<compile_context>
chip_gen: v6e
topology: v6e:2x2x1
jax: 0.10.0
libtpu: 0.0.40
codegen_flags: <defaults>
</compile_context>

<pallas_src>
import math

import jax
import jax.numpy as jnp
from jax.experimental import pallas as pl
from jax.experimental.pallas import tpu as pltpu


# ---------------------------------------------------------------------------
# Kernel factory: the whole TransC forward as one Pallas program.
# ---------------------------------------------------------------------------
def _make_transc_kernel(*, n_nodes, d_model, heads, n_layers, use_edge_proj):
    N, D, H, L = n_nodes, d_model, heads, n_layers
    C = D // H
    scale = 1.0 / math.sqrt(C)

    def kernel(*refs):
        out_ref = refs[-1]
        (xf_ref, s_src_ref, s_tgt_ref, s_tgt_t_ref, eattr_ref,
         lpw_ref, lpb_ref) = refs[:7]
        rest = refs[7:-1]
        if use_edge_proj:
            pew_ref, peb_ref = rest[0], rest[1]
            rest = rest[2:]
        wqkvs_ref, bqkvs_ref, we_ref, wbo_ref, wbs_ref = rest

        # Incidence matrices (built in the wrapper): S_src[e, j] = 1 iff src(e) == j,
        # S_tgt[e, i] = 1 iff tgt(e) == i.  s_tgt_t is the pre-transposed [N, E] copy.
        s_src = s_src_ref[...]          # [E, N]
        s_tgt = s_tgt_ref[...]          # [E, N]
        s_tgt_t = s_tgt_t_ref[...]      # [N, E]

        # Hoisted (shared by every layer / head): adjacency, mask bias, mean-aggr factor.
        adj = jnp.dot(s_tgt_t, s_src, preferred_element_type=jnp.float32)     # [N, N] 0/1
        mask_bias = (adj - 1.0) * 1e9                                          # 0 / -1e9
        deg = jnp.sum(adj, axis=-1, keepdims=True)                             # [N, 1]
        adj_over_deg = adj * pl.reciprocal(jnp.maximum(deg, 1.0), approx=True)

        # x = lp(data.x)
        x = jnp.dot(xf_ref[...], lpw_ref[...],
                    preferred_element_type=jnp.float32) + lpb_ref[...]         # [N, D]

        # e = relu(lp_edge_attr(edge_attr))   (computed once, reused by all 3 convs)
        e_used = eattr_ref[...]                                                # [E, edge_dim]
        if use_edge_proj:
            e_used = jnp.maximum(
                jnp.dot(e_used, pew_ref[...],
                        preferred_element_type=jnp.float32) + peb_ref[...], 0.0)

        for l in range(L):
            # Fused Q/K/V/skip projection: one [N, D] x [D, 4D] MXU op per layer.
            qkvs = jnp.dot(x, wqkvs_ref[l],
                           preferred_element_type=jnp.float32) + bqkvs_ref[l]  # [N, 4D]
            q = qkvs[:, 0 * D:1 * D]
            k = qkvs[:, 1 * D:2 * D]
            v = qkvs[:, 2 * D:3 * D]
            skip = qkvs[:, 3 * D:4 * D]

            # lin_edge: one flat [E, edge_dim] x [edge_dim, D] matmul per layer.
            ep = jnp.dot(e_used, we_ref[l],
                         preferred_element_type=jnp.float32)                   # [E, D]

            # Gather per-edge source keys / target queries via incidence matmuls.
            k_src = jnp.dot(s_src, k, preferred_element_type=jnp.float32)      # [E, D]
            q_tgt = jnp.dot(s_tgt, q, preferred_element_type=jnp.float32)      # [E, D]
            key_e = k_src + ep                                                 # k_j + e_ij
            qk_prod = q_tgt * key_e                                            # [E, D]

            head_outs = []
            for h in range(H):
                sl = slice(h * C, (h + 1) * C)
                # Per-edge attention logit for this head.
                alpha = jnp.sum(qk_prod[:, sl], axis=-1, keepdims=True) * scale  # [E, 1]
                # Scatter to a dense [N, N] score matrix (target x source) + mask.
                s = jnp.dot(s_tgt_t, s_src * alpha,
                            preferred_element_type=jnp.float32) + mask_bias
                # Masked softmax over source nodes (per target), folded with 1/deg.
                s = s - jnp.max(s, axis=-1, keepdims=True)
                p = jnp.exp(s)
                p = p * (adj_over_deg *
                         pl.reciprocal(jnp.sum(p, axis=-1, keepdims=True), approx=True))
                # Value message: alpha-weighted mean of (v_j + e_ij).
                msg = jnp.dot(p, v[:, sl], preferred_element_type=jnp.float32)   # [N, C]
                w = jnp.sum(jnp.dot(s_tgt, p, preferred_element_type=jnp.float32) * s_src,
                            axis=-1, keepdims=True)                              # [E, 1]
                msg = msg + jnp.dot(s_tgt_t, w * ep[:, sl],
                                    preferred_element_type=jnp.float32)
                head_outs.append(msg)

            attn = jnp.concatenate(head_outs, axis=-1)                           # [N, D]

            # beta gate: sigmoid(lin_beta([out, x_r, out - x_r])) with the [3D, 1] weight
            # folded (in the wrapper) into two [1, D] vectors.
            z = (jnp.sum(attn * wbo_ref[l], axis=-1, keepdims=True)
                 + jnp.sum(skip * wbs_ref[l], axis=-1, keepdims=True))           # [N, 1]
            beta = pl.reciprocal(1.0 + jnp.exp(-z), approx=True)
            y = beta * skip + (1.0 - beta) * attn

            # TransC more_skip: x = relu(x + conv_l(x))
            x = jnp.maximum(x + y, 0.0)

        out_ref[...] = x

    return kernel


# ---------------------------------------------------------------------------
# Wrapper: densify the graph once, fold weights, launch a single pallas_call.
# ---------------------------------------------------------------------------
def transc_forward(node_x, edge_index, edge_attr, params, *, heads):
    N = node_x.shape[0]
    D = params["lp_w"].shape[1]
    L = len(params["convs"])
    use_edge_proj = "pe_w" in params

    src = edge_index[0]
    tgt = edge_index[1]
    E = src.shape[0]
    E_pad = ((E + 7) // 8) * 8          # sublane-align the edge dimension
    ED = edge_attr.shape[1]

    # Dense incidence matrices (one-time preprocessing of the sparse edge list).
    eidx = jnp.arange(E)
    s_src = jnp.zeros((E_pad, N), jnp.float32).at[eidx, src].set(1.0)
    s_tgt = jnp.zeros((E_pad, N), jnp.float32).at[eidx, tgt].set(1.0)
    s_tgt_t = s_tgt.T
    e_attr_p = jnp.zeros((E_pad, ED), jnp.float32).at[:E, :].set(
        edge_attr.astype(jnp.float32))

    # Fold per-layer weights: Q/K/V/skip -> one [D, 4D]; beta [3D,1] -> two [1, D] rows.
    convs = params["convs"]
    wqkvs = jnp.stack([jnp.concatenate([c["Wq"], c["Wk"], c["Wv"], c["Ws"]], axis=1)
                       for c in convs])                                    # [L, D, 4D]
    bqkvs = jnp.stack([jnp.concatenate([c["bq"], c["bk"], c["bv"], c["bs"]], axis=1)
                       for c in convs])                                    # [L, 1, 4D]
    we = jnp.stack([c["We"] for c in convs])                               # [L, E_in, D]
    wbo = jnp.stack([(c["Wb"][:D, 0] + c["Wb"][2 * D:, 0])[None, :] for c in convs])
    wbs = jnp.stack([(c["Wb"][D:2 * D, 0] - c["Wb"][2 * D:, 0])[None, :] for c in convs])

    args = [node_x.astype(jnp.float32), s_src, s_tgt, s_tgt_t, e_attr_p,
            params["lp_w"], params["lp_b"]]
    if use_edge_proj:
        args += [params["pe_w"], params["pe_b"]]
    args += [wqkvs, bqkvs, we, wbo, wbs]

    kernel = _make_transc_kernel(n_nodes=N, d_model=D, heads=heads, n_layers=L,
                                 use_edge_proj=use_edge_proj)
    return pl.pallas_call(
        kernel,
        out_shape=jax.ShapeDtypeStruct((N, D), jnp.float32),
        in_specs=[pl.BlockSpec(memory_space=pltpu.MemorySpace.VMEM) for _ in args],
        out_specs=pl.BlockSpec(memory_space=pltpu.MemorySpace.VMEM),
        compiler_params=pltpu.CompilerParams(vmem_limit_bytes=32 * 1024 * 1024),
    )(*args)


# ---------------------------------------------------------------------------
# Deterministic synthetic parameters (torch.nn.Linear-style layout: y = x @ W + b).
# ---------------------------------------------------------------------------
def init_params(key, *, node_feat_dim, d_model, edge_dim, heads,
                project_edge_dim=None, n_layers=3):
    def linear(k, din, dout, bias=True):
        bound = 1.0 / math.sqrt(din)
        kw, kb = jax.random.split(k)
        w = jax.random.uniform(kw, (din, dout), jnp.float32, -bound, bound)
        b = (jax.random.uniform(kb, (1, dout), jnp.float32, -bound, bound)
             if bias else None)
        return w, b

    keys = jax.random.split(key, 2 + n_layers)
    p = {}
    p["lp_w"], p["lp_b"] = linear(keys[0], node_feat_dim, d_model)
    conv_edge_dim = edge_dim
    if project_edge_dim is not None:
        p["pe_w"], p["pe_b"] = linear(keys[1], edge_dim, project_edge_dim)
        conv_edge_dim = project_edge_dim
    convs = []
    for i in range(n_layers):
        ks = jax.random.split(keys[2 + i], 6)
        c = {}
        c["Wq"], c["bq"] = linear(ks[0], d_model, d_model)
        c["Wk"], c["bk"] = linear(ks[1], d_model, d_model)
        c["Wv"], c["bv"] = linear(ks[2], d_model, d_model)
        c["Ws"], c["bs"] = linear(ks[3], d_model, d_model)          # lin_skip (root weight)
        c["We"], _ = linear(ks[4], conv_edge_dim, d_model, bias=False)   # lin_edge
        c["Wb"], _ = linear(ks[5], 3 * d_model, 1, bias=False)           # lin_beta
        convs.append(c)
    p["convs"] = convs
    return p


# ---------------------------------------------------------------------------
# Pure-JAX reference (edge-list / segment-op formulation of PyG TransformerConv).
# ---------------------------------------------------------------------------
def _ref_transformer_conv(x, edge_index, e, c, heads):
    N, D = x.shape
    C = D // heads
    src, tgt = edge_index[0], edge_index[1]
    E = src.shape[0]
    q = (x @ c["Wq"] + c["bq"]).reshape(N, heads, C)
    k = (x @ c["Wk"] + c["bk"]).reshape(N, heads, C)
    v = (x @ c["Wv"] + c["bv"]).reshape(N, heads, C)
    ep = (e @ c["We"]).reshape(E, heads, C)
    k_j = k[src] + ep
    alpha = jnp.sum(q[tgt] * k_j, axis=-1) / math.sqrt(C)                 # [E, H]
    amax = jax.ops.segment_max(alpha, tgt, num_segments=N)
    ex = jnp.exp(alpha - amax[tgt])
    den = jax.ops.segment_sum(ex, tgt, num_segments=N)
    alpha = ex / den[tgt]
    msg = (v[src] + ep) * alpha[:, :, None]
    agg = jax.ops.segment_sum(msg, tgt, num_segments=N)
    cnt = jax.ops.segment_sum(jnp.ones((E,), jnp.float32), tgt, num_segments=N)
    agg = agg / jnp.maximum(cnt, 1.0)[:, None, None]                      # aggr='mean'
    out = agg.reshape(N, D)
    x_r = x @ c["Ws"] + c["bs"]
    beta = jax.nn.sigmoid(jnp.concatenate([out, x_r, out - x_r], axis=-1) @ c["Wb"])
    return beta * x_r + (1.0 - beta) * out


def _ref_transc(node_x, edge_index, edge_attr, params, *, heads):
    x = node_x @ params["lp_w"] + params["lp_b"]
    e = edge_attr
    if "pe_w" in params:
        e = jax.nn.relu(edge_attr @ params["pe_w"] + params["pe_b"])
    for c in params["convs"]:
        x = jax.nn.relu(x + _ref_transformer_conv(x, edge_index, e, c, heads))
    return x


# ---------------------------------------------------------------------------
if __name__ == "__main__":
    N_NODES, NODE_FEAT_DIM, D_MODEL, HEADS = 16, 16, 32, 4
    EDGE_DIM, PROJECT_EDGE_DIM = 16, 16

    key = jax.random.PRNGKey(0)
    k_x, k_e, k_p = jax.random.split(key, 3)

    node_x = jax.random.normal(k_x, (N_NODES, NODE_FEAT_DIM), jnp.float32)

    # Deterministic simple directed graph: no duplicate (src, tgt) pairs, no self loops.
    src, tgt = [], []
    for i in range(N_NODES):
        for off in (1, 2, 5):
            if off == 2 and i % 2 != 0:
                continue
            if off == 5 and i % 3 != 0:
                continue
            src.append((i + off) % N_NODES)
            tgt.append(i)
    edge_index = jnp.array([src, tgt], dtype=jnp.int32)        # [2, E], E = 30
    edge_attr = jax.random.normal(k_e, (edge_index.shape[1], EDGE_DIM), jnp.float32)

    params = init_params(k_p, node_feat_dim=NODE_FEAT_DIM, d_model=D_MODEL,
                         edge_dim=EDGE_DIM, heads=HEADS,
                         project_edge_dim=PROJECT_EDGE_DIM, n_layers=3)

    out = transc_forward(node_x, edge_index, edge_attr, params, heads=HEADS)
    out = jax.block_until_ready(out)

    ref = _ref_transc(node_x, edge_index, edge_attr, params, heads=HEADS)
    assert out.shape == (N_NODES, D_MODEL)
    max_err = float(jnp.max(jnp.abs(out - ref)))
    # Tolerance accounts for pl.reciprocal(approx=True) in softmax / mean / sigmoid.
    assert jnp.allclose(out, ref, atol=5e-3, rtol=5e-3), max_err

    # TODO(synk): last_average=True (head-averaged conv3), more_skip=False, and
    # training-mode attention dropout variants are not implemented (eval-mode defaults only).
    print("KERNEL_OK")
</pallas_src>

<mosaic_0001>
module attributes {stable_mosaic.version = 11 : i64} {
  func.func @kernel(%arg0: memref<16x16xf32, #tpu.memory_space<vmem>>, %arg1: memref<32x16xf32, #tpu.memory_space<vmem>>, %arg2: memref<32x16xf32, #tpu.memory_space<vmem>>, %arg3: memref<16x32xf32, #tpu.memory_space<vmem>>, %arg4: memref<32x16xf32, #tpu.memory_space<vmem>>, %arg5: memref<16x32xf32, #tpu.memory_space<vmem>>, %arg6: memref<1x32xf32, #tpu.memory_space<vmem>>, %arg7: memref<16x16xf32, #tpu.memory_space<vmem>>, %arg8: memref<1x16xf32, #tpu.memory_space<vmem>>, %arg9: memref<3x32x128xf32, #tpu.memory_space<vmem>>, %arg10: memref<3x1x128xf32, #tpu.memory_space<vmem>>, %arg11: memref<3x16x32xf32, #tpu.memory_space<vmem>>, %arg12: memref<3x1x32xf32, #tpu.memory_space<vmem>>, %arg13: memref<3x1x32xf32, #tpu.memory_space<vmem>>, %arg14: memref<16x32xf32, #tpu.memory_space<vmem>>) attributes {dimension_semantics = [], scalar_prefetch = 0 : i64, scratch_operands = 0 : i64, tpu.core_type = #tpu.core_type<tc>} {
    %c0 = arith.constant 0 : index
    %c0_0 = arith.constant 0 : index
    %0 = vector.load %arg1[%c0, %c0_0] : memref<32x16xf32, #tpu.memory_space<vmem>>, vector<32x16xf32>
    %c0_1 = arith.constant 0 : index
    %c0_2 = arith.constant 0 : index
    %1 = vector.load %arg2[%c0_1, %c0_2] : memref<32x16xf32, #tpu.memory_space<vmem>>, vector<32x16xf32>
    %c0_3 = arith.constant 0 : index
    %c0_4 = arith.constant 0 : index
    %2 = vector.load %arg3[%c0_3, %c0_4] : memref<16x32xf32, #tpu.memory_space<vmem>>, vector<16x32xf32>
    %cst = arith.constant dense<0.000000e+00> : vector<16x16xf32>
    %3 = tpu.matmul %2, %0, %cst {dimension_numbers = #tpu.dot_dimension_numbers<[1], [0], [0], [1], [0, 0, 1, 1], [], []>} : vector<16x32xf32>, vector<32x16xf32>, vector<16x16xf32> -> vector<16x16xf32>
    %cst_5 = arith.constant 1.000000e+00 : f32
    %4 = vector.broadcast %cst_5 : f32 to vector<16x16xf32>
    %5 = arith.subf %3, %4 : vector<16x16xf32>
    %cst_6 = arith.constant 1.000000e+09 : f32
    %6 = vector.broadcast %cst_6 : f32 to vector<16x16xf32>
    %7 = arith.mulf %5, %6 : vector<16x16xf32>
    %cst_7 = arith.constant dense<0.000000e+00> : vector<16xf32>
    %8 = vector.multi_reduction <add>, %3, %cst_7 [1] : vector<16x16xf32> to vector<16xf32>
    %9 = vector.shape_cast %8 : vector<16xf32> to vector<16x1xf32>
    %cst_8 = arith.constant 1.000000e+00 : f32
    %10 = vector.broadcast %cst_8 : f32 to vector<16x1xf32>
    %11 = arith.maximumf %9, %10 : vector<16x1xf32>
    %12 = tpu.reciprocal %11 {approx = true} : vector<16x1xf32> -> vector<16x1xf32>
    %13 = vector.broadcast %12 : vector<16x1xf32> to vector<16x16xf32>
    %14 = arith.mulf %3, %13 : vector<16x16xf32>
    %c0_9 = arith.constant 0 : index
    %c0_10 = arith.constant 0 : index
    %15 = vector.load %arg0[%c0_9, %c0_10] : memref<16x16xf32, #tpu.memory_space<vmem>>, vector<16x16xf32>
    %c0_11 = arith.constant 0 : index
    %c0_12 = arith.constant 0 : index
    %16 = vector.load %arg5[%c0_11, %c0_12] : memref<16x32xf32, #tpu.memory_space<vmem>>, vector<16x32xf32>
    %cst_13 = arith.constant dense<0.000000e+00> : vector<16x32xf32>
    %17 = tpu.matmul %15, %16, %cst_13 {dimension_numbers = #tpu.dot_dimension_numbers<[1], [0], [0], [1], [0, 0, 1, 1], [], []>} : vector<16x16xf32>, vector<16x32xf32>, vector<16x32xf32> -> vector<16x32xf32>
    %c0_14 = arith.constant 0 : index
    %c0_15 = arith.constant 0 : index
    %18 = vector.load %arg6[%c0_14, %c0_15] : memref<1x32xf32, #tpu.memory_space<vmem>>, vector<1x32xf32>
    %19 = vector.broadcast %18 : vector<1x32xf32> to vector<16x32xf32>
    %20 = arith.addf %17, %19 : vector<16x32xf32>
    %c0_16 = arith.constant 0 : index
    %c0_17 = arith.constant 0 : index
    %21 = vector.load %arg4[%c0_16, %c0_17] : memref<32x16xf32, #tpu.memory_space<vmem>>, vector<32x16xf32>
    %c0_18 = arith.constant 0 : index
    %c0_19 = arith.constant 0 : index
    %22 = vector.load %arg7[%c0_18, %c0_19] : memref<16x16xf32, #tpu.memory_space<vmem>>, vector<16x16xf32>
    %cst_20 = arith.constant dense<0.000000e+00> : vector<32x16xf32>
    %23 = tpu.matmul %21, %22, %cst_20 {dimension_numbers = #tpu.dot_dimension_numbers<[1], [0], [0], [1], [0, 0, 1, 1], [], []>} : vector<32x16xf32>, vector<16x16xf32>, vector<32x16xf32> -> vector<32x16xf32>
    %c0_21 = arith.constant 0 : index
    %c0_22 = arith.constant 0 : index
    %24 = vector.load %arg8[%c0_21, %c0_22] : memref<1x16xf32, #tpu.memory_space<vmem>>, vector<1x16xf32>
    %25 = vector.broadcast %24 : vector<1x16xf32> to vector<32x16xf32>
    %26 = arith.addf %23, %25 : vector<32x16xf32>
    %cst_23 = arith.constant 0.000000e+00 : f32
    %27 = vector.broadcast %cst_23 : f32 to vector<32x16xf32>
    %28 = arith.maximumf %26, %27 : vector<32x16xf32>
    %c0_24 = arith.constant 0 : index
    %c0_25 = arith.constant 0 : index
    %c0_26 = arith.constant 0 : index
    %29 = vector.load %arg9[%c0_24, %c0_25, %c0_26] : memref<3x32x128xf32, #tpu.memory_space<vmem>>, vector<1x32x128xf32>
    %30 = vector.shape_cast %29 : vector<1x32x128xf32> to vector<32x128xf32>
    %cst_27 = arith.constant dense<0.000000e+00> : vector<16x128xf32>
    %31 = tpu.matmul %20, %30, %cst_27 {dimension_numbers = #tpu.dot_dimension_numbers<[1], [0], [0], [1], [0, 0, 1, 1], [], []>} : vector<16x32xf32>, vector<32x128xf32>, vector<16x128xf32> -> vector<16x128xf32>
    %c0_28 = arith.constant 0 : index
    %c0_29 = arith.constant 0 : index
    %c0_30 = arith.constant 0 : index
    %32 = vector.load %arg10[%c0_28, %c0_29, %c0_30] : memref<3x1x128xf32, #tpu.memory_space<vmem>>, vector<1x1x128xf32>
    %33 = vector.shape_cast %32 : vector<1x1x128xf32> to vector<1x128xf32>
    %34 = vector.broadcast %33 : vector<1x128xf32> to vector<16x128xf32>
    %35 = arith.addf %31, %34 : vector<16x128xf32>
    %36 = vector.extract_strided_slice %35 {offsets = [0, 0], sizes = [16, 32], strides = [1, 1]} : vector<16x128xf32> to vector<16x32xf32>
    %37 = vector.extract_strided_slice %35 {offsets = [0, 32], sizes = [16, 32], strides = [1, 1]} : vector<16x128xf32> to vector<16x32xf32>
    %38 = vector.extract_strided_slice %35 {offsets = [0, 64], sizes = [16, 32], strides = [1, 1]} : vector<16x128xf32> to vector<16x32xf32>
    %39 = vector.extract_strided_slice %35 {offsets = [0, 96], sizes = [16, 32], strides = [1, 1]} : vector<16x128xf32> to vector<16x32xf32>
    %c0_31 = arith.constant 0 : index
    %c0_32 = arith.constant 0 : index
    %c0_33 = arith.constant 0 : index
    %40 = vector.load %arg11[%c0_31, %c0_32, %c0_33] : memref<3x16x32xf32, #tpu.memory_space<vmem>>, vector<1x16x32xf32>
    %41 = vector.shape_cast %40 : vector<1x16x32xf32> to vector<16x32xf32>
    %cst_34 = arith.constant dense<0.000000e+00> : vector<32x32xf32>
    %42 = tpu.matmul %28, %41, %cst_34 {dimension_numbers = #tpu.dot_dimension_numbers<[1], [0], [0], [1], [0, 0, 1, 1], [], []>} : vector<32x16xf32>, vector<16x32xf32>, vector<32x32xf32> -> vector<32x32xf32>
    %cst_35 = arith.constant dense<0.000000e+00> : vector<32x32xf32>
    %43 = tpu.matmul %0, %37, %cst_35 {dimension_numbers = #tpu.dot_dimension_numbers<[1], [0], [0], [1], [0, 0, 1, 1], [], []>} : vector<32x16xf32>, vector<16x32xf32>, vector<32x32xf32> -> vector<32x32xf32>
    %cst_36 = arith.constant dense<0.000000e+00> : vector<32x32xf32>
    %44 = tpu.matmul %1, %36, %cst_36 {dimension_numbers = #tpu.dot_dimension_numbers<[1], [0], [0], [1], [0, 0, 1, 1], [], []>} : vector<32x16xf32>, vector<16x32xf32>, vector<32x32xf32> -> vector<32x32xf32>
    %45 = arith.addf %43, %42 : vector<32x32xf32>
    %46 = arith.mulf %44, %45 : vector<32x32xf32>
    %47 = vector.extract_strided_slice %46 {offsets = [0, 0], sizes = [32, 8], strides = [1, 1]} : vector<32x32xf32> to vector<32x8xf32>
    %cst_37 = arith.constant dense<0.000000e+00> : vector<32xf32>
    %48 = vector.multi_reduction <add>, %47, %cst_37 [1] : vector<32x8xf32> to vector<32xf32>
    %49 = vector.shape_cast %48 : vector<32xf32> to vector<32x1xf32>
    %cst_38 = arith.constant 0.353553385 : f32
    %50 = vector.broadcast %cst_38 : f32 to vector<32x1xf32>
    %51 = arith.mulf %49, %50 : vector<32x1xf32>
    %52 = vector.broadcast %51 : vector<32x1xf32> to vector<32x16xf32>
    %53 = arith.mulf %0, %52 : vector<32x16xf32>
    %cst_39 = arith.constant dense<0.000000e+00> : vector<16x16xf32>
    %54 = tpu.matmul %2, %53, %cst_39 {dimension_numbers = #tpu.dot_dimension_numbers<[1], [0], [0], [1], [0, 0, 1, 1], [], []>} : vector<16x32xf32>, vector<32x16xf32>, vector<16x16xf32> -> vector<16x16xf32>
    %55 = arith.addf %54, %7 : vector<16x16xf32>
    %cst_40 = arith.constant dense<0xFF800000> : vector<16xf32>
    %56 = vector.multi_reduction <maximumf>, %55, %cst_40 [1] : vector<16x16xf32> to vector<16xf32>
    %57 = vector.shape_cast %56 : vector<16xf32> to vector<16x1xf32>
    %58 = vector.broadcast %57 : vector<16x1xf32> to vector<16x16xf32>
    %59 = arith.subf %55, %58 : vector<16x16xf32>
    %60 = math.exp %59 : vector<16x16xf32>
    %cst_41 = arith.constant dense<0.000000e+00> : vector<16xf32>
    %61 = vector.multi_reduction <add>, %60, %cst_41 [1] : vector<16x16xf32> to vector<16xf32>
    %62 = vector.shape_cast %61 : vector<16xf32> to vector<16x1xf32>
    %63 = tpu.reciprocal %62 {approx = true} : vector<16x1xf32> -> vector<16x1xf32>
    %64 = vector.broadcast %63 : vector<16x1xf32> to vector<16x16xf32>
    %65 = arith.mulf %14, %64 : vector<16x16xf32>
    %66 = arith.mulf %60, %65 : vector<16x16xf32>
    %67 = vector.extract_strided_slice %38 {offsets = [0, 0], sizes = [16, 8], strides = [1, 1]} : vector<16x32xf32> to vector<16x8xf32>
    %cst_42 = arith.constant dense<0.000000e+00> : vector<16x8xf32>
    %68 = tpu.matmul %66, %67, %cst_42 {dimension_numbers = #tpu.dot_dimension_numbers<[1], [0], [0], [1], [0, 0, 1, 1], [], []>} : vector<16x16xf32>, vector<16x8xf32>, vector<16x8xf32> -> vector<16x8xf32>
    %cst_43 = arith.constant dense<0.000000e+00> : vector<32x16xf32>
    %69 = tpu.matmul %1, %66, %cst_43 {dimension_numbers = #tpu.dot_dimension_numbers<[1], [0], [0], [1], [0, 0, 1, 1], [], []>} : vector<32x16xf32>, vector<16x16xf32>, vector<32x16xf32> -> vector<32x16xf32>
    %70 = arith.mulf %69, %0 : vector<32x16xf32>
    %cst_44 = arith.constant dense<0.000000e+00> : vector<32xf32>
    %71 = vector.multi_reduction <add>, %70, %cst_44 [1] : vector<32x16xf32> to vector<32xf32>
    %72 = vector.shape_cast %71 : vector<32xf32> to vector<32x1xf32>
    %73 = vector.extract_strided_slice %42 {offsets = [0, 0], sizes = [32, 8], strides = [1, 1]} : vector<32x32xf32> to vector<32x8xf32>
    %74 = vector.broadcast %72 : vector<32x1xf32> to vector<32x8xf32>
    %75 = arith.mulf %74, %73 : vector<32x8xf32>
    %cst_45 = arith.constant dense<0.000000e+00> : vector<16x8xf32>
    %76 = tpu.matmul %2, %75, %cst_45 {dimension_numbers = #tpu.dot_dimension_numbers<[1], [0], [0], [1], [0, 0, 1, 1], [], []>} : vector<16x32xf32>, vector<32x8xf32>, vector<16x8xf32> -> vector<16x8xf32>
    %77 = arith.addf %68, %76 : vector<16x8xf32>
    %78 = vector.extract_strided_slice %46 {offsets = [0, 8], sizes = [32, 8], strides = [1, 1]} : vector<32x32xf32> to vector<32x8xf32>
    %cst_46 = arith.constant dense<0.000000e+00> : vector<32xf32>
    %79 = vector.multi_reduction <add>, %78, %cst_46 [1] : vector<32x8xf32> to vector<32xf32>
    %80 = vector.shape_cast %79 : vector<32xf32> to vector<32x1xf32>
    %cst_47 = arith.constant 0.353553385 : f32
    %81 = vector.broadcast %cst_47 : f32 to vector<32x1xf32>
    %82 = arith.mulf %80, %81 : vector<32x1xf32>
    %83 = vector.broadcast %82 : vector<32x1xf32> to vector<32x16xf32>
    %84 = arith.mulf %0, %83 : vector<32x16xf32>
    %cst_48 = arith.constant dense<0.000000e+00> : vector<16x16xf32>
    %85 = tpu.matmul %2, %84, %cst_48 {dimension_numbers = #tpu.dot_dimension_numbers<[1], [0], [0], [1], [0, 0, 1, 1], [], []>} : vector<16x32xf32>, vector<32x16xf32>, vector<16x16xf32> -> vector<16x16xf32>
    %86 = arith.addf %85, %7 : vector<16x16xf32>
    %cst_49 = arith.constant dense<0xFF800000> : vector<16xf32>
    %87 = vector.multi_reduction <maximumf>, %86, %cst_49 [1] : vector<16x16xf32> to vector<16xf32>
    %88 = vector.shape_cast %87 : vector<16xf32> to vector<16x1xf32>
    %89 = vector.broadcast %88 : vector<16x1xf32> to vector<16x16xf32>
    %90 = arith.subf %86, %89 : vector<16x16xf32>
    %91 = math.exp %90 : vector<16x16xf32>
    %cst_50 = arith.constant dense<0.000000e+00> : vector<16xf32>
    %92 = vector.multi_reduction <add>, %91, %cst_50 [1] : vector<16x16xf32> to vector<16xf32>
    %93 = vector.shape_cast %92 : vector<16xf32> to vector<16x1xf32>
    %94 = tpu.reciprocal %93 {approx = true} : vector<16x1xf32> -> vector<16x1xf32>
    %95 = vector.broadcast %94 : vector<16x1xf32> to vector<16x16xf32>
    %96 = arith.mulf %14, %95 : vector<16x16xf32>
    %97 = arith.mulf %91, %96 : vector<16x16xf32>
    %98 = vector.extract_strided_slice %38 {offsets = [0, 8], sizes = [16, 8], strides = [1, 1]} : vector<16x32xf32> to vector<16x8xf32>
    %cst_51 = arith.constant dense<0.000000e+00> : vector<16x8xf32>
    %99 = tpu.matmul %97, %98, %cst_51 {dimension_numbers = #tpu.dot_dimension_numbers<[1], [0], [0], [1], [0, 0, 1, 1], [], []>} : vector<16x16xf32>, vector<16x8xf32>, vector<16x8xf32> -> vector<16x8xf32>
    %cst_52 = arith.constant dense<0.000000e+00> : vector<32x16xf32>
    %100 = tpu.matmul %1, %97, %cst_52 {dimension_numbers = #tpu.dot_dimension_numbers<[1], [0], [0], [1], [0, 0, 1, 1], [], []>} : vector<32x16xf32>, vector<16x16xf32>, vector<32x16xf32> -> vector<32x16xf32>
    %101 = arith.mulf %100, %0 : vector<32x16xf32>
    %cst_53 = arith.constant dense<0.000000e+00> : vector<32xf32>
    %102 = vector.multi_reduction <add>, %101, %cst_53 [1] : vector<32x16xf32> to vector<32xf32>
    %103 = vector.shape_cast %102 : vector<32xf32> to vector<32x1xf32>
    %104 = vector.extract_strided_slice %42 {offsets = [0, 8], sizes = [32, 8], strides = [1, 1]} : vector<32x32xf32> to vector<32x8xf32>
    %105 = vector.broadcast %103 : vector<32x1xf32> to vector<32x8xf32>
    %106 = arith.mulf %105, %104 : vector<32x8xf32>
    %cst_54 = arith.constant dense<0.000000e+00> : vector<16x8xf32>
    %107 = tpu.matmul %2, %106, %cst_54 {dimension_numbers = #tpu.dot_dimension_numbers<[1], [0], [0], [1], [0, 0, 1, 1], [], []>} : vector<16x32xf32>, vector<32x8xf32>, vector<16x8xf32> -> vector<16x8xf32>
    %108 = arith.addf %99, %107 : vector<16x8xf32>
    %109 = vector.extract_strided_slice %46 {offsets = [0, 16], sizes = [32, 8], strides = [1, 1]} : vector<32x32xf32> to vector<32x8xf32>
    %cst_55 = arith.constant dense<0.000000e+00> : vector<32xf32>
    %110 = vector.multi_reduction <add>, %109, %cst_55 [1] : vector<32x8xf32> to vector<32xf32>
    %111 = vector.shape_cast %110 : vector<32xf32> to vector<32x1xf32>
    %cst_56 = arith.constant 0.353553385 : f32
    %112 = vector.broadcast %cst_56 : f32 to vector<32x1xf32>
    %113 = arith.mulf %111, %112 : vector<32x1xf32>
    %114 = vector.broadcast %113 : vector<32x1xf32> to vector<32x16xf32>
    %115 = arith.mulf %0, %114 : vector<32x16xf32>
    %cst_57 = arith.constant dense<0.000000e+00> : vector<16x16xf32>
    %116 = tpu.matmul %2, %115, %cst_57 {dimension_numbers = #tpu.dot_dimension_numbers<[1], [0], [0], [1], [0, 0, 1, 1], [], []>} : vector<16x32xf32>, vector<32x16xf32>, vector<16x16xf32> -> vector<16x16xf32>
    %117 = arith.addf %116, %7 : vector<16x16xf32>
    %cst_58 = arith.constant dense<0xFF800000> : vector<16xf32>
    %118 = vector.multi_reduction <maximumf>, %117, %cst_58 [1] : vector<16x16xf32> to vector<16xf32>
    %119 = vector.shape_cast %118 : vector<16xf32> to vector<16x1xf32>
    %120 = vector.broadcast %119 : vector<16x1xf32> to vector<16x16xf32>
    %121 = arith.subf %117, %120 : vector<16x16xf32>
    %122 = math.exp %121 : vector<16x16xf32>
    %cst_59 = arith.constant dense<0.000000e+00> : vector<16xf32>
    %123 = vector.multi_reduction <add>, %122, %cst_59 [1] : vector<16x16xf32> to vector<16xf32>
    %124 = vector.shape_cast %123 : vector<16xf32> to vector<16x1xf32>
    %125 = tpu.reciprocal %124 {approx = true} : vector<16x1xf32> -> vector<16x1xf32>
    %126 = vector.broadcast %125 : vector<16x1xf32> to vector<16x16xf32>
    %127 = arith.mulf %14, %126 : vector<16x16xf32>
    %128 = arith.mulf %122, %127 : vector<16x16xf32>
    %129 = vector.extract_strided_slice %38 {offsets = [0, 16], sizes = [16, 8], strides = [1, 1]} : vector<16x32xf32> to vector<16x8xf32>
    %cst_60 = arith.constant dense<0.000000e+00> : vector<16x8xf32>
    %130 = tpu.matmul %128, %129, %cst_60 {dimension_numbers = #tpu.dot_dimension_numbers<[1], [0], [0], [1], [0, 0, 1, 1], [], []>} : vector<16x16xf32>, vector<16x8xf32>, vector<16x8xf32> -> vector<16x8xf32>
    %cst_61 = arith.constant dense<0.000000e+00> : vector<32x16xf32>
    %131 = tpu.matmul %1, %128, %cst_61 {dimension_numbers = #tpu.dot_dimension_numbers<[1], [0], [0], [1], [0, 0, 1, 1], [], []>} : vector<32x16xf32>, vector<16x16xf32>, vector<32x16xf32> -> vector<32x16xf32>
    %132 = arith.mulf %131, %0 : vector<32x16xf32>
    %cst_62 = arith.constant dense<0.000000e+00> : vector<32xf32>
    %133 = vector.multi_reduction <add>, %132, %cst_62 [1] : vector<32x16xf32> to vector<32xf32>
    %134 = vector.shape_cast %133 : vector<32xf32> to vector<32x1xf32>
    %135 = vector.extract_strided_slice %42 {offsets = [0, 16], sizes = [32, 8], strides = [1, 1]} : vector<32x32xf32> to vector<32x8xf32>
    %136 = vector.broadcast %134 : vector<32x1xf32> to vector<32x8xf32>
    %137 = arith.mulf %136, %135 : vector<32x8xf32>
    %cst_63 = arith.constant dense<0.000000e+00> : vector<16x8xf32>
    %138 = tpu.matmul %2, %137, %cst_63 {dimension_numbers = #tpu.dot_dimension_numbers<[1], [0], [0], [1], [0, 0, 1, 1], [], []>} : vector<16x32xf32>, vector<32x8xf32>, vector<16x8xf32> -> vector<16x8xf32>
    %139 = arith.addf %130, %138 : vector<16x8xf32>
    %140 = vector.extract_strided_slice %46 {offsets = [0, 24], sizes = [32, 8], strides = [1, 1]} : vector<32x32xf32> to vector<32x8xf32>
    %cst_64 = arith.constant dense<0.000000e+00> : vector<32xf32>
    %141 = vector.multi_reduction <add>, %140, %cst_64 [1] : vector<32x8xf32> to vector<32xf32>
    %142 = vector.shape_cast %141 : vector<32xf32> to vector<32x1xf32>
    %cst_65 = arith.constant 0.353553385 : f32
    %143 = vector.broadcast %cst_65 : f32 to vector<32x1xf32>
    %144 = arith.mulf %142, %143 : vector<32x1xf32>
    %145 = vector.broadcast %144 : vector<32x1xf32> to vector<32x16xf32>
    %146 = arith.mulf %0, %145 : vector<32x16xf32>
    %cst_66 = arith.constant dense<0.000000e+00> : vector<16x16xf32>
    %147 = tpu.matmul %2, %146, %cst_66 {dimension_numbers = #tpu.dot_dimension_numbers<[1], [0], [0], [1], [0, 0, 1, 1], [], []>} : vector<16x32xf32>, vector<32x16xf32>, vector<16x16xf32> -> vector<16x16xf32>
    %148 = arith.addf %147, %7 : vector<16x16xf32>
    %cst_67 = arith.constant dense<0xFF800000> : vector<16xf32>
    %149 = vector.multi_reduction <maximumf>, %148, %cst_67 [1] : vector<16x16xf32> to vector<16xf32>
    %150 = vector.shape_cast %149 : vector<16xf32> to vector<16x1xf32>
    %151 = vector.broadcast %150 : vector<16x1xf32> to vector<16x16xf32>
    %152 = arith.subf %148, %151 : vector<16x16xf32>
    %153 = math.exp %152 : vector<16x16xf32>
    %cst_68 = arith.constant dense<0.000000e+00> : vector<16xf32>
    %154 = vector.multi_reduction <add>, %153, %cst_68 [1] : vector<16x16xf32> to vector<16xf32>
    %155 = vector.shape_cast %154 : vector<16xf32> to vector<16x1xf32>
    %156 = tpu.reciprocal %155 {approx = true} : vector<16x1xf32> -> vector<16x1xf32>
    %157 = vector.broadcast %156 : vector<16x1xf32> to vector<16x16xf32>
    %158 = arith.mulf %14, %157 : vector<16x16xf32>
    %159 = arith.mulf %153, %158 : vector<16x16xf32>
    %160 = vector.extract_strided_slice %38 {offsets = [0, 24], sizes = [16, 8], strides = [1, 1]} : vector<16x32xf32> to vector<16x8xf32>
    %cst_69 = arith.constant dense<0.000000e+00> : vector<16x8xf32>
    %161 = tpu.matmul %159, %160, %cst_69 {dimension_numbers = #tpu.dot_dimension_numbers<[1], [0], [0], [1], [0, 0, 1, 1], [], []>} : vector<16x16xf32>, vector<16x8xf32>, vector<16x8xf32> -> vector<16x8xf32>
    %cst_70 = arith.constant dense<0.000000e+00> : vector<32x16xf32>
    %162 = tpu.matmul %1, %159, %cst_70 {dimension_numbers = #tpu.dot_dimension_numbers<[1], [0], [0], [1], [0, 0, 1, 1], [], []>} : vector<32x16xf32>, vector<16x16xf32>, vector<32x16xf32> -> vector<32x16xf32>
    %163 = arith.mulf %162, %0 : vector<32x16xf32>
    %cst_71 = arith.constant dense<0.000000e+00> : vector<32xf32>
    %164 = vector.multi_reduction <add>, %163, %cst_71 [1] : vector<32x16xf32> to vector<32xf32>
    %165 = vector.shape_cast %164 : vector<32xf32> to vector<32x1xf32>
    %166 = vector.extract_strided_slice %42 {offsets = [0, 24], sizes = [32, 8], strides = [1, 1]} : vector<32x32xf32> to vector<32x8xf32>
    %167 = vector.broadcast %165 : vector<32x1xf32> to vector<32x8xf32>
    %168 = arith.mulf %167, %166 : vector<32x8xf32>
    %cst_72 = arith.constant dense<0.000000e+00> : vector<16x8xf32>
    %169 = tpu.matmul %2, %168, %cst_72 {dimension_numbers = #tpu.dot_dimension_numbers<[1], [0], [0], [1], [0, 0, 1, 1], [], []>} : vector<16x32xf32>, vector<32x8xf32>, vector<16x8xf32> -> vector<16x8xf32>
    %170 = arith.addf %161, %169 : vector<16x8xf32>
    %171 = tpu.concatenate %77, %108, %139, %170 in 1 : vector<16x8xf32>, vector<16x8xf32>, vector<16x8xf32>, vector<16x8xf32> -> vector<16x32xf32>
    %c0_73 = arith.constant 0 : index
    %c0_74 = arith.constant 0 : index
    %c0_75 = arith.constant 0 : index
    %172 = vector.load %arg12[%c0_73, %c0_74, %c0_75] : memref<3x1x32xf32, #tpu.memory_space<vmem>>, vector<1x1x32xf32>
    %173 = vector.shape_cast %172 : vector<1x1x32xf32> to vector<1x32xf32>
    %174 = vector.broadcast %173 : vector<1x32xf32> to vector<16x32xf32>
    %175 = arith.mulf %171, %174 : vector<16x32xf32>
    %cst_76 = arith.constant dense<0.000000e+00> : vector<16xf32>
    %176 = vector.multi_reduction <add>, %175, %cst_76 [1] : vector<16x32xf32> to vector<16xf32>
    %177 = vector.shape_cast %176 : vector<16xf32> to vector<16x1xf32>
    %c0_77 = arith.constant 0 : index
    %c0_78 = arith.constant 0 : index
    %c0_79 = arith.constant 0 : index
    %178 = vector.load %arg13[%c0_77, %c0_78, %c0_79] : memref<3x1x32xf32, #tpu.memory_space<vmem>>, vector<1x1x32xf32>
    %179 = vector.shape_cast %178 : vector<1x1x32xf32> to vector<1x32xf32>
    %180 = vector.broadcast %179 : vector<1x32xf32> to vector<16x32xf32>
    %181 = arith.mulf %39, %180 : vector<16x32xf32>
    %cst_80 = arith.constant dense<0.000000e+00> : vector<16xf32>
    %182 = vector.multi_reduction <add>, %181, %cst_80 [1] : vector<16x32xf32> to vector<16xf32>
    %183 = vector.shape_cast %182 : vector<16xf32> to vector<16x1xf32>
    %184 = arith.addf %177, %183 : vector<16x1xf32>
    %cst_81 = arith.constant 0.000000e+00 : f32
    %185 = vector.broadcast %cst_81 : f32 to vector<16x1xf32>
    %186 = arith.subf %185, %184 : vector<16x1xf32>
    %187 = math.exp %186 : vector<16x1xf32>
    %cst_82 = arith.constant 1.000000e+00 : f32
    %188 = vector.broadcast %cst_82 : f32 to vector<16x1xf32>
    %189 = arith.addf %188, %187 : vector<16x1xf32>
    %190 = tpu.reciprocal %189 {approx = true} : vector<16x1xf32> -> vector<16x1xf32>
    %191 = vector.broadcast %190 : vector<16x1xf32> to vector<16x32xf32>
    %192 = arith.mulf %191, %39 : vector<16x32xf32>
    %cst_83 = arith.constant 1.000000e+00 : f32
    %193 = vector.broadcast %cst_83 : f32 to vector<16x1xf32>
    %194 = arith.subf %193, %190 : vector<16x1xf32>
    %195 = vector.broadcast %194 : vector<16x1xf32> to vector<16x32xf32>
    %196 = arith.mulf %195, %171 : vector<16x32xf32>
    %197 = arith.addf %192, %196 : vector<16x32xf32>
    %198 = arith.addf %20, %197 : vector<16x32xf32>
    %cst_84 = arith.constant 0.000000e+00 : f32
    %199 = vector.broadcast %cst_84 : f32 to vector<16x32xf32>
    %200 = arith.maximumf %198, %199 : vector<16x32xf32>
    %c1 = arith.constant 1 : index
    %c0_85 = arith.constant 0 : index
    %c0_86 = arith.constant 0 : index
    %201 = vector.load %arg9[%c1, %c0_85, %c0_86] : memref<3x32x128xf32, #tpu.memory_space<vmem>>, vector<1x32x128xf32>
    %202 = vector.shape_cast %201 : vector<1x32x128xf32> to vector<32x128xf32>
    %cst_87 = arith.constant dense<0.000000e+00> : vector<16x128xf32>
    %203 = tpu.matmul %200, %202, %cst_87 {dimension_numbers = #tpu.dot_dimension_numbers<[1], [0], [0], [1], [0, 0, 1, 1], [], []>} : vector<16x32xf32>, vector<32x128xf32>, vector<16x128xf32> -> vector<16x128xf32>
    %c1_88 = arith.constant 1 : index
    %c0_89 = arith.constant 0 : index
    %c0_90 = arith.constant 0 : index
    %204 = vector.load %arg10[%c1_88, %c0_89, %c0_90] : memref<3x1x128xf32, #tpu.memory_space<vmem>>, vector<1x1x128xf32>
    %205 = vector.shape_cast %204 : vector<1x1x128xf32> to vector<1x128xf32>
    %206 = vector.broadcast %205 : vector<1x128xf32> to vector<16x128xf32>
    %207 = arith.addf %203, %206 : vector<16x128xf32>
    %208 = vector.extract_strided_slice %207 {offsets = [0, 0], sizes = [16, 32], strides = [1, 1]} : vector<16x128xf32> to vector<16x32xf32>
    %209 = vector.extract_strided_slice %207 {offsets = [0, 32], sizes = [16, 32], strides = [1, 1]} : vector<16x128xf32> to vector<16x32xf32>
    %210 = vector.extract_strided_slice %207 {offsets = [0, 64], sizes = [16, 32], strides = [1, 1]} : vector<16x128xf32> to vector<16x32xf32>
    %211 = vector.extract_strided_slice %207 {offsets = [0, 96], sizes = [16, 32], strides = [1, 1]} : vector<16x128xf32> to vector<16x32xf32>
    %c1_91 = arith.constant 1 : index
    %c0_92 = arith.constant 0 : index
    %c0_93 = arith.constant 0 : index
    %212 = vector.load %arg11[%c1_91, %c0_92, %c0_93] : memref<3x16x32xf32, #tpu.memory_space<vmem>>, vector<1x16x32xf32>
    %213 = vector.shape_cast %212 : vector<1x16x32xf32> to vector<16x32xf32>
    %cst_94 = arith.constant dense<0.000000e+00> : vector<32x32xf32>
    %214 = tpu.matmul %28, %213, %cst_94 {dimension_numbers = #tpu.dot_dimension_numbers<[1], [0], [0], [1], [0, 0, 1, 1], [], []>} : vector<32x16xf32>, vector<16x32xf32>, vector<32x32xf32> -> vector<32x32xf32>
    %cst_95 = arith.constant dense<0.000000e+00> : vector<32x32xf32>
    %215 = tpu.matmul %0, %209, %cst_95 {dimension_numbers = #tpu.dot_dimension_numbers<[1], [0], [0], [1], [0, 0, 1, 1], [], []>} : vector<32x16xf32>, vector<16x32xf32>, vector<32x32xf32> -> vector<32x32xf32>
    %cst_96 = arith.constant dense<0.000000e+00> : vector<32x32xf32>
    %216 = tpu.matmul %1, %208, %cst_96 {dimension_numbers = #tpu.dot_dimension_numbers<[1], [0], [0], [1], [0, 0, 1, 1], [], []>} : vector<32x16xf32>, vector<16x32xf32>, vector<32x32xf32> -> vector<32x32xf32>
    %217 = arith.addf %215, %214 : vector<32x32xf32>
    %218 = arith.mulf %216, %217 : vector<32x32xf32>
    %219 = vector.extract_strided_slice %218 {offsets = [0, 0], sizes = [32, 8], strides = [1, 1]} : vector<32x32xf32> to vector<32x8xf32>
    %cst_97 = arith.constant dense<0.000000e+00> : vector<32xf32>
    %220 = vector.multi_reduction <add>, %219, %cst_97 [1] : vector<32x8xf32> to vector<32xf32>
    %221 = vector.shape_cast %220 : vector<32xf32> to vector<32x1xf32>
    %cst_98 = arith.constant 0.353553385 : f32
    %222 = vector.broadcast %cst_98 : f32 to vector<32x1xf32>
    %223 = arith.mulf %221, %222 : vector<32x1xf32>
    %224 = vector.broadcast %223 : vector<32x1xf32> to vector<32x16xf32>
    %225 = arith.mulf %0, %224 : vector<32x16xf32>
    %cst_99 = arith.constant dense<0.000000e+00> : vector<16x16xf32>
    %226 = tpu.matmul %2, %225, %cst_99 {dimension_numbers = #tpu.dot_dimension_numbers<[1], [0], [0], [1], [0, 0, 1, 1], [], []>} : vector<16x32xf32>, vector<32x16xf32>, vector<16x16xf32> -> vector<16x16xf32>
    %227 = arith.addf %226, %7 : vector<16x16xf32>
    %cst_100 = arith.constant dense<0xFF800000> : vector<16xf32>
    %228 = vector.multi_reduction <maximumf>, %227, %cst_100 [1] : vector<16x16xf32> to vector<16xf32>
    %229 = vector.shape_cast %228 : vector<16xf32> to vector<16x1xf32>
    %230 = vector.broadcast %229 : vector<16x1xf32> to vector<16x16xf32>
    %231 = arith.subf %227, %230 : vector<16x16xf32>
    %232 = math.exp %231 : vector<16x16xf32>
    %cst_101 = arith.constant dense<0.000000e+00> : vector<16xf32>
    %233 = vector.multi_reduction <add>, %232, %cst_101 [1] : vector<16x16xf32> to vector<16xf32>
    %234 = vector.shape_cast %233 : vector<16xf32> to vector<16x1xf32>
    %235 = tpu.reciprocal %234 {approx = true} : vector<16x1xf32> -> vector<16x1xf32>
    %236 = vector.broadcast %235 : vector<16x1xf32> to vector<16x16xf32>
    %237 = arith.mulf %14, %236 : vector<16x16xf32>
    %238 = arith.mulf %232, %237 : vector<16x16xf32>
    %239 = vector.extract_strided_slice %210 {offsets = [0, 0], sizes = [16, 8], strides = [1, 1]} : vector<16x32xf32> to vector<16x8xf32>
    %cst_102 = arith.constant dense<0.000000e+00> : vector<16x8xf32>
    %240 = tpu.matmul %238, %239, %cst_102 {dimension_numbers = #tpu.dot_dimension_numbers<[1], [0], [0], [1], [0, 0, 1, 1], [], []>} : vector<16x16xf32>, vector<16x8xf32>, vector<16x8xf32> -> vector<16x8xf32>
    %cst_103 = arith.constant dense<0.000000e+00> : vector<32x16xf32>
    %241 = tpu.matmul %1, %238, %cst_103 {dimension_numbers = #tpu.dot_dimension_numbers<[1], [0], [0], [1], [0, 0, 1, 1], [], []>} : vector<32x16xf32>, vector<16x16xf32>, vector<32x16xf32> -> vector<32x16xf32>
    %242 = arith.mulf %241, %0 : vector<32x16xf32>
    %cst_104 = arith.constant dense<0.000000e+00> : vector<32xf32>
    %243 = vector.multi_reduction <add>, %242, %cst_104 [1] : vector<32x16xf32> to vector<32xf32>
    %244 = vector.shape_cast %243 : vector<32xf32> to vector<32x1xf32>
    %245 = vector.extract_strided_slice %214 {offsets = [0, 0], sizes = [32, 8], strides = [1, 1]} : vector<32x32xf32> to vector<32x8xf32>
    %246 = vector.broadcast %244 : vector<32x1xf32> to vector<32x8xf32>
    %247 = arith.mulf %246, %245 : vector<32x8xf32>
    %cst_105 = arith.constant dense<0.000000e+00> : vector<16x8xf32>
    %248 = tpu.matmul %2, %247, %cst_105 {dimension_numbers = #tpu.dot_dimension_numbers<[1], [0], [0], [1], [0, 0, 1, 1], [], []>} : vector<16x32xf32>, vector<32x8xf32>, vector<16x8xf32> -> vector<16x8xf32>
    %249 = arith.addf %240, %248 : vector<16x8xf32>
    %250 = vector.extract_strided_slice %218 {offsets = [0, 8], sizes = [32, 8], strides = [1, 1]} : vector<32x32xf32> to vector<32x8xf32>
    %cst_106 = arith.constant dense<0.000000e+00> : vector<32xf32>
    %251 = vector.multi_reduction <add>, %250, %cst_106 [1] : vector<32x8xf32> to vector<32xf32>
    %252 = vector.shape_cast %251 : vector<32xf32> to vector<32x1xf32>
    %cst_107 = arith.constant 0.353553385 : f32
    %253 = vector.broadcast %cst_107 : f32 to vector<32x1xf32>
    %254 = arith.mulf %252, %253 : vector<32x1xf32>
    %255 = vector.broadcast %254 : vector<32x1xf32> to vector<32x16xf32>
    %256 = arith.mulf %0, %255 : vector<32x16xf32>
    %cst_108 = arith.constant dense<0.000000e+00> : vector<16x16xf32>
    %257 = tpu.matmul %2, %256, %cst_108 {dimension_numbers = #tpu.dot_dimension_numbers<[1], [0], [0], [1], [0, 0, 1, 1], [], []>} : vector<16x32xf32>, vector<32x16xf32>, vector<16x16xf32> -> vector<16x16xf32>
    %258 = arith.addf %257, %7 : vector<16x16xf32>
    %cst_109 = arith.constant dense<0xFF800000> : vector<16xf32>
    %259 = vector.multi_reduction <maximumf>, %258, %cst_109 [1] : vector<16x16xf32> to vector<16xf32>
    %260 = vector.shape_cast %259 : vector<16xf32> to vector<16x1xf32>
    %261 = vector.broadcast %260 : vector<16x1xf32> to vector<16x16xf32>
    %262 = arith.subf %258, %261 : vector<16x16xf32>
    %263 = math.exp %262 : vector<16x16xf32>
    %cst_110 = arith.constant dense<0.000000e+00> : vector<16xf32>
    %264 = vector.multi_reduction <add>, %263, %cst_110 [1] : vector<16x16xf32> to vector<16xf32>
    %265 = vector.shape_cast %264 : vector<16xf32> to vector<16x1xf32>
    %266 = tpu.reciprocal %265 {approx = true} : vector<16x1xf32> -> vector<16x1xf32>
    %267 = vector.broadcast %266 : vector<16x1xf32> to vector<16x16xf32>
    %268 = arith.mulf %14, %267 : vector<16x16xf32>
    %269 = arith.mulf %263, %268 : vector<16x16xf32>
    %270 = vector.extract_strided_slice %210 {offsets = [0, 8], sizes = [16, 8], strides = [1, 1]} : vector<16x32xf32> to vector<16x8xf32>
    %cst_111 = arith.constant dense<0.000000e+00> : vector<16x8xf32>
    %271 = tpu.matmul %269, %270, %cst_111 {dimension_numbers = #tpu.dot_dimension_numbers<[1], [0], [0], [1], [0, 0, 1, 1], [], []>} : vector<16x16xf32>, vector<16x8xf32>, vector<16x8xf32> -> vector<16x8xf32>
    %cst_112 = arith.constant dense<0.000000e+00> : vector<32x16xf32>
    %272 = tpu.matmul %1, %269, %cst_112 {dimension_numbers = #tpu.dot_dimension_numbers<[1], [0], [0], [1], [0, 0, 1, 1], [], []>} : vector<32x16xf32>, vector<16x16xf32>, vector<32x16xf32> -> vector<32x16xf32>
    %273 = arith.mulf %272, %0 : vector<32x16xf32>
    %cst_113 = arith.constant dense<0.000000e+00> : vector<32xf32>
    %274 = vector.multi_reduction <add>, %273, %cst_113 [1] : vector<32x16xf32> to vector<32xf32>
    %275 = vector.shape_cast %274 : vector<32xf32> to vector<32x1xf32>
    %276 = vector.extract_strided_slice %214 {offsets = [0, 8], sizes = [32, 8], strides = [1, 1]} : vector<32x32xf32> to vector<32x8xf32>
    %277 = vector.broadcast %275 : vector<32x1xf32> to vector<32x8xf32>
    %278 = arith.mulf %277, %276 : vector<32x8xf32>
    %cst_114 = arith.constant dense<0.000000e+00> : vector<16x8xf32>
    %279 = tpu.matmul %2, %278, %cst_114 {dimension_numbers = #tpu.dot_dimension_numbers<[1], [0], [0], [1], [0, 0, 1, 1], [], []>} : vector<16x32xf32>, vector<32x8xf32>, vector<16x8xf32> -> vector<16x8xf32>
    %280 = arith.addf %271, %279 : vector<16x8xf32>
    %281 = vector.extract_strided_slice %218 {offsets = [0, 16], sizes = [32, 8], strides = [1, 1]} : vector<32x32xf32> to vector<32x8xf32>
    %cst_115 = arith.constant dense<0.000000e+00> : vector<32xf32>
    %282 = vector.multi_reduction <add>, %281, %cst_115 [1] : vector<32x8xf32> to vector<32xf32>
    %283 = vector.shape_cast %282 : vector<32xf32> to vector<32x1xf32>
    %cst_116 = arith.constant 0.353553385 : f32
    %284 = vector.broadcast %cst_116 : f32 to vector<32x1xf32>
    %285 = arith.mulf %283, %284 : vector<32x1xf32>
    %286 = vector.broadcast %285 : vector<32x1xf32> to vector<32x16xf32>
    %287 = arith.mulf %0, %286 : vector<32x16xf32>
    %cst_117 = arith.constant dense<0.000000e+00> : vector<16x16xf32>
    %288 = tpu.matmul %2, %287, %cst_117 {dimension_numbers = #tpu.dot_dimension_numbers<[1], [0], [0], [1], [0, 0, 1, 1], [], []>} : vector<16x32xf32>, vector<32x16xf32>, vector<16x16xf32> -> vector<16x16xf32>
    %289 = arith.addf %288, %7 : vector<16x16xf32>
    %cst_118 = arith.constant dense<0xFF800000> : vector<16xf32>
    %290 = vector.multi_reduction <maximumf>, %289, %cst_118 [1] : vector<16x16xf32> to vector<16xf32>
    %291 = vector.shape_cast %290 : vector<16xf32> to vector<16x1xf32>
    %292 = vector.broadcast %291 : vector<16x1xf32> to vector<16x16xf32>
    %293 = arith.subf %289, %292 : vector<16x16xf32>
    %294 = math.exp %293 : vector<16x16xf32>
    %cst_119 = arith.constant dense<0.000000e+00> : vector<16xf32>
    %295 = vector.multi_reduction <add>, %294, %cst_119 [1] : vector<16x16xf32> to vector<16xf32>
    %296 = vector.shape_cast %295 : vector<16xf32> to vector<16x1xf32>
    %297 = tpu.reciprocal %296 {approx = true} : vector<16x1xf32> -> vector<16x1xf32>
    %298 = vector.broadcast %297 : vector<16x1xf32> to vector<16x16xf32>
    %299 = arith.mulf %14, %298 : vector<16x16xf32>
    %300 = arith.mulf %294, %299 : vector<16x16xf32>
    %301 = vector.extract_strided_slice %210 {offsets = [0, 16], sizes = [16, 8], strides = [1, 1]} : vector<16x32xf32> to vector<16x8xf32>
    %cst_120 = arith.constant dense<0.000000e+00> : vector<16x8xf32>
    %302 = tpu.matmul %300, %301, %cst_120 {dimension_numbers = #tpu.dot_dimension_numbers<[1], [0], [0], [1], [0, 0, 1, 1], [], []>} : vector<16x16xf32>, vector<16x8xf32>, vector<16x8xf32> -> vector<16x8xf32>
    %cst_121 = arith.constant dense<0.000000e+00> : vector<32x16xf32>
    %303 = tpu.matmul %1, %300, %cst_121 {dimension_numbers = #tpu.dot_dimension_numbers<[1], [0], [0], [1], [0, 0, 1, 1], [], []>} : vector<32x16xf32>, vector<16x16xf32>, vector<32x16xf32> -> vector<32x16xf32>
    %304 = arith.mulf %303, %0 : vector<32x16xf32>
    %cst_122 = arith.constant dense<0.000000e+00> : vector<32xf32>
    %305 = vector.multi_reduction <add>, %304, %cst_122 [1] : vector<32x16xf32> to vector<32xf32>
    %306 = vector.shape_cast %305 : vector<32xf32> to vector<32x1xf32>
    %307 = vector.extract_strided_slice %214 {offsets = [0, 16], sizes = [32, 8], strides = [1, 1]} : vector<32x32xf32> to vector<32x8xf32>
    %308 = vector.broadcast %306 : vector<32x1xf32> to vector<32x8xf32>
    %309 = arith.mulf %308, %307 : vector<32x8xf32>
    %cst_123 = arith.constant dense<0.000000e+00> : vector<16x8xf32>
    %310 = tpu.matmul %2, %309, %cst_123 {dimension_numbers = #tpu.dot_dimension_numbers<[1], [0], [0], [1], [0, 0, 1, 1], [], []>} : vector<16x32xf32>, vector<32x8xf32>, vector<16x8xf32> -> vector<16x8xf32>
    %311 = arith.addf %302, %310 : vector<16x8xf32>
    %312 = vector.extract_strided_slice %218 {offsets = [0, 24], sizes = [32, 8], strides = [1, 1]} : vector<32x32xf32> to vector<32x8xf32>
    %cst_124 = arith.constant dense<0.000000e+00> : vector<32xf32>
    %313 = vector.multi_reduction <add>, %312, %cst_124 [1] : vector<32x8xf32> to vector<32xf32>
    %314 = vector.shape_cast %313 : vector<32xf32> to vector<32x1xf32>
    %cst_125 = arith.constant 0.353553385 : f32
    %315 = vector.broadcast %cst_125 : f32 to vector<32x1xf32>
    %316 = arith.mulf %314, %315 : vector<32x1xf32>
    %317 = vector.broadcast %316 : vector<32x1xf32> to vector<32x16xf32>
    %318 = arith.mulf %0, %317 : vector<32x16xf32>
    %cst_126 = arith.constant dense<0.000000e+00> : vector<16x16xf32>
    %319 = tpu.matmul %2, %318, %cst_126 {dimension_numbers = #tpu.dot_dimension_numbers<[1], [0], [0], [1], [0, 0, 1, 1], [], []>} : vector<16x32xf32>, vector<32x16xf32>, vector<16x16xf32> -> vector<16x16xf32>
    %320 = arith.addf %319, %7 : vector<16x16xf32>
    %cst_127 = arith.constant dense<0xFF800000> : vector<16xf32>
    %321 = vector.multi_reduction <maximumf>, %320, %cst_127 [1] : vector<16x16xf32> to vector<16xf32>
    %322 = vector.shape_cast %321 : vector<16xf32> to vector<16x1xf32>
    %323 = vector.broadcast %322 : vector<16x1xf32> to vector<16x16xf32>
    %324 = arith.subf %320, %323 : vector<16x16xf32>
    %325 = math.exp %324 : vector<16x16xf32>
    %cst_128 = arith.constant dense<0.000000e+00> : vector<16xf32>
    %326 = vector.multi_reduction <add>, %325, %cst_128 [1] : vector<16x16xf32> to vector<16xf32>
    %327 = vector.shape_cast %326 : vector<16xf32> to vector<16x1xf32>
    %328 = tpu.reciprocal %327 {approx = true} : vector<16x1xf32> -> vector<16x1xf32>
    %329 = vector.broadcast %328 : vector<16x1xf32> to vector<16x16xf32>
    %330 = arith.mulf %14, %329 : vector<16x16xf32>
    %331 = arith.mulf %325, %330 : vector<16x16xf32>
    %332 = vector.extract_strided_slice %210 {offsets = [0, 24], sizes = [16, 8], strides = [1, 1]} : vector<16x32xf32> to vector<16x8xf32>
    %cst_129 = arith.constant dense<0.000000e+00> : vector<16x8xf32>
    %333 = tpu.matmul %331, %332, %cst_129 {dimension_numbers = #tpu.dot_dimension_numbers<[1], [0], [0], [1], [0, 0, 1, 1], [], []>} : vector<16x16xf32>, vector<16x8xf32>, vector<16x8xf32> -> vector<16x8xf32>
    %cst_130 = arith.constant dense<0.000000e+00> : vector<32x16xf32>
    %334 = tpu.matmul %1, %331, %cst_130 {dimension_numbers = #tpu.dot_dimension_numbers<[1], [0], [0], [1], [0, 0, 1, 1], [], []>} : vector<32x16xf32>, vector<16x16xf32>, vector<32x16xf32> -> vector<32x16xf32>
    %335 = arith.mulf %334, %0 : vector<32x16xf32>
    %cst_131 = arith.constant dense<0.000000e+00> : vector<32xf32>
    %336 = vector.multi_reduction <add>, %335, %cst_131 [1] : vector<32x16xf32> to vector<32xf32>
    %337 = vector.shape_cast %336 : vector<32xf32> to vector<32x1xf32>
    %338 = vector.extract_strided_slice %214 {offsets = [0, 24], sizes = [32, 8], strides = [1, 1]} : vector<32x32xf32> to vector<32x8xf32>
    %339 = vector.broadcast %337 : vector<32x1xf32> to vector<32x8xf32>
    %340 = arith.mulf %339, %338 : vector<32x8xf32>
    %cst_132 = arith.constant dense<0.000000e+00> : vector<16x8xf32>
    %341 = tpu.matmul %2, %340, %cst_132 {dimension_numbers = #tpu.dot_dimension_numbers<[1], [0], [0], [1], [0, 0, 1, 1], [], []>} : vector<16x32xf32>, vector<32x8xf32>, vector<16x8xf32> -> vector<16x8xf32>
    %342 = arith.addf %333, %341 : vector<16x8xf32>
    %343 = tpu.concatenate %249, %280, %311, %342 in 1 : vector<16x8xf32>, vector<16x8xf32>, vector<16x8xf32>, vector<16x8xf32> -> vector<16x32xf32>
    %c1_133 = arith.constant 1 : index
    %c0_134 = arith.constant 0 : index
    %c0_135 = arith.constant 0 : index
    %344 = vector.load %arg12[%c1_133, %c0_134, %c0_135] : memref<3x1x32xf32, #tpu.memory_space<vmem>>, vector<1x1x32xf32>
    %345 = vector.shape_cast %344 : vector<1x1x32xf32> to vector<1x32xf32>
    %346 = vector.broadcast %345 : vector<1x32xf32> to vector<16x32xf32>
    %347 = arith.mulf %343, %346 : vector<16x32xf32>
    %cst_136 = arith.constant dense<0.000000e+00> : vector<16xf32>
    %348 = vector.multi_reduction <add>, %347, %cst_136 [1] : vector<16x32xf32> to vector<16xf32>
    %349 = vector.shape_cast %348 : vector<16xf32> to vector<16x1xf32>
    %c1_137 = arith.constant 1 : index
    %c0_138 = arith.constant 0 : index
    %c0_139 = arith.constant 0 : index
    %350 = vector.load %arg13[%c1_137, %c0_138, %c0_139] : memref<3x1x32xf32, #tpu.memory_space<vmem>>, vector<1x1x32xf32>
    %351 = vector.shape_cast %350 : vector<1x1x32xf32> to vector<1x32xf32>
    %352 = vector.broadcast %351 : vector<1x32xf32> to vector<16x32xf32>
    %353 = arith.mulf %211, %352 : vector<16x32xf32>
    %cst_140 = arith.constant dense<0.000000e+00> : vector<16xf32>
    %354 = vector.multi_reduction <add>, %353, %cst_140 [1] : vector<16x32xf32> to vector<16xf32>
    %355 = vector.shape_cast %354 : vector<16xf32> to vector<16x1xf32>
    %356 = arith.addf %349, %355 : vector<16x1xf32>
    %cst_141 = arith.constant 0.000000e+00 : f32
    %357 = vector.broadcast %cst_141 : f32 to vector<16x1xf32>
    %358 = arith.subf %357, %356 : vector<16x1xf32>
    %359 = math.exp %358 : vector<16x1xf32>
    %cst_142 = arith.constant 1.000000e+00 : f32
    %360 = vector.broadcast %cst_142 : f32 to vector<16x1xf32>
    %361 = arith.addf %360, %359 : vector<16x1xf32>
    %362 = tpu.reciprocal %361 {approx = true} : vector<16x1xf32> -> vector<16x1xf32>
    %363 = vector.broadcast %362 : vector<16x1xf32> to vector<16x32xf32>
    %364 = arith.mulf %363, %211 : vector<16x32xf32>
    %cst_143 = arith.constant 1.000000e+00 : f32
    %365 = vector.broadcast %cst_143 : f32 to vector<16x1xf32>
    %366 = arith.subf %365, %362 : vector<16x1xf32>
    %367 = vector.broadcast %366 : vector<16x1xf32> to vector<16x32xf32>
    %368 = arith.mulf %367, %343 : vector<16x32xf32>
    %369 = arith.addf %364, %368 : vector<16x32xf32>
    %370 = arith.addf %200, %369 : vector<16x32xf32>
    %cst_144 = arith.constant 0.000000e+00 : f32
    %371 = vector.broadcast %cst_144 : f32 to vector<16x32xf32>
    %372 = arith.maximumf %370, %371 : vector<16x32xf32>
    %c2 = arith.constant 2 : index
    %c0_145 = arith.constant 0 : index
    %c0_146 = arith.constant 0 : index
    %373 = vector.load %arg9[%c2, %c0_145, %c0_146] : memref<3x32x128xf32, #tpu.memory_space<vmem>>, vector<1x32x128xf32>
    %374 = vector.shape_cast %373 : vector<1x32x128xf32> to vector<32x128xf32>
    %cst_147 = arith.constant dense<0.000000e+00> : vector<16x128xf32>
    %375 = tpu.matmul %372, %374, %cst_147 {dimension_numbers = #tpu.dot_dimension_numbers<[1], [0], [0], [1], [0, 0, 1, 1], [], []>} : vector<16x32xf32>, vector<32x128xf32>, vector<16x128xf32> -> vector<16x128xf32>
    %c2_148 = arith.constant 2 : index
    %c0_149 = arith.constant 0 : index
    %c0_150 = arith.constant 0 : index
    %376 = vector.load %arg10[%c2_148, %c0_149, %c0_150] : memref<3x1x128xf32, #tpu.memory_space<vmem>>, vector<1x1x128xf32>
    %377 = vector.shape_cast %376 : vector<1x1x128xf32> to vector<1x128xf32>
    %378 = vector.broadcast %377 : vector<1x128xf32> to vector<16x128xf32>
    %379 = arith.addf %375, %378 : vector<16x128xf32>
    %380 = vector.extract_strided_slice %379 {offsets = [0, 0], sizes = [16, 32], strides = [1, 1]} : vector<16x128xf32> to vector<16x32xf32>
    %381 = vector.extract_strided_slice %379 {offsets = [0, 32], sizes = [16, 32], strides = [1, 1]} : vector<16x128xf32> to vector<16x32xf32>
    %382 = vector.extract_strided_slice %379 {offsets = [0, 64], sizes = [16, 32], strides = [1, 1]} : vector<16x128xf32> to vector<16x32xf32>
    %383 = vector.extract_strided_slice %379 {offsets = [0, 96], sizes = [16, 32], strides = [1, 1]} : vector<16x128xf32> to vector<16x32xf32>
    %c2_151 = arith.constant 2 : index
    %c0_152 = arith.constant 0 : index
    %c0_153 = arith.constant 0 : index
    %384 = vector.load %arg11[%c2_151, %c0_152, %c0_153] : memref<3x16x32xf32, #tpu.memory_space<vmem>>, vector<1x16x32xf32>
    %385 = vector.shape_cast %384 : vector<1x16x32xf32> to vector<16x32xf32>
    %cst_154 = arith.constant dense<0.000000e+00> : vector<32x32xf32>
    %386 = tpu.matmul %28, %385, %cst_154 {dimension_numbers = #tpu.dot_dimension_numbers<[1], [0], [0], [1], [0, 0, 1, 1], [], []>} : vector<32x16xf32>, vector<16x32xf32>, vector<32x32xf32> -> vector<32x32xf32>
    %cst_155 = arith.constant dense<0.000000e+00> : vector<32x32xf32>
    %387 = tpu.matmul %0, %381, %cst_155 {dimension_numbers = #tpu.dot_dimension_numbers<[1], [0], [0], [1], [0, 0, 1, 1], [], []>} : vector<32x16xf32>, vector<16x32xf32>, vector<32x32xf32> -> vector<32x32xf32>
    %cst_156 = arith.constant dense<0.000000e+00> : vector<32x32xf32>
    %388 = tpu.matmul %1, %380, %cst_156 {dimension_numbers = #tpu.dot_dimension_numbers<[1], [0], [0], [1], [0, 0, 1, 1], [], []>} : vector<32x16xf32>, vector<16x32xf32>, vector<32x32xf32> -> vector<32x32xf32>
    %389 = arith.addf %387, %386 : vector<32x32xf32>
    %390 = arith.mulf %388, %389 : vector<32x32xf32>
    %391 = vector.extract_strided_slice %390 {offsets = [0, 0], sizes = [32, 8], strides = [1, 1]} : vector<32x32xf32> to vector<32x8xf32>
    %cst_157 = arith.constant dense<0.000000e+00> : vector<32xf32>
    %392 = vector.multi_reduction <add>, %391, %cst_157 [1] : vector<32x8xf32> to vector<32xf32>
    %393 = vector.shape_cast %392 : vector<32xf32> to vector<32x1xf32>
    %cst_158 = arith.constant 0.353553385 : f32
    %394 = vector.broadcast %cst_158 : f32 to vector<32x1xf32>
    %395 = arith.mulf %393, %394 : vector<32x1xf32>
    %396 = vector.broadcast %395 : vector<32x1xf32> to vector<32x16xf32>
    %397 = arith.mulf %0, %396 : vector<32x16xf32>
    %cst_159 = arith.constant dense<0.000000e+00> : vector<16x16xf32>
    %398 = tpu.matmul %2, %397, %cst_159 {dimension_numbers = #tpu.dot_dimension_numbers<[1], [0], [0], [1], [0, 0, 1, 1], [], []>} : vector<16x32xf32>, vector<32x16xf32>, vector<16x16xf32> -> vector<16x16xf32>
    %399 = arith.addf %398, %7 : vector<16x16xf32>
    %cst_160 = arith.constant dense<0xFF800000> : vector<16xf32>
    %400 = vector.multi_reduction <maximumf>, %399, %cst_160 [1] : vector<16x16xf32> to vector<16xf32>
    %401 = vector.shape_cast %400 : vector<16xf32> to vector<16x1xf32>
    %402 = vector.broadcast %401 : vector<16x1xf32> to vector<16x16xf32>
    %403 = arith.subf %399, %402 : vector<16x16xf32>
    %404 = math.exp %403 : vector<16x16xf32>
    %cst_161 = arith.constant dense<0.000000e+00> : vector<16xf32>
    %405 = vector.multi_reduction <add>, %404, %cst_161 [1] : vector<16x16xf32> to vector<16xf32>
    %406 = vector.shape_cast %405 : vector<16xf32> to vector<16x1xf32>
    %407 = tpu.reciprocal %406 {approx = true} : vector<16x1xf32> -> vector<16x1xf32>
    %408 = vector.broadcast %407 : vector<16x1xf32> to vector<16x16xf32>
    %409 = arith.mulf %14, %408 : vector<16x16xf32>
    %410 = arith.mulf %404, %409 : vector<16x16xf32>
    %411 = vector.extract_strided_slice %382 {offsets = [0, 0], sizes = [16, 8], strides = [1, 1]} : vector<16x32xf32> to vector<16x8xf32>
    %cst_162 = arith.constant dense<0.000000e+00> : vector<16x8xf32>
    %412 = tpu.matmul %410, %411, %cst_162 {dimension_numbers = #tpu.dot_dimension_numbers<[1], [0], [0], [1], [0, 0, 1, 1], [], []>} : vector<16x16xf32>, vector<16x8xf32>, vector<16x8xf32> -> vector<16x8xf32>
    %cst_163 = arith.constant dense<0.000000e+00> : vector<32x16xf32>
    %413 = tpu.matmul %1, %410, %cst_163 {dimension_numbers = #tpu.dot_dimension_numbers<[1], [0], [0], [1], [0, 0, 1, 1], [], []>} : vector<32x16xf32>, vector<16x16xf32>, vector<32x16xf32> -> vector<32x16xf32>
    %414 = arith.mulf %413, %0 : vector<32x16xf32>
    %cst_164 = arith.constant dense<0.000000e+00> : vector<32xf32>
    %415 = vector.multi_reduction <add>, %414, %cst_164 [1] : vector<32x16xf32> to vector<32xf32>
    %416 = vector.shape_cast %415 : vector<32xf32> to vector<32x1xf32>
    %417 = vector.extract_strided_slice %386 {offsets = [0, 0], sizes = [32, 8], strides = [1, 1]} : vector<32x32xf32> to vector<32x8xf32>
    %418 = vector.broadcast %416 : vector<32x1xf32> to vector<32x8xf32>
    %419 = arith.mulf %418, %417 : vector<32x8xf32>
    %cst_165 = arith.constant dense<0.000000e+00> : vector<16x8xf32>
    %420 = tpu.matmul %2, %419, %cst_165 {dimension_numbers = #tpu.dot_dimension_numbers<[1], [0], [0], [1], [0, 0, 1, 1], [], []>} : vector<16x32xf32>, vector<32x8xf32>, vector<16x8xf32> -> vector<16x8xf32>
    %421 = arith.addf %412, %420 : vector<16x8xf32>
    %422 = vector.extract_strided_slice %390 {offsets = [0, 8], sizes = [32, 8], strides = [1, 1]} : vector<32x32xf32> to vector<32x8xf32>
    %cst_166 = arith.constant dense<0.000000e+00> : vector<32xf32>
    %423 = vector.multi_reduction <add>, %422, %cst_166 [1] : vector<32x8xf32> to vector<32xf32>
    %424 = vector.shape_cast %423 : vector<32xf32> to vector<32x1xf32>
    %cst_167 = arith.constant 0.353553385 : f32
    %425 = vector.broadcast %cst_167 : f32 to vector<32x1xf32>
    %426 = arith.mulf %424, %425 : vector<32x1xf32>
    %427 = vector.broadcast %426 : vector<32x1xf32> to vector<32x16xf32>
    %428 = arith.mulf %0, %427 : vector<32x16xf32>
    %cst_168 = arith.constant dense<0.000000e+00> : vector<16x16xf32>
    %429 = tpu.matmul %2, %428, %cst_168 {dimension_numbers = #tpu.dot_dimension_numbers<[1], [0], [0], [1], [0, 0, 1, 1], [], []>} : vector<16x32xf32>, vector<32x16xf32>, vector<16x16xf32> -> vector<16x16xf32>
    %430 = arith.addf %429, %7 : vector<16x16xf32>
    %cst_169 = arith.constant dense<0xFF800000> : vector<16xf32>
    %431 = vector.multi_reduction <maximumf>, %430, %cst_169 [1] : vector<16x16xf32> to vector<16xf32>
    %432 = vector.shape_cast %431 : vector<16xf32> to vector<16x1xf32>
    %433 = vector.broadcast %432 : vector<16x1xf32> to vector<16x16xf32>
    %434 = arith.subf %430, %433 : vector<16x16xf32>
    %435 = math.exp %434 : vector<16x16xf32>
    %cst_170 = arith.constant dense<0.000000e+00> : vector<16xf32>
    %436 = vector.multi_reduction <add>, %435, %cst_170 [1] : vector<16x16xf32> to vector<16xf32>
    %437 = vector.shape_cast %436 : vector<16xf32> to vector<16x1xf32>
    %438 = tpu.reciprocal %437 {approx = true} : vector<16x1xf32> -> vector<16x1xf32>
    %439 = vector.broadcast %438 : vector<16x1xf32> to vector<16x16xf32>
    %440 = arith.mulf %14, %439 : vector<16x16xf32>
    %441 = arith.mulf %435, %440 : vector<16x16xf32>
    %442 = vector.extract_strided_slice %382 {offsets = [0, 8], sizes = [16, 8], strides = [1, 1]} : vector<16x32xf32> to vector<16x8xf32>
    %cst_171 = arith.constant dense<0.000000e+00> : vector<16x8xf32>
    %443 = tpu.matmul %441, %442, %cst_171 {dimension_numbers = #tpu.dot_dimension_numbers<[1], [0], [0], [1], [0, 0, 1, 1], [], []>} : vector<16x16xf32>, vector<16x8xf32>, vector<16x8xf32> -> vector<16x8xf32>
    %cst_172 = arith.constant dense<0.000000e+00> : vector<32x16xf32>
    %444 = tpu.matmul %1, %441, %cst_172 {dimension_numbers = #tpu.dot_dimension_numbers<[1], [0], [0], [1], [0, 0, 1, 1], [], []>} : vector<32x16xf32>, vector<16x16xf32>, vector<32x16xf32> -> vector<32x16xf32>
    %445 = arith.mulf %444, %0 : vector<32x16xf32>
    %cst_173 = arith.constant dense<0.000000e+00> : vector<32xf32>
    %446 = vector.multi_reduction <add>, %445, %cst_173 [1] : vector<32x16xf32> to vector<32xf32>
    %447 = vector.shape_cast %446 : vector<32xf32> to vector<32x1xf32>
    %448 = vector.extract_strided_slice %386 {offsets = [0, 8], sizes = [32, 8], strides = [1, 1]} : vector<32x32xf32> to vector<32x8xf32>
    %449 = vector.broadcast %447 : vector<32x1xf32> to vector<32x8xf32>
    %450 = arith.mulf %449, %448 : vector<32x8xf32>
    %cst_174 = arith.constant dense<0.000000e+00> : vector<16x8xf32>
    %451 = tpu.matmul %2, %450, %cst_174 {dimension_numbers = #tpu.dot_dimension_numbers<[1], [0], [0], [1], [0, 0, 1, 1], [], []>} : vector<16x32xf32>, vector<32x8xf32>, vector<16x8xf32> -> vector<16x8xf32>
    %452 = arith.addf %443, %451 : vector<16x8xf32>
    %453 = vector.extract_strided_slice %390 {offsets = [0, 16], sizes = [32, 8], strides = [1, 1]} : vector<32x32xf32> to vector<32x8xf32>
    %cst_175 = arith.constant dense<0.000000e+00> : vector<32xf32>
    %454 = vector.multi_reduction <add>, %453, %cst_175 [1] : vector<32x8xf32> to vector<32xf32>
    %455 = vector.shape_cast %454 : vector<32xf32> to vector<32x1xf32>
    %cst_176 = arith.constant 0.353553385 : f32
    %456 = vector.broadcast %cst_176 : f32 to vector<32x1xf32>
    %457 = arith.mulf %455, %456 : vector<32x1xf32>
    %458 = vector.broadcast %457 : vector<32x1xf32> to vector<32x16xf32>
    %459 = arith.mulf %0, %458 : vector<32x16xf32>
    %cst_177 = arith.constant dense<0.000000e+00> : vector<16x16xf32>
    %460 = tpu.matmul %2, %459, %cst_177 {dimension_numbers = #tpu.dot_dimension_numbers<[1], [0], [0], [1], [0, 0, 1, 1], [], []>} : vector<16x32xf32>, vector<32x16xf32>, vector<16x16xf32> -> vector<16x16xf32>
    %461 = arith.addf %460, %7 : vector<16x16xf32>
    %cst_178 = arith.constant dense<0xFF800000> : vector<16xf32>
    %462 = vector.multi_reduction <maximumf>, %461, %cst_178 [1] : vector<16x16xf32> to vector<16xf32>
    %463 = vector.shape_cast %462 : vector<16xf32> to vector<16x1xf32>
    %464 = vector.broadcast %463 : vector<16x1xf32> to vector<16x16xf32>
    %465 = arith.subf %461, %464 : vector<16x16xf32>
    %466 = math.exp %465 : vector<16x16xf32>
    %cst_179 = arith.constant dense<0.000000e+00> : vector<16xf32>
    %467 = vector.multi_reduction <add>, %466, %cst_179 [1] : vector<16x16xf32> to vector<16xf32>
    %468 = vector.shape_cast %467 : vector<16xf32> to vector<16x1xf32>
    %469 = tpu.reciprocal %468 {approx = true} : vector<16x1xf32> -> vector<16x1xf32>
    %470 = vector.broadcast %469 : vector<16x1xf32> to vector<16x16xf32>
    %471 = arith.mulf %14, %470 : vector<16x16xf32>
    %472 = arith.mulf %466, %471 : vector<16x16xf32>
    %473 = vector.extract_strided_slice %382 {offsets = [0, 16], sizes = [16, 8], strides = [1, 1]} : vector<16x32xf32> to vector<16x8xf32>
    %cst_180 = arith.constant dense<0.000000e+00> : vector<16x8xf32>
    %474 = tpu.matmul %472, %473, %cst_180 {dimension_numbers = #tpu.dot_dimension_numbers<[1], [0], [0], [1], [0, 0, 1, 1], [], []>} : vector<16x16xf32>, vector<16x8xf32>, vector<16x8xf32> -> vector<16x8xf32>
    %cst_181 = arith.constant dense<0.000000e+00> : vector<32x16xf32>
    %475 = tpu.matmul %1, %472, %cst_181 {dimension_numbers = #tpu.dot_dimension_numbers<[1], [0], [0], [1], [0, 0, 1, 1], [], []>} : vector<32x16xf32>, vector<16x16xf32>, vector<32x16xf32> -> vector<32x16xf32>
    %476 = arith.mulf %475, %0 : vector<32x16xf32>
    %cst_182 = arith.constant dense<0.000000e+00> : vector<32xf32>
    %477 = vector.multi_reduction <add>, %476, %cst_182 [1] : vector<32x16xf32> to vector<32xf32>
    %478 = vector.shape_cast %477 : vector<32xf32> to vector<32x1xf32>
    %479 = vector.extract_strided_slice %386 {offsets = [0, 16], sizes = [32, 8], strides = [1, 1]} : vector<32x32xf32> to vector<32x8xf32>
    %480 = vector.broadcast %478 : vector<32x1xf32> to vector<32x8xf32>
    %481 = arith.mulf %480, %479 : vector<32x8xf32>
    %cst_183 = arith.constant dense<0.000000e+00> : vector<16x8xf32>
    %482 = tpu.matmul %2, %481, %cst_183 {dimension_numbers = #tpu.dot_dimension_numbers<[1], [0], [0], [1], [0, 0, 1, 1], [], []>} : vector<16x32xf32>, vector<32x8xf32>, vector<16x8xf32> -> vector<16x8xf32>
    %483 = arith.addf %474, %482 : vector<16x8xf32>
    %484 = vector.extract_strided_slice %390 {offsets = [0, 24], sizes = [32, 8], strides = [1, 1]} : vector<32x32xf32> to vector<32x8xf32>
    %cst_184 = arith.constant dense<0.000000e+00> : vector<32xf32>
    %485 = vector.multi_reduction <add>, %484, %cst_184 [1] : vector<32x8xf32> to vector<32xf32>
    %486 = vector.shape_cast %485 : vector<32xf32> to vector<32x1xf32>
    %cst_185 = arith.constant 0.353553385 : f32
    %487 = vector.broadcast %cst_185 : f32 to vector<32x1xf32>
    %488 = arith.mulf %486, %487 : vector<32x1xf32>
    %489 = vector.broadcast %488 : vector<32x1xf32> to vector<32x16xf32>
    %490 = arith.mulf %0, %489 : vector<32x16xf32>
    %cst_186 = arith.constant dense<0.000000e+00> : vector<16x16xf32>
    %491 = tpu.matmul %2, %490, %cst_186 {dimension_numbers = #tpu.dot_dimension_numbers<[1], [0], [0], [1], [0, 0, 1, 1], [], []>} : vector<16x32xf32>, vector<32x16xf32>, vector<16x16xf32> -> vector<16x16xf32>
    %492 = arith.addf %491, %7 : vector<16x16xf32>
    %cst_187 = arith.constant dense<0xFF800000> : vector<16xf32>
    %493 = vector.multi_reduction <maximumf>, %492, %cst_187 [1] : vector<16x16xf32> to vector<16xf32>
    %494 = vector.shape_cast %493 : vector<16xf32> to vector<16x1xf32>
    %495 = vector.broadcast %494 : vector<16x1xf32> to vector<16x16xf32>
    %496 = arith.subf %492, %495 : vector<16x16xf32>
    %497 = math.exp %496 : vector<16x16xf32>
    %cst_188 = arith.constant dense<0.000000e+00> : vector<16xf32>
    %498 = vector.multi_reduction <add>, %497, %cst_188 [1] : vector<16x16xf32> to vector<16xf32>
    %499 = vector.shape_cast %498 : vector<16xf32> to vector<16x1xf32>
    %500 = tpu.reciprocal %499 {approx = true} : vector<16x1xf32> -> vector<16x1xf32>
    %501 = vector.broadcast %500 : vector<16x1xf32> to vector<16x16xf32>
    %502 = arith.mulf %14, %501 : vector<16x16xf32>
    %503 = arith.mulf %497, %502 : vector<16x16xf32>
    %504 = vector.extract_strided_slice %382 {offsets = [0, 24], sizes = [16, 8], strides = [1, 1]} : vector<16x32xf32> to vector<16x8xf32>
    %cst_189 = arith.constant dense<0.000000e+00> : vector<16x8xf32>
    %505 = tpu.matmul %503, %504, %cst_189 {dimension_numbers = #tpu.dot_dimension_numbers<[1], [0], [0], [1], [0, 0, 1, 1], [], []>} : vector<16x16xf32>, vector<16x8xf32>, vector<16x8xf32> -> vector<16x8xf32>
    %cst_190 = arith.constant dense<0.000000e+00> : vector<32x16xf32>
    %506 = tpu.matmul %1, %503, %cst_190 {dimension_numbers = #tpu.dot_dimension_numbers<[1], [0], [0], [1], [0, 0, 1, 1], [], []>} : vector<32x16xf32>, vector<16x16xf32>, vector<32x16xf32> -> vector<32x16xf32>
    %507 = arith.mulf %506, %0 : vector<32x16xf32>
    %cst_191 = arith.constant dense<0.000000e+00> : vector<32xf32>
    %508 = vector.multi_reduction <add>, %507, %cst_191 [1] : vector<32x16xf32> to vector<32xf32>
    %509 = vector.shape_cast %508 : vector<32xf32> to vector<32x1xf32>
    %510 = vector.extract_strided_slice %386 {offsets = [0, 24], sizes = [32, 8], strides = [1, 1]} : vector<32x32xf32> to vector<32x8xf32>
    %511 = vector.broadcast %509 : vector<32x1xf32> to vector<32x8xf32>
    %512 = arith.mulf %511, %510 : vector<32x8xf32>
    %cst_192 = arith.constant dense<0.000000e+00> : vector<16x8xf32>
    %513 = tpu.matmul %2, %512, %cst_192 {dimension_numbers = #tpu.dot_dimension_numbers<[1], [0], [0], [1], [0, 0, 1, 1], [], []>} : vector<16x32xf32>, vector<32x8xf32>, vector<16x8xf32> -> vector<16x8xf32>
    %514 = arith.addf %505, %513 : vector<16x8xf32>
    %515 = tpu.concatenate %421, %452, %483, %514 in 1 : vector<16x8xf32>, vector<16x8xf32>, vector<16x8xf32>, vector<16x8xf32> -> vector<16x32xf32>
    %c2_193 = arith.constant 2 : index
    %c0_194 = arith.constant 0 : index
    %c0_195 = arith.constant 0 : index
    %516 = vector.load %arg12[%c2_193, %c0_194, %c0_195] : memref<3x1x32xf32, #tpu.memory_space<vmem>>, vector<1x1x32xf32>
    %517 = vector.shape_cast %516 : vector<1x1x32xf32> to vector<1x32xf32>
    %518 = vector.broadcast %517 : vector<1x32xf32> to vector<16x32xf32>
    %519 = arith.mulf %515, %518 : vector<16x32xf32>
    %cst_196 = arith.constant dense<0.000000e+00> : vector<16xf32>
    %520 = vector.multi_reduction <add>, %519, %cst_196 [1] : vector<16x32xf32> to vector<16xf32>
    %521 = vector.shape_cast %520 : vector<16xf32> to vector<16x1xf32>
    %c2_197 = arith.constant 2 : index
    %c0_198 = arith.constant 0 : index
    %c0_199 = arith.constant 0 : index
    %522 = vector.load %arg13[%c2_197, %c0_198, %c0_199] : memref<3x1x32xf32, #tpu.memory_space<vmem>>, vector<1x1x32xf32>
    %523 = vector.shape_cast %522 : vector<1x1x32xf32> to vector<1x32xf32>
    %524 = vector.broadcast %523 : vector<1x32xf32> to vector<16x32xf32>
    %525 = arith.mulf %383, %524 : vector<16x32xf32>
    %cst_200 = arith.constant dense<0.000000e+00> : vector<16xf32>
    %526 = vector.multi_reduction <add>, %525, %cst_200 [1] : vector<16x32xf32> to vector<16xf32>
    %527 = vector.shape_cast %526 : vector<16xf32> to vector<16x1xf32>
    %528 = arith.addf %521, %527 : vector<16x1xf32>
    %cst_201 = arith.constant 0.000000e+00 : f32
    %529 = vector.broadcast %cst_201 : f32 to vector<16x1xf32>
    %530 = arith.subf %529, %528 : vector<16x1xf32>
    %531 = math.exp %530 : vector<16x1xf32>
    %cst_202 = arith.constant 1.000000e+00 : f32
    %532 = vector.broadcast %cst_202 : f32 to vector<16x1xf32>
    %533 = arith.addf %532, %531 : vector<16x1xf32>
    %534 = tpu.reciprocal %533 {approx = true} : vector<16x1xf32> -> vector<16x1xf32>
    %535 = vector.broadcast %534 : vector<16x1xf32> to vector<16x32xf32>
    %536 = arith.mulf %535, %383 : vector<16x32xf32>
    %cst_203 = arith.constant 1.000000e+00 : f32
    %537 = vector.broadcast %cst_203 : f32 to vector<16x1xf32>
    %538 = arith.subf %537, %534 : vector<16x1xf32>
    %539 = vector.broadcast %538 : vector<16x1xf32> to vector<16x32xf32>
    %540 = arith.mulf %539, %515 : vector<16x32xf32>
    %541 = arith.addf %536, %540 : vector<16x32xf32>
    %542 = arith.addf %372, %541 : vector<16x32xf32>
    %cst_204 = arith.constant 0.000000e+00 : f32
    %543 = vector.broadcast %cst_204 : f32 to vector<16x32xf32>
    %544 = arith.maximumf %542, %543 : vector<16x32xf32>
    %c0_205 = arith.constant 0 : index
    %c0_206 = arith.constant 0 : index
    %545 = vector.load %arg14[%c0_205, %c0_206] : memref<16x32xf32, #tpu.memory_space<vmem>>, vector<16x32xf32>
    tpu.vector_store %arg14[%c0_205, %c0_206], %544 {strides = array<i32>} : memref<16x32xf32, #tpu.memory_space<vmem>>, vector<16x32xf32>,
    return
  }
}

</mosaic_0001>

<bundles_post_ra>
// kernel: tpu_custom_call.1
= control target key start
LH: loop header
LB: loop body
LE: loop exit
PB: predicated region body
PF: predicated region fallthrough
CT: control target
= control target key end

     0   :  { %19 = vsyncpa [#allocation3], 0  ;;  %s9933_s0 = inlined_call_operand.hbm [shape: f32[16,16], index: 0, kind: input, shape index: {}]   ;;  %s9934_s1 = inlined_call_operand.vmem [shape: f32[32,16], index: 1, kind: input, shape index: {}]   ;;  %s9935_s2 = inlined_call_operand.vmem [shape: f32[32,16], index: 2, kind: input, shape index: {}]   ;;  %s9936_s3 = inlined_call_operand.hbm [shape: f32[16,32], index: 3, kind: input, shape index: {}]   ;;  %s9937_s4 = inlined_call_operand.vmem [shape: f32[32,16], index: 4, kind: input, shape index: {}]   ;;  %s9938_s5 = inlined_call_operand.hbm [shape: f32[16,32], index: 5, kind: input, shape index: {}]   ;;  %s9939_s6 = inlined_call_operand.hbm [shape: f32[1,32], index: 6, kind: input, shape index: {}]   ;;  %s9940_s7 = inlined_call_operand.hbm [shape: f32[16,16], index: 7, kind: input, shape index: {}]   ;;  %s9941_s8 = inlined_call_operand.hbm [shape: f32[1,16], index: 8, kind: input, shape index: {}]   ;;  %s9942_s9 = inlined_call_operand.vmem [shape: f32[3,32,128], index: 9, kind: input, shape index: {}]   ;;  %s9943_s10 = inlined_call_operand.hbm [shape: f32[3,1,128], index: 10, kind: input, shape index: {}]   ;;  %s9944_s11 = inlined_call_operand.vmem [shape: f32[3,16,32], index: 11, kind: input, shape index: {}]   ;;  %s9945_s12 = inlined_call_operand.vmem [shape: f32[3,1,32], index: 12, kind: input, shape index: {}]   ;;  %s9946_s13 = inlined_call_operand.vmem [shape: f32[3,1,32], index: 13, kind: input, shape index: {}]   ;;  %s9947_s14 = inlined_call_operand.hbm [shape: f32[16,32], index: 14, kind: output, shape index: {}]  }
   0x1   :  { %20 = vsyncpa [#allocation6], 0 }
   0x2   :  { %21 = vsyncpa [#allocation9], 0 }
   0x3   :  { %22 = vsyncpa [#allocation12], 0 }
   0x4   :  { %23 = vsyncpa [#allocation4], 0  ;;  %s8349_s29 = smov [#allocation5]   ;;  %s8350_s15 = smov [#allocation8]  }
   0x5   :  { %s45_s30 = sshll.u32 %s8349_s29, 4  ;;  %s72_s16 = sshll.u32 %s8350_s15, 4  ;;  %s46_s30 = int_to_ptr.vmem [resolvable:$true] %s45_s30  ;;  %s73_s16 = int_to_ptr.vmem [resolvable:$true] %s72_s16 }
   0x6   :  { %s8187_s17 = scalar_lea.vmem %s46_s30, 256  ;;  %p8192_p1 = scmp.lt.s32.totalorder %s46_s30, %s46_s30 }
   0x7   :  { %p8188_p0 = scmp.ne.s32.totalorder %s46_s30, %s8187_s17  ;;  %p8193_p2 = scmp.lt.s32.totalorder %s8187_s17, %s8187_s17 }
   0x9   :  { %p8194_p3 = por %p8193_p2, %p8192_p1 }
   0xb   :  { %p8195_p4 = pnand %p8194_p3, %p8188_p0 }
   0xd   :  { %8198 = shalt.err (!%p8195_p4)
}
   0xe   :  { %s8351_s18 = smov 128   ;;  %s8352_s19 = smov 8  }
   0xf   :  { %51 = dma.hbm_to_vmem [thread:$0]  %s9936_s3, 256, %s46_s30, [#allocation6], %s8351_s18, %s8351_s18, %s8352_s19  }
  0x10   :  { %s8207_s22 = scalar_lea.vmem %s73_s16, 16  ;;  %s8211_s23 = scalar_lea.vmem %s73_s16, 32 }
  0x11   :  { %p8208_p5 = scmp.ne.s32.totalorder %s73_s16, %s8207_s22  ;;  %p8212_p6 = scmp.lt.s32.totalorder %s73_s16, %s73_s16 }
  0x12   :  { %p8213_p7 = scmp.lt.s32.totalorder %s8211_s23, %s8207_s22 }
  0x14   :  { %p8214_p8 = por %p8213_p7, %p8212_p6 }
  0x16   :  { %p8215_p9 = pnand %p8214_p8, %p8208_p5 }
  0x18   :  { %8218 = shalt.err (!%p8215_p9)
}
  0x19   :  { %75 = dma.hbm_to_vmem [thread:$0]  %s9939_s6, 16, %s73_s16, [#allocation9]  }
  0x1a   :  { %s8353_s26 = smov [#allocation11]   ;;  %s8354_s28 = smov [#allocation2]  }
  0x1b   :  { %s94_s27 = sshll.u32 %s8353_s26, 4  ;;  %s29_s29 = sshll.u32 %s8354_s28, 4  ;;  %s95_s27 = int_to_ptr.vmem [resolvable:$true] %s94_s27  ;;  %s30_s29 = int_to_ptr.vmem [resolvable:$true] %s29_s29 }
  0x1c   :  { %s8227_s15 = scalar_lea.vmem %s95_s27, 16  ;;  %s8231_s3 = scalar_lea.vmem %s95_s27, 32 }
  0x1d   :  { %p8228_p10 = scmp.ne.s32.totalorder %s95_s27, %s8227_s15  ;;  %p8232_p11 = scmp.lt.s32.totalorder %s95_s27, %s95_s27 }
  0x1e   :  { %p8233_p12 = scmp.lt.s32.totalorder %s8231_s3, %s8227_s15 }
  0x20   :  { %p8234_p13 = por %p8233_p12, %p8232_p11 }
  0x22   :  { %p8235_p0 = pnand %p8234_p13, %p8228_p10 }
  0x24   :  { %8238 = shalt.err (!%p8235_p0)
}
  0x25   :  { %97 = dma.hbm_to_vmem [thread:$0]  %s9941_s8, 16, %s95_s27, [#allocation12]  }
  0x26   :  { %s8247_s20 = scalar_lea.vmem %s30_s29, 256  ;;  %p8252_p2 = scmp.lt.s32.totalorder %s30_s29, %s30_s29 }
  0x27   :  { %p8248_p1 = scmp.ne.s32.totalorder %s30_s29, %s8247_s20  ;;  %p8253_p3 = scmp.lt.s32.totalorder %s8247_s20, %s8247_s20 }
  0x29   :  { %p8254_p4 = por %p8253_p3, %p8252_p2 }
  0x2b   :  { %p8255_p5 = pnand %p8254_p4, %p8248_p1 }
  0x2d   :  { %8258 = shalt.err (!%p8255_p5)
}
  0x2e   :  { %35 = dma.hbm_to_vmem [thread:$0]  %s9933_s0, 256, %s30_s29, [#allocation3], %s8351_s18, %s8351_s18, %s8352_s19  }
  0x2f   :  { %s8355_s21 = smov [#allocation7]   ;;  %s8356_s23 = smov [#allocation10]  }
  0x30   :  { %s59_s22 = sshll.u32 %s8355_s21, 4  ;;  %s81_s24 = sshll.u32 %s8356_s23, 4  ;;  %s60_s22 = int_to_ptr.vmem [resolvable:$true] %s59_s22  ;;  %s82_s24 = int_to_ptr.vmem [resolvable:$true] %s81_s24 }
  0x31   :  { %s8267_s8 = scalar_lea.vmem %s60_s22, 256  ;;  %p8272_p7 = scmp.lt.s32.totalorder %s60_s22, %s60_s22 }
  0x32   :  { %p8268_p6 = scmp.ne.s32.totalorder %s60_s22, %s8267_s8  ;;  %p8273_p8 = scmp.lt.s32.totalorder %s8267_s8, %s8267_s8 }
  0x34   :  { %p8274_p9 = por %p8273_p8, %p8272_p7 }
  0x36   :  { %p8275_p10 = pnand %p8274_p9, %p8268_p6 }
  0x38   :  { %8278 = shalt.err (!%p8275_p10)
}
  0x39   :  { %65 = dma.hbm_to_vmem [thread:$0]  %s9938_s5, 256, %s60_s22, [#allocation6], %s8351_s18, %s8351_s18, %s8352_s19  }
  0x3a   :  { %s8287_s0 = scalar_lea.vmem %s82_s24, 256  ;;  %p8292_p12 = scmp.lt.s32.totalorder %s82_s24, %s82_s24 }
  0x3b   :  { %p8288_p11 = scmp.ne.s32.totalorder %s82_s24, %s8287_s0  ;;  %p8293_p13 = scmp.lt.s32.totalorder %s8287_s0, %s8287_s0 }
  0x3d   :  { %p8294_p0 = por %p8293_p13, %p8292_p12 }
  0x3f   :  { %p8295_p1 = pnand %p8294_p0, %p8288_p11 }
  0x41   :  { %8298 = shalt.err (!%p8295_p1)
}
  0x42   :  { %87 = dma.hbm_to_vmem [thread:$0]  %s9940_s7, 256, %s82_s24, [#allocation9], %s8351_s18, %s8351_s18, %s8352_s19  }
  0x43   :  { %s8357_s29 = smov [#allocation13]  }
  0x44   :  { %s105_s15 = sshll.u32 %s8357_s29, 4  ;;  %s106_s15 = int_to_ptr.vmem [resolvable:$true] %s105_s15 }
  0x45   :  { %s8307_s3 = scalar_lea.vmem %s106_s15, 48  ;;  %s8311_s5 = scalar_lea.vmem %s106_s15, 64 }
  0x46   :  { %p8308_p2 = scmp.ne.s32.totalorder %s106_s15, %s8307_s3  ;;  %p8312_p3 = scmp.lt.s32.totalorder %s106_s15, %s106_s15 }
  0x47   :  { %p8313_p4 = scmp.lt.s32.totalorder %s8311_s5, %s8307_s3 }
  0x49   :  { %p8314_p5 = por %p8313_p4, %p8312_p3 }
  0x4b   :  { %p8315_p6 = pnand %p8314_p5, %p8308_p2 }
  0x4d   :  { %8318 = shalt.err (!%p8315_p6)
}
  0x4e   :  { %s8358_s30 = smov 16   ;;  %s8359_s17 = smov 1  }
  0x4f   :  { %111 = dma.hbm_to_vmem [thread:$0]  %s9943_s10, 48, %s106_s15, [#allocation12], %s8358_s30, %s8358_s30, %s8359_s17  }
  0x50   :  { %8339 = dma.done.wait [#allocation3], 256  }
  0x51   :  { %8340 = vsyncadd [#allocation3], 4294967040 }
  0x52   :  { %8341 = dma.done.wait [#allocation6], 512  }
  0x53   :  { %8342 = vsyncadd [#allocation6], 4294966784 }
  0x54   :  { %8343 = dma.done.wait [#allocation9], 272  }
  0x55   :  { %8344 = vsyncadd [#allocation9], 4294967024 }
  0x56   :  { %8345 = dma.done.wait [#allocation12], 64  }
  0x57   :  { %8346 = vsyncadd [#allocation12], 4294967232  ;;  %vm235_vm0 = vcmask 130048   ;;  %v251_v0 = vld [vmem:[#allocation7 + $0x8] sm:$0xff]  ;;  %v250_v1 = vld [vmem:[#allocation7] sm:$0xff]  ;;  %vm149_vm1 = vcmask 261120  }
  0x58   :  { %v248_v2 = vld [vmem:[#allocation2] sm:$0xff]  ;;  %7395 = vmatprep.subr.mxu1 %v251_v0  ;;  %v8485_v3 = vld [vmem:[%s9934_s1 + $0x18] sm:$0xff]  ;;  %v8490_v4 = vld [vmem:[%s9934_s1 + $0x10] sm:$0xff]  ;;  %s8360_s26 = smov 96   ;;  %vm851_vm2 = vcmask 64512   ;;  %s8361_s5 = smov 120  }
  0x59   :  { %7399 = vmatprep.mubr.msk.f32.mxu1 %vm235_vm0, %v248_v2  ;;  %7396 = vmatpush3.msra.mxu1 %v251_v0  ;;  %v249_v5 = vld [vmem:[#allocation2 + $0x8] sm:$0xff]  ;;  %v8499_v7 = vld [vmem:[#allocation5] sm:$0xff]  ;;  %v8507_v8 = vld [vmem:[%s9934_s1] sm:$0xff]  ;;  %s8362_s17 = smov 64   ;;  %s8363_s20 = smov 112   ;;  %vm2512_vm3 = vcmask 195584  }
  0x5a   :  { %7384 = vmatprep.subr.mxu0 %v8485_v3  ;;  %7397 = vmatprep.subr.mxu1 %v250_v1  ;;  %v8497_v6 = vld [vmem:[%s9934_s1 + $0x8] sm:$0xff]  ;;  %v8513_v9 = vld [vmem:[#allocation5 + $0x8] sm:$0xff]  ;;  %v456_v11 = vld [vmem:[%s9942_s9 + $0x10] sm:$0xff]  ;;  %s8364_s6 = smov 104   ;;  %s8365_s7 = smov 48  }
  0x5b   :  { %7385 = vmatpush3.msra.mxu0 %v8485_v3  ;;  %7398 = vmatpush3.msra.mxu1 %v250_v1  ;;  %v457_v10 = vld [vmem:[%s9942_s9 + $0x18] sm:$0xff]  ;;  %v455_v12 = vld [vmem:[%s9942_s9 + $0x8] sm:$0xff]  ;;  %v454_v13 = vld [vmem:[%s9942_s9] sm:$0xff]  ;;  %s8366_s16 = smov 56   ;;  %s8368_s27 = smov 24  }
  0x5c   :  { %7386 = vmatprep.subr.mxu0 %v8490_v4  ;;  %7400 = vmatmul.mubr.msk.f32.vlgmr.msra.gmra.mxu1 %vm235_vm0, %v249_v5  ;;  %v345_v14 = vld [vmem:[#allocation10 + $0x8] sm:$0xff]  ;;  %v344_v15 = vld [vmem:[#allocation10] sm:$0xff]  ;;  %v341_v17 = vld [vmem:[%s9937_s4 + $0x8] sm:$0xff]  ;;  %s8369_s28 = smov 32  }
  0x5d   :  { %7387 = vmatpush3.msra.mxu0 %v8490_v4  ;;  %7392 = vmatprep.mubr.msk.f32.mxu0 %vm149_vm1, %v8499_v7  ;;  %v340_v16 = vld [vmem:[%s9937_s4] sm:$0xff]  ;;  %v342_v18 = vld [vmem:[%s9937_s4 + $0x10] sm:$0xff]  ;;  %v343_v19 = vld [vmem:[%s9937_s4 + $0x18] sm:$0xff]  ;;  %s8367_s4 = smov 40  }
  0x5e   :  { %7388 = vmatprep.subr.mxu0 %v8497_v6  ;;  %7402 = vmatprep.subr.mxu1 %v345_v14  ;;  %v6837_v21 = vld [vmem:[#allocation8] ss:$0 sm:$0xff]  ;;  %v6840_v26 = vld [vmem:[#allocation11] ss:$0 sm:$0xff]  ;;  %v547_v27 = vld [vmem:[%s9944_s11 + $0x8] sm:$0xff] }
  0x5f   :  { %7389 = vmatpush3.msra.mxu0 %v8497_v6  ;;  %7406 = vmatprep.mubr.msk.f32.mxu1 %vm235_vm0, %v340_v16  ;;  %v546_v28 = vld [vmem:[%s9944_s11] sm:$0xff]  ;;  %v8601_v48 = vld [vmem:[%s9935_s2 + $0x8] sm:$0xff]  ;;  %v8607_v49 = vld [vmem:[%s9935_s2 + $0x10] sm:$0xff] }
  0x60   :  { %7390 = vmatprep.subr.mxu0 %v8507_v8  ;;  %7403 = vmatpush3.msra.mxu1 %v345_v14  ;;  %v8584_v41 = vld [vmem:[%s9935_s2] sm:$0xff]  ;;  %v8619_v50 = vld [vmem:[%s9935_s2 + $0x18] sm:$0xff] }
  0x61   :  { %7391 = vmatpush3.msra.mxu0 %v8507_v8  ;;  %7404 = vmatprep.subr.mxu1 %v344_v15  ;;  %v6845_v43 = vld [vmem:[#allocation13] ss:$0 sm:$0xff] }
  0x62   :  { %7393 = vmatmul.mubr.msk.f32.vlgmr.msra.gmra.mxu0 %vm149_vm1, %v8513_v9  ;;  %7412 = vmatprep.subr.mxu0 %v457_v10 }
  0x63   :  { %7413 = vmatpush3.msra.mxu0 %v457_v10  ;;  %7405 = vmatpush3.msra.mxu1 %v344_v15 }
  0x64   :  { %7414 = vmatprep.subr.mxu0 %v456_v11  ;;  %7407 = vmatmul.mubr.msk.f32.vlgmr.msra.gmra.mxu1 %vm235_vm0, %v341_v17 }
  0x65   :  { %7415 = vmatpush3.msra.mxu0 %v456_v11  ;;  %7409 = vmatprep.mubr.msk.f32.mxu1 %vm235_vm0, %v342_v18 }
  0x66   :  { %7416 = vmatprep.subr.mxu0 %v455_v12  ;;  %7423 = vmatprep.subr.mxu1 %v547_v27 }
  0x67   :  { %7417 = vmatpush3.msra.mxu0 %v455_v12  ;;  %7424 = vmatpush3.msra.mxu1 %v547_v27 }
  0x68   :  { %7418 = vmatprep.subr.mxu0 %v454_v13  ;;  %7410 = vmatmul.mubr.msk.f32.gmra.mxu1 %vm235_vm0, %v343_v19 }
  0x69   :  { %7419 = vmatpush3.msra.mxu0 %v454_v13  ;;  %7425 = vmatprep.subr.mxu1 %v546_v28 }
  0x6a   :  { %7426 = vmatpush3.msra.mxu1 %v546_v28 }
 0x11c   :  { %v7401_v20 = vpop.f32.mrf.mxu1 }
 0x11d   :  { %v8549_v24 = vadd.f32 %v7401_v20, %v6837_v21 }
 0x11e   :  { %v331_v22 = vpop.f32.mrf.mxu1 }
 0x11f   :  { %v8547_v23 = vadd.f32 %v6837_v21, %v331_v22 }
 0x121   :  { %7420 = vmatprep.mubr.msk.f32.mxu0 %vm149_vm1, %v8547_v23 }
 0x122   :  { %7421 = vmatmul.mubr.msk.f32.vlgmr.msra.gmra.mxu0 %vm149_vm1, %v8549_v24  ;;  %v8579_v40 = vpop.f32.mrf.mxu0 }
 0x123   :  { %7437 = vmatprep.mubr.msk.f32.mxu0 %vm235_vm0, %v8584_v41 }
 0x124   :  { %v7408_v25 = vpop.f32.mrf.mxu1  ;;  %v8588_v42 = vpop.f32.mrf.mxu0 }
 0x125   :  { %v437_v29 = vadd.f32 %v7408_v25, %v6840_v26  ;;  %v236_v19 = vsel %vm235_vm0, %v8588_v42, 0.0 }
 0x126   :  { %v431_v30 = vpop.f32.mrf.mxu1 }
 0x127   :  { %v432_v31 = vadd.f32 %v6840_v26, %v431_v30  ;;  %v8561_v32 = vmax.f32 %v437_v29, 0.0 }
 0x128   :  { %v7411_v33 = vpop.f32.mrf.mxu1 }
 0x129   :  { %v8563_v34 = vmax.f32 %v432_v31, 0.0  ;;  %v447_v35 = vadd.f32 %v7411_v33, %v6840_v26 }
 0x12a   :  { %v441_v36 = vpop.f32.mrf.mxu1 }
 0x12b   :  { %v442_v37 = vadd.f32 %v6840_v26, %v441_v36  ;;  %7427 = vmatprep.mubr.msk.f32.mxu1 %vm235_vm0, %v8563_v34  ;;  %v8567_v38 = vmax.f32 %v447_v35, 0.0  ;;  %v6836_v36 = vadd.f32 -1.0, %v8579_v40 }
 0x12c   :  { %7428 = vmatmul.mubr.msk.f32.vlgmr.msra.gmra.mxu1 %vm235_vm0, %v8561_v32 }
 0x12d   :  { %v8571_v39 = vmax.f32 %v442_v37, 0.0  ;;  %v6835_v37 = vadd.f32 -1.0, %v8588_v42 }
 0x12f   :  { %7430 = vmatprep.mubr.msk.f32.mxu1 %vm235_vm0, %v8571_v39 }
 0x130   :  { %7431 = vmatmul.mubr.msk.f32.gmra.mxu1 %vm235_vm0, %v8567_v38 }
 0x131   :  { %7447 = vmatprep.mubr.msk.f32.mxu1 %vm235_vm0, %v8507_v8 }
 0x1e2   :  { %v7422_v44 = vpop.f32.mrf.mxu0 }
 0x1e3   :  { %v8590_v45 = vadd.f32 %v7422_v44, %v6845_v43 }
 0x1e4   :  { %v537_v46 = vpop.f32.mrf.mxu0 }
 0x1e5   :  { %v8592_v47 = vadd.f32 %v6845_v43, %v537_v46  ;;  %746 = vrot.lane.b32.xlu0 %v8590_v45, %s8360_s26  ;;  %7433 = vmatprep.subr.mxu0 %v8590_v45  ;;  %v8675_v43 = vmul.f32 1e+09, %v6836_v36  ;;  %v8677_v46 = vmul.f32 1e+09, %v6835_v37 }
 0x1e6   :  { %7434 = vmatpush3.msra.mxu0 %v8590_v45 }
 0x1e7   :  { %7435 = vmatprep.subr.mxu0 %v8592_v47 }
 0x1e8   :  { %7436 = vmatpush3.msra.mxu0 %v8592_v47 }
 0x1e9   :  { %744 = vrot.lane.b32.xlu0 %v8592_v47, %s8360_s26  ;;  %7438 = vmatmul.mubr.msk.f32.vlgmr.msra.gmra.mxu0 %vm235_vm0, %v8601_v48 }
 0x1ea   :  { %7440 = vmatprep.mubr.msk.f32.mxu0 %vm235_vm0, %v8607_v49 }
 0x1ec   :  { %v8633_v53 = vpop.f32.mrf.mxu1 }
 0x1ed   :  { %7441 = vmatmul.mubr.msk.f32.gmra.mxu0 %vm235_vm0, %v8619_v50 }
 0x1ee   :  { %7461 = vmatprep.mubr.msk.f32.mxu0 %vm149_vm1, %v8499_v7  ;;  %v8635_v54 = vpop.f32.mrf.mxu1 }
 0x1f0   :  { %v8637_v55 = vpop.f32.mrf.mxu1 }
 0x1f2   :  { %v8639_v57 = vpop.f32.mrf.mxu1 }
 0x257   :  { %v747_v51 = vpop.permute.xlu0 %746 }
 0x258   :  { %7443 = vmatprep.subr.mxu1 %v747_v51 }
 0x259   :  { %7444 = vmatpush3.msra.mxu1 %v747_v51 }
 0x25b   :  { %v745_v52 = vpop.permute.xlu0 %744 }
 0x25c   :  { %7445 = vmatprep.subr.mxu1 %v745_v52 }
 0x25d   :  { %7446 = vmatpush3.msra.mxu1 %v745_v52 }
 0x25e   :  { %7448 = vmatmul.mubr.msk.f32.vlgmr.msra.gmra.mxu1 %vm235_vm0, %v8497_v6 }
 0x25f   :  { %7450 = vmatprep.mubr.msk.f32.mxu1 %vm235_vm0, %v8490_v4 }
 0x262   :  { %7451 = vmatmul.mubr.msk.f32.gmra.mxu1 %vm235_vm0, %v8485_v3 }
 0x263   :  { %7482 = vmatprep.mubr.msk.f32.mxu1 %vm149_vm1, %v8499_v7 }
 0x2a9   :  { %v7439_v56 = vpop.f32.mrf.mxu0 }
 0x2ab   :  { %v723_v59 = vpop.f32.mrf.mxu0 }
 0x2ad   :  { %v7442_v63 = vpop.f32.mrf.mxu0 }
 0x2af   :  { %v733_v12 = vpop.f32.mrf.mxu0 }
 0x31e   :  { %v7449_v58 = vpop.f32.mrf.mxu1 }
 0x31f   :  { %v834_v60 = vadd.f32 %v7449_v58, %v8633_v53 }
 0x320   :  { %v828_v61 = vpop.f32.mrf.mxu1 }
 0x321   :  { %v8642_v62 = vmul.f32 %v7439_v56, %v834_v60  ;;  %v829_v13 = vadd.f32 %v828_v61, %v8635_v54  ;;  %v239_v60 = vsel %vm235_vm0, %v8579_v40, 0.0 }
 0x322   :  { %v7452_v0 = vpop.f32.mrf.mxu1 }
 0x323   :  { %v844_v1 = vadd.f32 %v7452_v0, %v8637_v55  ;;  %v855_v2 = vsel %vm851_vm2, %v8642_v62, 0.0  ;;  %v8655_v16 = vmul.f32 %v829_v13, %v723_v59 }
 0x324   :  { %v838_v5 = vpop.f32.mrf.mxu1  ;;  %856 = vadd.xlane.f32.xlu0 %v855_v2 }
 0x325   :  { %v8647_v10 = vmul.f32 %v7442_v63, %v844_v1  ;;  %v839_v11 = vadd.f32 %v838_v5, %v8639_v57  ;;  %v852_v18 = vsel %vm851_vm2, %v8655_v16, 0.0 }
 0x327   :  { %v8651_v14 = vmul.f32 %v839_v11, %v733_v12  ;;  %v861_v15 = vsel %vm851_vm2, %v8647_v10, 0.0 }
 0x328   :  { %862 = vadd.xlane.f32.xlu1 %v861_v15 }
 0x329   :  { %v858_v17 = vsel %vm851_vm2, %v8651_v14, 0.0 }
 0x32c   :  { %859 = vadd.xlane.f32.xlu1 %v858_v17 }
 0x330   :  { %853 = vadd.xlane.f32.xlu1 %v852_v18 }
 0x33a   :  { %1244 = vrot.lane.b32.xlu0 %v8642_v62, %s8361_s5 }
 0x359   :  { %237 = vadd.xlane.f32.xlu0 %v236_v19 }
 0x3ad   :  { %v857_v22 = vpop.xlane.xlu0 %856 }
 0x3ae   :  { %v865_v27 = vmul.f32 0.35355338, %v857_v22 }
 0x3b0   :  { %v869_v31 = vmul.f32 %v865_v27, %v8497_v6 }
 0x3b1   :  { %v863_v20 = vpop.xlane.xlu1 %862 }
 0x3b2   :  { %v867_v21 = vmul.f32 0.35355338, %v863_v20 }
 0x3b4   :  { %v871_v25 = vmul.f32 %v867_v21, %v8485_v3 }
 0x3b5   :  { %v860_v26 = vpop.xlane.xlu1 %859 }
 0x3b6   :  { %v866_v28 = vmul.f32 0.35355338, %v860_v26  ;;  %7453 = vmatprep.subr.mxu0 %v871_v25 }
 0x3b7   :  { %7454 = vmatpush3.msra.mxu0 %v871_v25  ;;  %v1245_v25 = vpop.permute.xlu0 %1244 }
 0x3b8   :  { %v870_v29 = vmul.f32 %v866_v28, %v8490_v4  ;;  %v1257_v26 = vsel %vm851_vm2, %v1245_v25, 0.0 }
 0x3b9   :  { %v854_v30 = vpop.xlane.xlu1 %853 }
 0x3ba   :  { %v864_v33 = vmul.f32 0.35355338, %v854_v30  ;;  %7455 = vmatprep.subr.mxu0 %v870_v29 }
 0x3bb   :  { %7456 = vmatpush3.msra.mxu0 %v870_v29 }
 0x3bc   :  { %v868_v35 = vmul.f32 %v864_v33, %v8507_v8  ;;  %7457 = vmatprep.subr.mxu0 %v869_v31 }
 0x3bd   :  { %7458 = vmatpush3.msra.mxu0 %v869_v31 }
 0x3be   :  { %7459 = vmatprep.subr.mxu0 %v868_v35 }
 0x3bf   :  { %7460 = vmatpush3.msra.mxu0 %v868_v35 }
 0x3c0   :  { %7462 = vmatmul.mubr.msk.f32.vlgmr.msra.gmra.mxu0 %vm149_vm1, %v8513_v9 }
 0x3c1   :  { %7468 = vmatprep.mubr.msk.f32.mxu0 %vm235_vm0, %v8584_v41 }
 0x3e2   :  { %v238_v28 = vpop.xlane.xlu0 %237 }
 0x3e3   :  { %v242_v30 = vmax.f32 %v238_v28, 1.0 }
 0x480   :  { %v7463_v44 = vpop.f32.mrf.mxu0 }
 0x481   :  { %v944_v51 = vadd.f32 %v7463_v44, %v8675_v43 }
 0x482   :  { %v938_v52 = vpop.f32.mrf.mxu0 }
 0x483   :  { %v939_v56 = vadd.f32 %v938_v52, %v8677_v46  ;;  %v950_v58 = vsel %vm235_vm0, %v944_v51, -inf }
 0x484   :  { %951 = vmax.xlane.f32.xlu1 %v950_v58 }
 0x485   :  { %v947_v59 = vsel %vm235_vm0, %v939_v56, -inf }
 0x488   :  { %948 = vmax.xlane.f32.xlu1 %v947_v59 }
 0x499   :  { %1248 = vrot.lane.b32.xlu1 %v8647_v10, %s8361_s5 }
 0x49d   :  { %1246 = vrot.lane.b32.xlu1 %v8651_v14, %s8361_s5 }
 0x4a1   :  { %1242 = vrot.lane.b32.xlu1 %v8655_v16, %s8361_s5 }
 0x4c5   :  { %240 = vadd.xlane.f32.xlu1 %v239_v60 }
 0x50d   :  { %v952_v61 = vpop.xlane.xlu1 %951 }
 0x50e   :  { %v954_v63 = vsub.f32 %v944_v51, %v952_v61 }
 0x510   :  { %v957_v0 = vmul.f32 1.442695, %v954_v63 }
 0x511   :  { %v949_v1 = vpop.xlane.xlu1 %948 }
 0x512   :  { %8025 = vpow2.f32 %v957_v0  ;;  %v953_v2 = vsub.f32 %v939_v56, %v949_v1 }
 0x514   :  { %v955_v5 = vmul.f32 1.442695, %v953_v2 }
 0x515   :  { %v1249_v11 = vpop.permute.xlu1 %1248 }
 0x516   :  { %8027 = vpow2.f32 %v955_v5  ;;  %v1263_v22 = vsel %vm851_vm2, %v1249_v11, 0.0 }
 0x519   :  { %v1247_v12 = vpop.permute.xlu1 %1246 }
 0x51a   :  { %v1260_v13 = vsel %vm851_vm2, %v1247_v12, 0.0 }
 0x51b   :  { %1261 = vadd.xlane.f32.xlu0 %v1260_v13 }
 0x51d   :  { %v1243_v15 = vpop.permute.xlu1 %1242 }
 0x51e   :  { %v1254_v17 = vsel %vm851_vm2, %v1243_v15, 0.0 }
 0x51f   :  { %v8026_v18 = vpop.eup %8025  ;;  %1255 = vadd.xlane.f32.xlu0 %v1254_v17 }
 0x520   :  { %v962_v19 = vsel %vm235_vm0, %v8026_v18, 0.0 }
 0x521   :  { %963 = vadd.xlane.f32.xlu1 %v962_v19 }
 0x523   :  { %v8028_v20 = vpop.eup %8027 }
 0x524   :  { %v959_v21 = vsel %vm235_vm0, %v8028_v20, 0.0 }
 0x525   :  { %960 = vadd.xlane.f32.xlu1 %v959_v21 }
 0x529   :  { %1264 = vadd.xlane.f32.xlu1 %v1263_v22 }
 0x52d   :  { %1258 = vadd.xlane.f32.xlu1 %v1257_v26 }
 0x54e   :  { %v241_v27 = vpop.xlane.xlu1 %240 }
 0x54f   :  { %v243_v29 = vmax.f32 %v241_v27, 1.0 }
 0x551   :  { %8029 = vrcp.f32 %v243_v29 }
 0x552   :  { %8031 = vrcp.f32 %v242_v30 }
 0x55e   :  { %v8030_v35 = vpop.eup %8029 }
 0x55f   :  { %v8032_v36 = vpop.eup %8031  ;;  %v8698_v37 = vmul.f32 %v8030_v35, %v8579_v40 }
 0x560   :  { %v8702_v58 = vmul.f32 %v8032_v36, %v8588_v42 }
 0x5a4   :  { %v1262_v56 = vpop.xlane.xlu0 %1261 }
 0x5a5   :  { %v1268_v40 = vmul.f32 0.35355338, %v1262_v56 }
 0x5a7   :  { %v1272_v42 = vmul.f32 %v1268_v40, %v8490_v4 }
 0x5a8   :  { %v1256_v2 = vpop.xlane.xlu0 %1255 }
 0x5a9   :  { %v1266_v12 = vmul.f32 0.35355338, %v1256_v2 }
 0x5aa   :  { %v964_v31 = vpop.xlane.xlu1 %963 }
 0x5ab   :  { %8033 = vrcp.f32 %v964_v31  ;;  %v1270_v15 = vmul.f32 %v1266_v12, %v8507_v8 }
 0x5ae   :  { %v961_v33 = vpop.xlane.xlu1 %960 }
 0x5af   :  { %8035 = vrcp.f32 %v961_v33 }
 0x5b2   :  { %v1265_v51 = vpop.xlane.xlu1 %1264 }
 0x5b3   :  { %v1269_v61 = vmul.f32 0.35355338, %v1265_v51 }
 0x5b5   :  { %v1273_v5 = vmul.f32 %v1269_v61, %v8485_v3 }
 0x5b6   :  { %v1259_v0 = vpop.xlane.xlu1 %1258 }
 0x5b7   :  { %v1267_v11 = vmul.f32 0.35355338, %v1259_v0 }
 0x5b8   :  { %v8034_v44 = vpop.eup %8033 }
 0x5b9   :  { %v968_v52 = vmul.f32 %v8034_v44, %v8698_v37  ;;  %v1271_v13 = vmul.f32 %v1267_v11, %v8497_v6 }
 0x5bb   :  { %v8704_v59 = vmul.f32 %v8026_v18, %v968_v52 }
 0x5bc   :  { %v8036_v60 = vpop.eup %8035 }
 0x5bd   :  { %7464 = vmatprep.subr.mxu0 %v8704_v59  ;;  %v967_v63 = vmul.f32 %v8036_v60, %v8702_v58 }
 0x5be   :  { %7465 = vmatpush3.msra.mxu0 %v8704_v59 }
 0x5bf   :  { %v8709_v1 = vmul.f32 %v8028_v20, %v967_v63 }
 0x5c1   :  { %7466 = vmatprep.subr.mxu0 %v8709_v1 }
 0x5c2   :  { %7467 = vmatpush3.msra.mxu0 %v8709_v1 }
 0x5c3   :  { %7469 = vmatmul.mubr.msk.f32.vlgmr.msra.gmra.mxu0 %vm235_vm0, %v8601_v48  ;;  %7492 = vmatprep.subr.mxu0 %v1273_v5 }
 0x5c4   :  { %7493 = vmatpush3.msra.mxu0 %v1273_v5  ;;  %7471 = vmatprep.mubr.msk.f32.mxu0 %vm235_vm0, %v8607_v49 }
 0x5c5   :  { %7494 = vmatprep.subr.mxu0 %v1272_v42 }
 0x5c6   :  { %7495 = vmatpush3.msra.mxu0 %v1272_v42 }
 0x5c7   :  { %7472 = vmatmul.mubr.msk.f32.gmra.mxu0 %vm235_vm0, %v8619_v50  ;;  %7496 = vmatprep.subr.mxu0 %v1271_v13 }
 0x5c8   :  { %7497 = vmatpush3.msra.mxu0 %v1271_v13  ;;  %7500 = vmatprep.mubr.msk.f32.mxu0 %vm149_vm1, %v8499_v7 }
 0x5c9   :  { %7498 = vmatprep.subr.mxu0 %v1270_v15 }
 0x5ca   :  { %7499 = vmatpush3.msra.mxu0 %v1270_v15 }
 0x5cb   :  { %7501 = vmatmul.mubr.msk.f32.vlgmr.msra.gmra.mxu0 %vm149_vm1, %v8513_v9 }
 0x5cc   :  { %7521 = vmatprep.mubr.msk.f32.mxu0 %vm149_vm1, %v8499_v7 }
 0x683   :  { %v7470_v17 = vpop.f32.mrf.mxu0 }
 0x684   :  { %v1057_v31 = vmul.f32 %v7470_v17, %v8497_v6 }
 0x685   :  { %v1037_v18 = vpop.f32.mrf.mxu0 }
 0x686   :  { %v1056_v35 = vmul.f32 %v1037_v18, %v8507_v8  ;;  %v1063_v44 = vsel %vm235_vm0, %v1057_v31, 0.0 }
 0x687   :  { %v7473_v19 = vpop.f32.mrf.mxu0 }
 0x688   :  { %v1059_v26 = vmul.f32 %v7473_v19, %v8485_v3  ;;  %v1060_v51 = vsel %vm235_vm0, %v1056_v35, 0.0 }
 0x689   :  { %v1047_v20 = vpop.f32.mrf.mxu0 }
 0x68a   :  { %v1058_v29 = vmul.f32 %v1047_v20, %v8490_v4  ;;  %v1069_v33 = vsel %vm235_vm0, %v1059_v26, 0.0 }
 0x68b   :  { %v7502_v21 = vpop.f32.mrf.mxu0 }
 0x68c   :  { %v1346_v22 = vadd.f32 %v7502_v21, %v8675_v43  ;;  %v1066_v36 = vsel %vm235_vm0, %v1058_v29, 0.0 }
 0x68d   :  { %v1340_v25 = vpop.f32.mrf.mxu0 }
 0x68e   :  { %v1341_v27 = vadd.f32 %v1340_v25, %v8677_v46  ;;  %v1352_v28 = vsel %vm235_vm0, %v1346_v22, -inf }
 0x68f   :  { %1353 = vmax.xlane.f32.xlu1 %v1352_v28 }
 0x690   :  { %v1349_v30 = vsel %vm235_vm0, %v1341_v27, -inf }
 0x691   :  { %1350 = vmax.xlane.f32.xlu0 %v1349_v30 }
 0x693   :  { %1070 = vadd.xlane.f32.xlu1 %v1069_v33 }
 0x695   :  { %1067 = vadd.xlane.f32.xlu0 %v1066_v36 }
 0x697   :  { %1064 = vadd.xlane.f32.xlu1 %v1063_v44 }
 0x699   :  { %1061 = vadd.xlane.f32.xlu0 %v1060_v51 }
 0x718   :  { %v1354_v52 = vpop.xlane.xlu1 %1353 }
 0x719   :  { %v1356_v56 = vsub.f32 %v1346_v22, %v1354_v52 }
 0x71a   :  { %v1351_v60 = vpop.xlane.xlu0 %1350 }
 0x71b   :  { %v1359_v61 = vmul.f32 1.442695, %v1356_v56  ;;  %v1355_v63 = vsub.f32 %v1341_v27, %v1351_v60 }
 0x71c   :  { %v1071_v0 = vpop.xlane.xlu1 %1070 }
 0x71d   :  { %8037 = vpow2.f32 %v1359_v61  ;;  %v1357_v40 = vmul.f32 1.442695, %v1355_v63  ;;  %v1075_v2 = vmul.f32 %v8637_v55, %v1071_v0 }
 0x71e   :  { %v1068_v5 = vpop.xlane.xlu0 %1067 }
 0x71f   :  { %8039 = vpow2.f32 %v1357_v40  ;;  %v1074_v11 = vmul.f32 %v1068_v5, %v8639_v57  ;;  %7474 = vmatprep.subr.mxu1 %v1075_v2 }
 0x720   :  { %7475 = vmatpush3.msra.mxu1 %v1075_v2  ;;  %v1065_v42 = vpop.xlane.xlu1 %1064 }
 0x721   :  { %v1073_v12 = vmul.f32 %v8633_v53, %v1065_v42  ;;  %7476 = vmatprep.subr.mxu1 %v1074_v11 }
 0x722   :  { %7477 = vmatpush3.msra.mxu1 %v1074_v11  ;;  %v1062_v13 = vpop.xlane.xlu0 %1061 }
 0x723   :  { %v1072_v15 = vmul.f32 %v1062_v13, %v8635_v54  ;;  %7478 = vmatprep.subr.mxu1 %v1073_v12 }
 0x724   :  { %7479 = vmatpush3.msra.mxu1 %v1073_v12 }
 0x725   :  { %7480 = vmatprep.subr.mxu1 %v1072_v15 }
 0x726   :  { %7481 = vmatpush3.msra.mxu1 %v1072_v15 }
 0x727   :  { %7483 = vmatmul.mubr.msk.f32.vlgmr.msra.gmra.mxu1 %vm149_vm1, %v8513_v9 }
 0x728   :  { %7489 = vmatprep.mubr.msk.f32.mxu1 %vm235_vm0, %v8709_v1 }
 0x72a   :  { %v8038_v17 = vpop.eup %8037 }
 0x72b   :  { %v1364_v18 = vsel %vm235_vm0, %v8038_v17, 0.0 }
 0x72c   :  { %v8040_v19 = vpop.eup %8039  ;;  %1365 = vadd.xlane.f32.xlu1 %v1364_v18 }
 0x72d   :  { %v1361_v20 = vsel %vm235_vm0, %v8040_v19, 0.0 }
 0x72e   :  { %1362 = vadd.xlane.f32.xlu0 %v1361_v20 }
 0x73d   :  { %1153 = vrot.lane.b32.xlu1 %v8590_v45, %s8362_s17 }
 0x741   :  { %1660 = vrot.lane.b32.xlu1 %v8651_v14, %s8363_s20 }
 0x744   :  { %1151 = vrot.lane.b32.xlu0 %v8592_v47, %s8362_s17 }
 0x748   :  { %1662 = vrot.lane.b32.xlu0 %v8647_v10, %s8363_s20 }
 0x7b5   :  { %v1366_v1 = vpop.xlane.xlu1 %1365 }
 0x7b6   :  { %8041 = vrcp.f32 %v1366_v1 }
 0x7b7   :  { %v1363_v21 = vpop.xlane.xlu0 %1362 }
 0x7b8   :  { %8043 = vrcp.f32 %v1363_v21 }
 0x7b9   :  { %v1154_v22 = vpop.permute.xlu1 %1153 }
 0x7ba   :  { %7485 = vmatprep.subr.mxu1 %v1154_v22 }
 0x7bb   :  { %7486 = vmatpush3.msra.mxu1 %v1154_v22  ;;  %v1152_v25 = vpop.permute.xlu0 %1151 }
 0x7bc   :  { %7487 = vmatprep.subr.mxu1 %v1152_v25 }
 0x7bd   :  { %7488 = vmatpush3.msra.mxu1 %v1152_v25  ;;  %v1661_v13 = vpop.permute.xlu1 %1660 }
 0x7be   :  { %7490 = vmatmul.mubr.msk.f32.vlgmr.msra.gmra.mxu1 %vm235_vm0, %v8704_v59 }
 0x7bf   :  { %7507 = vmatprep.mubr.msk.f32.mxu1 %vm235_vm0, %v8584_v41  ;;  %v1663_v12 = vpop.permute.xlu0 %1662 }
 0x7c0   :  { %v1677_v15 = vsel %vm851_vm2, %v1663_v12, 0.0 }
 0x7c3   :  { %v8042_v26 = vpop.eup %8041 }
 0x7c4   :  { %v1370_v27 = vmul.f32 %v8042_v26, %v8698_v37 }
 0x7c5   :  { %v8044_v28 = vpop.eup %8043 }
 0x7c6   :  { %v8764_v29 = vmul.f32 %v8038_v17, %v1370_v27  ;;  %v1369_v30 = vmul.f32 %v8044_v28, %v8702_v58  ;;  %v1674_v17 = vsel %vm851_vm2, %v1661_v13, 0.0 }
 0x7c8   :  { %7503 = vmatprep.subr.mxu1 %v8764_v29  ;;  %v1371_v31 = vmul.f32 %v8040_v19, %v1369_v30 }
 0x7c9   :  { %7504 = vmatpush3.msra.mxu1 %v8764_v29 }
 0x7ca   :  { %7505 = vmatprep.subr.mxu1 %v1371_v31 }
 0x7cb   :  { %7506 = vmatpush3.msra.mxu1 %v1371_v31 }
 0x7cc   :  { %7508 = vmatmul.mubr.msk.f32.vlgmr.msra.gmra.mxu1 %vm235_vm0, %v8601_v48 }
 0x7cd   :  { %7510 = vmatprep.mubr.msk.f32.mxu1 %vm235_vm0, %v8607_v49 }
 0x7d0   :  { %7511 = vmatmul.mubr.msk.f32.gmra.mxu1 %vm235_vm0, %v8619_v50 }
 0x7d1   :  { %7528 = vmatprep.mubr.msk.f32.mxu1 %vm235_vm0, %v1371_v31 }
 0x7e7   :  { %v8776_v59 = vpop.f32.mrf.mxu1 }
 0x7e9   :  { %v1142_v33 = vpop.f32.mrf.mxu1 }
 0x87e   :  { %v8778_v35 = vpop.f32.mrf.mxu1 }
 0x880   :  { %v1229_v36 = vpop.f32.mrf.mxu1 }
 0x881   :  { %v8780_v44 = vadd.f32 %v1229_v36, %v1142_v33 }
 0x88c   :  { %v7509_v51 = vpop.f32.mrf.mxu1 }
 0x88d   :  { %v1459_v52 = vmul.f32 %v7509_v51, %v8497_v6 }
 0x88e   :  { %v1439_v56 = vpop.f32.mrf.mxu1 }
 0x88f   :  { %v1458_v60 = vmul.f32 %v1439_v56, %v8507_v8  ;;  %v1465_v61 = vsel %vm235_vm0, %v1459_v52, 0.0 }
 0x890   :  { %1466 = vadd.xlane.f32.xlu1 %v1465_v61  ;;  %v7512_v63 = vpop.f32.mrf.mxu1 }
 0x891   :  { %v1461_v40 = vmul.f32 %v7512_v63, %v8485_v3  ;;  %v1462_v5 = vsel %vm235_vm0, %v1458_v60, 0.0 }
 0x892   :  { %v1449_v0 = vpop.f32.mrf.mxu1 }
 0x893   :  { %v1460_v2 = vmul.f32 %v1449_v0, %v8490_v4  ;;  %v1471_v42 = vsel %vm235_vm0, %v1461_v40, 0.0 }
 0x894   :  { %1463 = vadd.xlane.f32.xlu1 %v1462_v5 }
 0x895   :  { %v1468_v11 = vsel %vm235_vm0, %v1460_v2, 0.0 }
 0x896   :  { %1469 = vadd.xlane.f32.xlu0 %v1468_v11 }
 0x898   :  { %1472 = vadd.xlane.f32.xlu1 %v1471_v42 }
 0x8a9   :  { %1656 = vrot.lane.b32.xlu1 %v8655_v16, %s8363_s20 }
 0x8ac   :  { %1658 = vrot.lane.b32.xlu0 %v8642_v62, %s8363_s20 }
 0x8cb   :  { %1678 = vadd.xlane.f32.xlu0 %v1677_v15 }
 0x8cd   :  { %1675 = vadd.xlane.f32.xlu1 %v1674_v17 }
 0x919   :  { %v1467_v18 = vpop.xlane.xlu1 %1466 }
 0x91a   :  { %v1475_v27 = vmul.f32 %v8633_v53, %v1467_v18 }
 0x91d   :  { %v1464_v19 = vpop.xlane.xlu1 %1463 }
 0x91e   :  { %v1474_v30 = vmul.f32 %v1464_v19, %v8635_v54 }
 0x91f   :  { %v1470_v20 = vpop.xlane.xlu0 %1469 }
 0x920   :  { %v1476_v31 = vmul.f32 %v1470_v20, %v8639_v57 }
 0x921   :  { %v1473_v1 = vpop.xlane.xlu1 %1472 }
 0x922   :  { %v1477_v21 = vmul.f32 %v8637_v55, %v1473_v1 }
 0x923   :  { %v1659_v22 = vpop.permute.xlu0 %1658 }
 0x924   :  { %1488 = vrot.lane.b32.xlu1 %v1477_v21, %s8361_s5  ;;  %v1671_v25 = vsel %vm851_vm2, %v1659_v22, 0.0 }
 0x925   :  { %v1657_v26 = vpop.permute.xlu1 %1656  ;;  %1672 = vadd.xlane.f32.xlu0 %v1671_v25 }
 0x926   :  { %v1668_v28 = vsel %vm851_vm2, %v1657_v26, 0.0 }
 0x928   :  { %1484 = vrot.lane.b32.xlu1 %v1475_v27, %s8361_s5 }
 0x929   :  { %1669 = vadd.xlane.f32.xlu0 %v1668_v28 }
 0x92c   :  { %1482 = vrot.lane.b32.xlu1 %v1474_v30, %s8361_s5 }
 0x93f   :  { %1486 = vrot.lane.b32.xlu0 %v1476_v31, %s8361_s5 }
 0x954   :  { %v1679_v51 = vpop.xlane.xlu0 %1678 }
 0x955   :  { %v1683_v63 = vmul.f32 0.35355338, %v1679_v51 }
 0x956   :  { %v1676_v33 = vpop.xlane.xlu1 %1675 }
 0x957   :  { %v1682_v0 = vmul.f32 0.35355338, %v1676_v33  ;;  %v1687_v2 = vmul.f32 %v1683_v63, %v8485_v3 }
 0x959   :  { %v1686_v11 = vmul.f32 %v1682_v0, %v8490_v4 }
 0x996   :  { %v1489_v36 = vpop.permute.xlu1 %1488 }
 0x997   :  { %7513 = vmatprep.subr.mxu0 %v1489_v36 }
 0x998   :  { %7514 = vmatpush3.msra.mxu0 %v1489_v36 }
 0x99a   :  { %v1485_v60 = vpop.permute.xlu1 %1484 }
 0x99e   :  { %v1483_v40 = vpop.permute.xlu1 %1482 }
 0x9ae   :  { %v1673_v52 = vpop.xlane.xlu0 %1672 }
 0x9af   :  { %v1681_v5 = vmul.f32 0.35355338, %v1673_v52 }
 0x9b1   :  { %v1685_v12 = vmul.f32 %v1681_v5, %v8497_v6 }
 0x9b2   :  { %v1670_v56 = vpop.xlane.xlu0 %1669 }
 0x9b3   :  { %v1680_v42 = vmul.f32 0.35355338, %v1670_v56 }
 0x9b5   :  { %v1684_v13 = vmul.f32 %v1680_v42, %v8507_v8 }
 0x9b6   :  { %v1487_v61 = vpop.permute.xlu0 %1486 }
 0x9b7   :  { %7515 = vmatprep.subr.mxu0 %v1487_v61 }
 0x9b8   :  { %7516 = vmatpush3.msra.mxu0 %v1487_v61 }
 0x9b9   :  { %7517 = vmatprep.subr.mxu0 %v1485_v60 }
 0x9ba   :  { %7518 = vmatpush3.msra.mxu0 %v1485_v60 }
 0x9bb   :  { %7519 = vmatprep.subr.mxu0 %v1483_v40 }
 0x9bc   :  { %7520 = vmatpush3.msra.mxu0 %v1483_v40 }
 0x9bd   :  { %7522 = vmatmul.mubr.msk.f32.vlgmr.msra.gmra.mxu0 %vm149_vm1, %v8513_v9  ;;  %7531 = vmatprep.subr.mxu0 %v1687_v2 }
 0x9be   :  { %7532 = vmatpush3.msra.mxu0 %v1687_v2  ;;  %7539 = vmatprep.mubr.msk.f32.mxu0 %vm149_vm1, %v8499_v7 }
 0x9bf   :  { %7533 = vmatprep.subr.mxu0 %v1686_v11 }
 0x9c0   :  { %7534 = vmatpush3.msra.mxu0 %v1686_v11 }
 0x9c1   :  { %7535 = vmatprep.subr.mxu0 %v1685_v12 }
 0x9c2   :  { %7536 = vmatpush3.msra.mxu0 %v1685_v12 }
 0x9c3   :  { %7537 = vmatprep.subr.mxu0 %v1684_v13 }
 0x9c4   :  { %7538 = vmatpush3.msra.mxu0 %v1684_v13 }
 0x9c5   :  { %7540 = vmatmul.mubr.msk.f32.vlgmr.msra.gmra.mxu0 %vm149_vm1, %v8513_v9 }
 0xa7d   :  { %v8816_v4 = vpop.f32.mrf.mxu0 }
 0xa7f   :  { %v8818_v15 = vpop.f32.mrf.mxu0 }
 0xa85   :  { %v7541_v17 = vpop.f32.mrf.mxu0 }
 0xa86   :  { %v1760_v7 = vadd.f32 %v7541_v17, %v8675_v43 }
 0xa87   :  { %v1754_v18 = vpop.f32.mrf.mxu0 }
 0xa88   :  { %v1755_v6 = vadd.f32 %v1754_v18, %v8677_v46  ;;  %v1766_v19 = vsel %vm235_vm0, %v1760_v7, -inf }
 0xa89   :  { %1767 = vmax.xlane.f32.xlu1 %v1766_v19 }
 0xa8a   :  { %v1763_v20 = vsel %vm235_vm0, %v1755_v6, -inf }
 0xa8b   :  { %1764 = vmax.xlane.f32.xlu0 %v1763_v20 }
 0xa9a   :  { %2074 = vrot.lane.b32.xlu1 %v8651_v14, %s8364_s6 }
 0xa9e   :  { %2070 = vrot.lane.b32.xlu1 %v8655_v16, %s8364_s6 }
 0xaa1   :  { %2076 = vrot.lane.b32.xlu0 %v8647_v10, %s8364_s6 }
 0xaa5   :  { %2072 = vrot.lane.b32.xlu0 %v8642_v62, %s8364_s6 }
 0xb12   :  { %v1768_v9 = vpop.xlane.xlu1 %1767 }
 0xb13   :  { %v1770_v1 = vsub.f32 %v1760_v7, %v1768_v9 }
 0xb14   :  { %v1765_v21 = vpop.xlane.xlu0 %1764 }
 0xb15   :  { %v1773_v22 = vmul.f32 1.442695, %v1770_v1  ;;  %v1769_v25 = vsub.f32 %v1755_v6, %v1765_v21 }
 0xb16   :  { %v2075_v27 = vpop.permute.xlu1 %2074 }
 0xb17   :  { %8045 = vpow2.f32 %v1773_v22  ;;  %v1771_v26 = vmul.f32 1.442695, %v1769_v25  ;;  %v2088_v30 = vsel %vm851_vm2, %v2075_v27, 0.0  ;;  %v8869_v25 = vld [vmem:[#allocation5] sm:$0xff] }
 0xb18   :  { %v2077_v28 = vpop.permute.xlu0 %2076 }
 0xb19   :  { %8047 = vpow2.f32 %v1771_v26  ;;  %v2091_v14 = vsel %vm851_vm2, %v2077_v28, 0.0 }
 0xb1a   :  { %2092 = vadd.xlane.f32.xlu0 %v2091_v14  ;;  %v2071_v31 = vpop.permute.xlu1 %2070 }
 0xb1b   :  { %v2082_v62 = vsel %vm851_vm2, %v2071_v31, 0.0  ;;  %v8896_v31 = vld [vmem:[%s9934_s1 + $0x18] sm:$0xff] }
 0xb1c   :  { %v2073_v16 = vpop.permute.xlu0 %2072 }
 0xb1d   :  { %v2085_v10 = vsel %vm851_vm2, %v2073_v16, 0.0 }
 0xb1e   :  { %2089 = vadd.xlane.f32.xlu0 %v2088_v30  ;;  %2086 = vadd.xlane.f32.xlu1 %v2085_v10 }
 0xb22   :  { %2083 = vadd.xlane.f32.xlu0 %v2082_v62 }
 0xb24   :  { %v8046_v33 = vpop.eup %8045 }
 0xb25   :  { %v1778_v36 = vsel %vm235_vm0, %v8046_v33, 0.0 }
 0xb26   :  { %v8048_v51 = vpop.eup %8047  ;;  %1779 = vadd.xlane.f32.xlu1 %v1778_v36 }
 0xb27   :  { %v1775_v52 = vsel %vm235_vm0, %v8048_v51, 0.0 }
 0xb28   :  { %1776 = vadd.xlane.f32.xlu0 %v1775_v52 }
 0xb37   :  { %1985 = vrot.lane.b32.xlu1 %v8590_v45, %s8365_s7 }
 0xb3b   :  { %1571 = vrot.lane.b32.xlu1 %v8590_v45, %s8366_s16 }
 0xb3e   :  { %1983 = vrot.lane.b32.xlu0 %v8592_v47, %s8365_s7 }
 0xb3f   :  { %1569 = vrot.lane.b32.xlu1 %v8592_v47, %s8366_s16 }
 0xba3   :  { %v2093_v56 = vpop.xlane.xlu0 %2092 }
 0xba4   :  { %v2097_v2 = vmul.f32 0.35355338, %v2093_v56 }
 0xba6   :  { %v2101_v42 = vmul.f32 %v2097_v2, %v8485_v3 }
 0xba7   :  { %v2090_v60 = vpop.xlane.xlu0 %2089  ;;  %v2087_v61 = vpop.xlane.xlu1 %2086 }
 0xba8   :  { %v2096_v19 = vmul.f32 0.35355338, %v2090_v60  ;;  %v2095_v9 = vmul.f32 0.35355338, %v2087_v61 }
 0xbab   :  { %v2084_v63 = vpop.xlane.xlu0 %2083 }
 0xbac   :  { %v2094_v21 = vmul.f32 0.35355338, %v2084_v63 }
 0xbae   :  { %v2098_v26 = vmul.f32 %v2094_v21, %v8507_v8 }
 0xbaf   :  { %v1780_v0 = vpop.xlane.xlu1 %1779 }
 0xbb0   :  { %8049 = vrcp.f32 %v1780_v0 }
 0xbb1   :  { %v1777_v40 = vpop.xlane.xlu0 %1776 }
 0xbb2   :  { %8051 = vrcp.f32 %v1777_v40  ;;  %v8909_v40 = vld [vmem:[%s9934_s1] sm:$0xff] }
 0xbb3   :  { %v1986_v5 = vpop.permute.xlu1 %1985 }
 0xbb4   :  { %7563 = vmatprep.subr.mxu0 %v1986_v5 }
 0xbb5   :  { %7564 = vmatpush3.msra.mxu0 %v1986_v5  ;;  %v1984_v11 = vpop.permute.xlu0 %1983 }
 0xbb6   :  { %7565 = vmatprep.subr.mxu0 %v1984_v11 }
 0xbb7   :  { %v1572_v12 = vpop.permute.xlu1 %1571  ;;  %7566 = vmatpush3.msra.mxu0 %v1984_v11 }
 0xbb8   :  { %7524 = vmatprep.subr.mxu1 %v1572_v12  ;;  %7570 = vmatprep.subr.mxu0 %v2101_v42 }
 0xbb9   :  { %7525 = vmatpush3.msra.mxu1 %v1572_v12 }
 0xbbb   :  { %v1570_v13 = vpop.permute.xlu1 %1569 }
 0xbbc   :  { %7526 = vmatprep.subr.mxu1 %v1570_v13 }
 0xbbd   :  { %v8050_v17 = vpop.eup %8049  ;;  %7527 = vmatpush3.msra.mxu1 %v1570_v13 }
 0xbbe   :  { %7529 = vmatmul.mubr.msk.f32.vlgmr.msra.gmra.mxu1 %vm235_vm0, %v8764_v29  ;;  %v1784_v7 = vmul.f32 %v8050_v17, %v8698_v37  ;;  %v8857_v29 = vld [vmem:[%s9934_s1 + $0x10] sm:$0xff] }
 0xbbf   :  { %v8052_v18 = vpop.eup %8051  ;;  %7546 = vmatprep.mubr.msk.f32.mxu1 %vm235_vm0, %v8584_v41  ;;  %v2100_v1 = vmul.f32 %v8857_v29, %v2096_v19  ;;  %v8866_v41 = vld [vmem:[%s9934_s1 + $0x8] sm:$0xff] }
 0xbc0   :  { %v1786_v3 = vmul.f32 %v8046_v33, %v1784_v7  ;;  %v1783_v6 = vmul.f32 %v8052_v18, %v8702_v58  ;;  %v2099_v22 = vmul.f32 %v8866_v41, %v2095_v9 }
 0xbc2   :  { %7542 = vmatprep.subr.mxu1 %v1786_v3  ;;  %v1785_v20 = vmul.f32 %v8048_v51, %v1783_v6 }
 0xbc3   :  { %7543 = vmatpush3.msra.mxu1 %v1786_v3 }
 0xbc4   :  { %7544 = vmatprep.subr.mxu1 %v1785_v20  ;;  %7567 = vmatprep.mubr.msk.f32.mxu0 %vm235_vm0, %v1785_v20 }
 0xbc5   :  { %7545 = vmatpush3.msra.mxu1 %v1785_v20  ;;  %7568 = vmatmul.mubr.msk.f32.vlgmr.msra.gmra.mxu0 %vm235_vm0, %v1786_v3 }
 0xbc6   :  { %7571 = vmatpush3.msra.mxu0 %v2101_v42  ;;  %7547 = vmatmul.mubr.msk.f32.vlgmr.msra.gmra.mxu1 %vm235_vm0, %v8601_v48  ;;  %v8880_v48 = vld [vmem:[#allocation5 + $0x8] sm:$0xff] }
 0xbc7   :  { %7572 = vmatprep.subr.mxu0 %v2100_v1  ;;  %7578 = vmatprep.mubr.msk.f32.mxu0 %vm149_vm1, %v8869_v25 }
 0xbc8   :  { %7573 = vmatpush3.msra.mxu0 %v2100_v1  ;;  %7549 = vmatprep.mubr.msk.f32.mxu1 %vm235_vm0, %v8607_v49 }
 0xbc9   :  { %7574 = vmatprep.subr.mxu0 %v2099_v22 }
 0xbca   :  { %7575 = vmatpush3.msra.mxu0 %v2099_v22  ;;  %7550 = vmatmul.mubr.msk.f32.gmra.mxu1 %vm235_vm0, %v8619_v50 }
 0xbcb   :  { %7576 = vmatprep.subr.mxu0 %v2098_v26  ;;  %7560 = vmatprep.mubr.msk.f32.mxu1 %vm149_vm1, %v8869_v25 }
 0xbcc   :  { %7577 = vmatpush3.msra.mxu0 %v2098_v26 }
 0xbcd   :  { %7579 = vmatmul.mubr.msk.f32.vlgmr.msra.gmra.mxu0 %vm149_vm1, %v8880_v48 }
 0xc7e   :  { %v8884_v27 = vpop.f32.mrf.mxu1 }
 0xc80   :  { %v8886_v49 = vpop.f32.mrf.mxu1 }
 0xc85   :  { %v8888_v28 = vpop.f32.mrf.mxu0 }
 0xc86   :  { %v7548_v8 = vpop.f32.mrf.mxu1 }
 0xc87   :  { %v8890_v16 = vpop.f32.mrf.mxu0  ;;  %v1873_v56 = vmul.f32 %v8866_v41, %v7548_v8 }
 0xc88   :  { %v1853_v14 = vpop.f32.mrf.mxu1 }
 0xc89   :  { %v1879_v0 = vsel %vm235_vm0, %v1873_v56, 0.0  ;;  %v1872_v2 = vmul.f32 %v8909_v40, %v1853_v14 }
 0xc8a   :  { %v7551_v30 = vpop.f32.mrf.mxu1 }
 0xc8b   :  { %v1875_v62 = vmul.f32 %v8896_v31, %v7551_v30  ;;  %v1876_v11 = vsel %vm235_vm0, %v1872_v2, 0.0 }
 0xc8c   :  { %v1863_v52 = vpop.f32.mrf.mxu1 }
 0xc8d   :  { %v7580_v50 = vpop.f32.mrf.mxu0  ;;  %v1885_v61 = vsel %vm235_vm0, %v1875_v62, 0.0  ;;  %v1874_v63 = vmul.f32 %v8857_v29, %v1863_v52 }
 0xc8e   :  { %v2174_v10 = vadd.f32 %v7580_v50, %v8675_v43 }
 0xc8f   :  { %v2168_v33 = vpop.f32.mrf.mxu0  ;;  %v1882_v5 = vsel %vm235_vm0, %v1874_v63, 0.0 }
 0xc90   :  { %v2169_v36 = vadd.f32 %v2168_v33, %v8677_v46  ;;  %v2180_v51 = vsel %vm235_vm0, %v2174_v10, -inf }
 0xc91   :  { %2181 = vmax.xlane.f32.xlu0 %v2180_v51 }
 0xc92   :  { %v2177_v60 = vsel %vm235_vm0, %v2169_v36, -inf }
 0xc93   :  { %2178 = vmax.xlane.f32.xlu1 %v2177_v60 }
 0xc95   :  { %1886 = vadd.xlane.f32.xlu0 %v1885_v61  ;;  %v8931_v61 = vld [vmem:[%s9935_s2] sm:$0xff] }
 0xc97   :  { %1880 = vadd.xlane.f32.xlu1 %v1879_v0 }
 0xc99   :  { %1883 = vadd.xlane.f32.xlu0 %v1882_v5  ;;  %v8943_v5 = vld [vmem:[%s9935_s2 + $0x8] sm:$0xff] }
 0xc9d   :  { %1877 = vadd.xlane.f32.xlu0 %v1876_v11  ;;  %v8950_v11 = vld [vmem:[%s9935_s2 + $0x10] sm:$0xff] }
 0xd1a   :  { %v2182_v42 = vpop.xlane.xlu0 %2181 }
 0xd1b   :  { %v2184_v3 = vsub.f32 %v2174_v10, %v2182_v42  ;;  %v8957_v42 = vld [vmem:[%s9935_s2 + $0x18] sm:$0xff] }
 0xd1c   :  { %v2179_v12 = vpop.xlane.xlu1 %2178 }
 0xd1d   :  { %v2183_v13 = vsub.f32 %v2169_v36, %v2179_v12  ;;  %v2187_v20 = vmul.f32 1.442695, %v2184_v3 }
 0xd1e   :  { %v1887_v17 = vpop.xlane.xlu0 %1886 }
 0xd1f   :  { %v2185_v7 = vmul.f32 1.442695, %v2183_v13  ;;  %v1891_v18 = vmul.f32 %v8637_v55, %v1887_v17 }
 0xd20   :  { %v1881_v26 = vpop.xlane.xlu1 %1880 }
 0xd21   :  { %8053 = vpow2.f32 %v2185_v7  ;;  %1902 = vrot.lane.b32.xlu1 %v1891_v18, %s8363_s20  ;;  %v1889_v8 = vmul.f32 %v8633_v53, %v1881_v26 }
 0xd22   :  { %8055 = vpow2.f32 %v2187_v20  ;;  %v1884_v1 = vpop.xlane.xlu0 %1883 }
 0xd23   :  { %v1890_v21 = vmul.f32 %v1884_v1, %v8639_v57 }
 0xd26   :  { %v1878_v14 = vpop.xlane.xlu0 %1877 }
 0xd27   :  { %v1888_v50 = vmul.f32 %v1878_v14, %v8635_v54 }
 0xd2e   :  { %v8054_v6 = vpop.eup %8053 }
 0xd2f   :  { %v2189_v19 = vsel %vm235_vm0, %v8054_v6, 0.0  ;;  %v8056_v9 = vpop.eup %8055 }
 0xd30   :  { %2190 = vadd.xlane.f32.xlu0 %v2189_v19  ;;  %v2192_v22 = vsel %vm235_vm0, %v8056_v9, 0.0 }
 0xd45   :  { %2193 = vadd.xlane.f32.xlu1 %v2192_v22 }
 0xd46   :  { %1900 = vrot.lane.b32.xlu0 %v1890_v21, %s8363_s20 }
 0xd56   :  { %1898 = vrot.lane.b32.xlu1 %v1889_v8, %s8363_s20 }
 0xd5a   :  { %1896 = vrot.lane.b32.xlu1 %v1888_v50, %s8363_s20 }
 0xd93   :  { %v1903_v30 = vpop.permute.xlu1 %1902 }
 0xd94   :  { %7552 = vmatprep.subr.mxu1 %v1903_v30 }
 0xd95   :  { %7553 = vmatpush3.msra.mxu1 %v1903_v30 }
 0xdb9   :  { %v2191_v10 = vpop.xlane.xlu0 %2190 }
 0xdba   :  { %8057 = vrcp.f32 %v2191_v10 }
 0xdbd   :  { %v1901_v62 = vpop.permute.xlu0 %1900 }
 0xdbe   :  { %7554 = vmatprep.subr.mxu1 %v1901_v62 }
 0xdbf   :  { %7555 = vmatpush3.msra.mxu1 %v1901_v62 }
 0xdc7   :  { %v8058_v33 = vpop.eup %8057 }
 0xdc8   :  { %v2197_v36 = vmul.f32 %v8058_v33, %v8702_v58 }
 0xdca   :  { %v2199_v51 = vmul.f32 %v8054_v6, %v2197_v36 }
 0xdcc   :  { %7606 = vmatprep.mubr.msk.f32.mxu0 %vm235_vm0, %v2199_v51 }
 0xdce   :  { %v2194_v52 = vpop.xlane.xlu1 %2193 }
 0xdcf   :  { %8059 = vrcp.f32 %v2194_v52 }
 0xdd2   :  { %v1899_v56 = vpop.permute.xlu1 %1898 }
 0xdd3   :  { %7556 = vmatprep.subr.mxu1 %v1899_v56 }
 0xdd4   :  { %7557 = vmatpush3.msra.mxu1 %v1899_v56 }
 0xdd6   :  { %v1897_v60 = vpop.permute.xlu1 %1896 }
 0xdd7   :  { %7558 = vmatprep.subr.mxu1 %v1897_v60 }
 0xdd8   :  { %7559 = vmatpush3.msra.mxu1 %v1897_v60 }
 0xdd9   :  { %7561 = vmatmul.mubr.msk.f32.vlgmr.msra.gmra.mxu1 %vm149_vm1, %v8880_v48 }
 0xdda   :  { %7585 = vmatprep.mubr.msk.f32.mxu1 %vm235_vm0, %v8931_v61 }
 0xddc   :  { %v8060_v63 = vpop.eup %8059 }
 0xddd   :  { %v2198_v0 = vmul.f32 %v8060_v63, %v8698_v37 }
 0xddf   :  { %v8936_v2 = vmul.f32 %v8056_v9, %v2198_v0 }
 0xde1   :  { %7581 = vmatprep.subr.mxu1 %v8936_v2 }
 0xde2   :  { %7582 = vmatpush3.msra.mxu1 %v8936_v2 }
 0xde3   :  { %7583 = vmatprep.subr.mxu1 %v2199_v51 }
 0xde4   :  { %7584 = vmatpush3.msra.mxu1 %v2199_v51 }
 0xde5   :  { %7586 = vmatmul.mubr.msk.f32.vlgmr.msra.gmra.mxu1 %vm235_vm0, %v8943_v5 }
 0xde6   :  { %7588 = vmatprep.mubr.msk.f32.mxu1 %vm235_vm0, %v8950_v11 }
 0xde9   :  { %7589 = vmatmul.mubr.msk.f32.gmra.mxu1 %vm235_vm0, %v8957_v42 }
 0xdea   :  { %7599 = vmatprep.mubr.msk.f32.mxu1 %vm149_vm1, %v8869_v25 }
 0xe99   :  { %v7562_v12 = vpop.f32.mrf.mxu1 }
 0xe9b   :  { %v1974_v13 = vpop.f32.mrf.mxu1 }
 0xe9c   :  { %v2062_v51 = vadd.f32 %v8890_v16, %v1974_v13  ;;  %v6909_v16 = vld [vmem:[%s9944_s11 + $0x10] sm:$0xff] }
 0xea5   :  { %v7587_v17 = vpop.f32.mrf.mxu1 }
 0xea6   :  { %v2287_v19 = vmul.f32 %v8866_v41, %v7587_v17 }
 0xea7   :  { %v2267_v7 = vpop.f32.mrf.mxu1 }
 0xea8   :  { %v2286_v21 = vmul.f32 %v8909_v40, %v2267_v7  ;;  %v2293_v22 = vsel %vm235_vm0, %v2287_v19, 0.0 }
 0xea9   :  { %v7590_v18 = vpop.f32.mrf.mxu1 }
 0xeaa   :  { %v2289_v3 = vmul.f32 %v8896_v31, %v7590_v18  ;;  %v2290_v26 = vsel %vm235_vm0, %v2286_v21, 0.0 }
 0xeab   :  { %v2277_v6 = vpop.f32.mrf.mxu1 }
 0xeac   :  { %v2288_v20 = vmul.f32 %v8857_v29, %v2277_v6  ;;  %v2299_v9 = vsel %vm235_vm0, %v2289_v3, 0.0 }
 0xead   :  { %2300 = vadd.xlane.f32.xlu0 %v2299_v9  ;;  %v1235_v9 = vadd.f32 %v8778_v35, %v8776_v59 }
 0xeae   :  { %v2296_v1 = vsel %vm235_vm0, %v2288_v20, 0.0 }
 0xeaf   :  { %2297 = vadd.xlane.f32.xlu1 %v2296_v1 }
 0xeb1   :  { %2294 = vadd.xlane.f32.xlu0 %v2293_v22 }
 0xeb5   :  { %2291 = vadd.xlane.f32.xlu0 %v2290_v26 }
 0xf36   :  { %v2301_v8 = vpop.xlane.xlu0 %2300 }
 0xf37   :  { %v2305_v33 = vmul.f32 %v8637_v55, %v2301_v8  ;;  %v2067_v55 = vadd.f32 %v8888_v28, %v7562_v12 }
 0xf38   :  { %v2298_v14 = vpop.xlane.xlu1 %2297 }
 0xf39   :  { %v2304_v50 = vmul.f32 %v2298_v14, %v8639_v57  ;;  %v6901_v57 = vld [vmem:[%s9946_s13] ss:$0 sm:$0xff] }
 0xf3a   :  { %v2295_v30 = vpop.xlane.xlu0 %2294 }
 0xf3b   :  { %v2303_v10 = vmul.f32 %v8633_v53, %v2295_v30  ;;  %2314 = vrot.lane.b32.xlu0 %v2304_v50, %s8364_s6  ;;  %v1653_v53 = vadd.f32 %v8884_v27, %v8816_v4  ;;  %v6900_v50 = vld [vmem:[%s9945_s12] ss:$0 sm:$0xff] }
 0xf3d   :  { %2312 = vrot.lane.b32.xlu1 %v2303_v10, %s8364_s6 }
 0xf3e   :  { %v2292_v62 = vpop.xlane.xlu0 %2291 }
 0xf3f   :  { %v2302_v36 = vmul.f32 %v2292_v62, %v8635_v54  ;;  %v1648_v54 = vadd.f32 %v8886_v49, %v8818_v15  ;;  %v6910_v49 = vld [vmem:[%s9944_s11 + $0x18] sm:$0xff] }
 0xf41   :  { %2316 = vrot.lane.b32.xlu1 %v2305_v33, %s8364_s6  ;;  %2310 = vrot.lane.b32.xlu0 %v2302_v36, %s8364_s6 }
 0xf45   :  { %2399 = vrot.lane.b32.xlu1 %v8590_v45, %s8367_s4  ;;  %2536 = vrot.lane.b32.xlu0 %v6901_v57, %s8360_s26 }
 0xf49   :  { %2397 = vrot.lane.b32.xlu1 %v8592_v47, %s8367_s4  ;;  %2488 = vrot.lane.b32.xlu0 %v1653_v53, %s8352_s19 }
 0xf4d   :  { %2486 = vrot.lane.b32.xlu1 %v1648_v54, %s8352_s19  ;;  %2496 = vrot.lane.b32.xlu0 %v2067_v55, %s8358_s30 }
 0xf51   :  { %2494 = vrot.lane.b32.xlu1 %v2062_v51, %s8358_s30 }
 0xfad   :  { %v2315_v27 = vpop.permute.xlu0 %2314 }
 0xfaf   :  { %v2313_v52 = vpop.permute.xlu1 %2312 }
 0xfb3   :  { %v2317_v4 = vpop.permute.xlu1 %2316  ;;  %v2311_v15 = vpop.permute.xlu0 %2310 }
 0xfb4   :  { %7591 = vmatprep.subr.mxu1 %v2317_v4 }
 0xfb5   :  { %7592 = vmatpush3.msra.mxu1 %v2317_v4 }
 0xfb6   :  { %7593 = vmatprep.subr.mxu1 %v2315_v27 }
 0xfb7   :  { %7594 = vmatpush3.msra.mxu1 %v2315_v27  ;;  %v2400_v56 = vpop.permute.xlu1 %2399  ;;  %v2537_v0 = vpop.permute.xlu0 %2536 }
 0xfb8   :  { %7595 = vmatprep.subr.mxu1 %v2313_v52  ;;  %7602 = vmatprep.subr.mxu0 %v2400_v56  ;;  %v2540_v7 = vmul.f32 %v2537_v0, %v8590_v45  ;;  %v2539_v18 = vmul.f32 %v2537_v0, %v8592_v47 }
 0xfb9   :  { %7596 = vmatpush3.msra.mxu1 %v2313_v52  ;;  %7603 = vmatpush3.msra.mxu0 %v2400_v56 }
 0xfba   :  { %7597 = vmatprep.subr.mxu1 %v2311_v15 }
 0xfbb   :  { %7598 = vmatpush3.msra.mxu1 %v2311_v15  ;;  %v2398_v28 = vpop.permute.xlu1 %2397  ;;  %v2489_v3 = vpop.permute.xlu0 %2488 }
 0xfbc   :  { %7600 = vmatmul.mubr.msk.f32.vlgmr.msra.gmra.mxu1 %vm149_vm1, %v8880_v48  ;;  %7604 = vmatprep.subr.mxu0 %v2398_v28  ;;  %v2509_v22 = vsel %vm851_vm2, %v1235_v9, %v2489_v3  ;;  %v6905_v3 = vld [vmem:[%s9942_s9 + $0x38] sm:$0xff] }
 0xfbd   :  { %7620 = vmatprep.subr.mxu1 %v6910_v49  ;;  %7605 = vmatpush3.msra.mxu0 %v2398_v28 }
 0xfbe   :  { %7621 = vmatpush3.msra.mxu1 %v6910_v49  ;;  %7624 = vmatprep.mubr.msk.f32.mxu1 %vm235_vm0, %v8563_v34 }
 0xfbf   :  { %7607 = vmatmul.mubr.msk.f32.vlgmr.msra.gmra.mxu0 %vm235_vm0, %v8936_v2  ;;  %7622 = vmatprep.subr.mxu1 %v6909_v16  ;;  %v2487_v6 = vpop.permute.xlu1 %2486  ;;  %v2497_v19 = vpop.permute.xlu0 %2496 }
 0xfc0   :  { %7623 = vmatpush3.msra.mxu1 %v6909_v16  ;;  %v2508_v1 = vsel %vm851_vm2, %v8780_v44, %v2487_v6  ;;  %v2511_v14 = vsel %vm235_vm0, %v2509_v22, %v2497_v19  ;;  %7609 = vmatprep.subr.mxu0 %v6905_v3  ;;  %v6904_v6 = vld [vmem:[%s9942_s9 + $0x30] sm:$0xff]  ;;  %v6903_v19 = vld [vmem:[%s9942_s9 + $0x28] sm:$0xff] }
 0xfc1   :  { %7625 = vmatmul.mubr.msk.f32.vlgmr.msra.gmra.mxu1 %vm235_vm0, %v8561_v32  ;;  %7610 = vmatpush3.msra.mxu0 %v6905_v3 }
 0xfc2   :  { %7627 = vmatprep.mubr.msk.f32.mxu1 %vm235_vm0, %v8571_v39  ;;  %7611 = vmatprep.subr.mxu0 %v6904_v6 }
 0xfc3   :  { %v2495_v20 = vpop.permute.xlu1 %2494  ;;  %7612 = vmatpush3.msra.mxu0 %v6904_v6 }
 0xfc4   :  { %v2510_v26 = vsel %vm235_vm0, %v2508_v1, %v2495_v20  ;;  %7613 = vmatprep.subr.mxu0 %v6903_v19  ;;  %v6902_v20 = vld [vmem:[%s9942_s9 + $0x20] sm:$0xff] }
 0xfc5   :  { %7628 = vmatmul.mubr.msk.f32.gmra.mxu1 %vm235_vm0, %v8567_v38  ;;  %7614 = vmatpush3.msra.mxu0 %v6903_v19 }
 0xfc6   :  { %7644 = vmatprep.mubr.msk.f32.mxu1 %vm235_vm0, %v8909_v40  ;;  %7615 = vmatprep.subr.mxu0 %v6902_v20 }
 0xfc7   :  { %7616 = vmatpush3.msra.mxu0 %v6902_v20 }
0x107c   :  { %v7601_v60 = vpop.f32.mrf.mxu1 }
0x107e   :  { %v2388_v13 = vpop.f32.mrf.mxu1 }
0x107f   :  { %v7608_v63 = vpop.f32.mrf.mxu0 }
0x1080   :  { %v2481_v12 = vadd.f32 %v7608_v63, %v7601_v60 }
0x1081   :  { %v2475_v2 = vpop.f32.mrf.mxu0 }
0x1082   :  { %v2476_v17 = vadd.f32 %v2475_v2, %v2388_v13  ;;  %2504 = vrot.lane.b32.xlu0 %v2481_v12, %s8368_s27 }
0x1084   :  { %2502 = vrot.lane.b32.xlu1 %v2476_v17, %s8368_s27 }
0x1086   :  { %2545 = vrot.lane.b32.xlu0 %v2540_v7, %s8369_s28 }
0x1088   :  { %2543 = vrot.lane.b32.xlu1 %v2539_v18, %s8369_s28 }
0x10f4   :  { %v2505_v21 = vpop.permute.xlu0 %2504 }
0x10f5   :  { %v2514_v59 = vsel %vm2512_vm3, %v2511_v14, %v2505_v21 }
0x10f6   :  { %v2503_v8 = vpop.permute.xlu1 %2502  ;;  %v2523_v36 = vmul.f32 %v6900_v50, %v2514_v59 }
0x10f7   :  { %v2513_v30 = vsel %vm2512_vm3, %v2510_v26, %v2503_v8 }
0x10f8   :  { %v2522_v35 = vmul.f32 %v6900_v50, %v2513_v30  ;;  %v2546_v62 = vpop.permute.xlu0 %2545  ;;  %v2527_v53 = vsel %vm149_vm1, %v2523_v36, 0.0  ;;  %v9101_v36 = vpop.f32.mrf.mxu1 }
0x10f9   :  { %v2552_v57 = vsel %vm149_vm1, %v2546_v62, 0.0 }
0x10fa   :  { %v2544_v10 = vpop.permute.xlu1 %2543  ;;  %v2524_v44 = vsel %vm149_vm1, %v2522_v35, 0.0 }
0x10fb   :  { %2525 = vadd.xlane.f32.xlu1 %v2524_v44  ;;  %v2549_v33 = vsel %vm149_vm1, %v2544_v10, 0.0 }
0x10fc   :  { %2550 = vadd.xlane.f32.xlu0 %v2549_v33 }
0x10ff   :  { %2553 = vadd.xlane.f32.xlu1 %v2552_v57  ;;  %v9103_v57 = vpop.f32.mrf.mxu1 }
0x1100   :  { %2528 = vadd.xlane.f32.xlu0 %v2527_v53 }
0x1101   :  { %v9105_v53 = vpop.f32.mrf.mxu1 }
0x1184   :  { %v2526_v54 = vpop.xlane.xlu1 %2525 }
0x1185   :  { %v2551_v55 = vpop.xlane.xlu0 %2550 }
0x1186   :  { %v2555_v51 = vadd.f32 %v2551_v55, %v2526_v54  ;;  %v9107_v55 = vpop.f32.mrf.mxu1 }
0x1188   :  { %v2557_v52 = vsub.f32 0.0, %v2555_v51  ;;  %v2554_v4 = vpop.xlane.xlu1 %2553 }
0x1189   :  { %v2529_v27 = vpop.xlane.xlu0 %2528 }
0x118a   :  { %v2559_v56 = vmul.f32 1.442695, %v2557_v52  ;;  %v2556_v15 = vadd.f32 %v2554_v4, %v2529_v27 }
0x118c   :  { %8061 = vpow2.f32 %v2559_v56  ;;  %v2558_v49 = vsub.f32 0.0, %v2556_v15 }
0x118e   :  { %v2561_v28 = vmul.f32 1.442695, %v2558_v49 }
0x1190   :  { %8063 = vpow2.f32 %v2561_v28 }
0x1199   :  { %v8062_v16 = vpop.eup %8061 }
0x119a   :  { %v2563_v60 = vadd.f32 1.0, %v8062_v16 }
0x119c   :  { %8065 = vrcp.f32 %v2563_v60 }
0x119d   :  { %v8064_v63 = vpop.eup %8063 }
0x119e   :  { %v2564_v0 = vadd.f32 1.0, %v8064_v63 }
0x11a0   :  { %8067 = vrcp.f32 %v2564_v0 }
0x11a9   :  { %v8066_v12 = vpop.eup %8065 }
0x11aa   :  { %v2569_v13 = vsub.f32 1.0, %v8066_v12  ;;  %v2567_v9 = vmul.f32 %v8066_v12, %v8592_v47 }
0x11ac   :  { %v2571_v2 = vmul.f32 %v2569_v13, %v2513_v30 }
0x11ad   :  { %v8068_v17 = vpop.eup %8067 }
0x11ae   :  { %2575 = vrot.lane.b32.xlu0 %v2571_v2, %s8360_s26  ;;  %v2570_v7 = vsub.f32 1.0, %v8068_v17  ;;  %v2568_v22 = vmul.f32 %v8068_v17, %v8590_v45 }
0x11b0   :  { %v2572_v18 = vmul.f32 %v2570_v7, %v2514_v59 }
0x11b2   :  { %2577 = vrot.lane.b32.xlu1 %v2572_v18, %s8360_s26 }
0x1220   :  { %v2576_v1 = vpop.permute.xlu0 %2575 }
0x1221   :  { %v2581_v21 = vadd.f32 %v2576_v1, %v2567_v9 }
0x1223   :  { %2585 = vrot.lane.b32.xlu1 %v2581_v21, %s8369_s28 }
0x1224   :  { %v2578_v26 = vpop.permute.xlu1 %2577 }
0x1225   :  { %v2582_v8 = vadd.f32 %v2578_v26, %v2568_v22 }
0x1227   :  { %2587 = vrot.lane.b32.xlu0 %v2582_v8, %s8369_s28 }
0x1295   :  { %v2586_v14 = vpop.permute.xlu1 %2585 }
0x1296   :  { %v9058_v50 = vadd.f32 %v2586_v14, %v8547_v23  ;;  %v6906_v23 = vld [vmem:[#allocation13 + $0x1] ss:$0 sm:$0xff] }
0x1298   :  { %v2593_v30 = vmax.f32 %v9058_v50, 0.0  ;;  %v6971_v50 = vld [vmem:[#allocation13 + $0x2] ss:$0 sm:$0xff] }
0x1299   :  { %v2588_v59 = vpop.permute.xlu0 %2587 }
0x129a   :  { %v9062_v35 = vadd.f32 %v2588_v59, %v8549_v24  ;;  %7617 = vmatprep.mubr.msk.f32.mxu0 %vm149_vm1, %v2593_v30 }
0x129c   :  { %v2594_v45 = vmax.f32 %v9062_v35, 0.0 }
0x129e   :  { %7618 = vmatmul.mubr.msk.f32.vlgmr.msra.gmra.mxu0 %vm149_vm1, %v2594_v45 }
0x129f   :  { %7634 = vmatprep.mubr.msk.f32.mxu0 %vm235_vm0, %v8931_v61 }
0x135e   :  { %v7619_v47 = vpop.f32.mrf.mxu0 }
0x135f   :  { %v9073_v10 = vadd.f32 %v7619_v47, %v6906_v23 }
0x1360   :  { %v2680_v44 = vpop.f32.mrf.mxu0 }
0x1361   :  { %v9075_v24 = vadd.f32 %v6906_v23, %v2680_v44  ;;  %2866 = vrot.lane.b32.xlu1 %v9073_v10, %s8360_s26  ;;  %7630 = vmatprep.subr.mxu0 %v9073_v10 }
0x1362   :  { %7631 = vmatpush3.msra.mxu0 %v9073_v10 }
0x1363   :  { %2864 = vrot.lane.b32.xlu0 %v9075_v24, %s8360_s26  ;;  %7632 = vmatprep.subr.mxu0 %v9075_v24 }
0x1364   :  { %7633 = vmatpush3.msra.mxu0 %v9075_v24 }
0x1365   :  { %7635 = vmatmul.mubr.msk.f32.vlgmr.msra.gmra.mxu0 %vm235_vm0, %v8943_v5 }
0x1366   :  { %7637 = vmatprep.mubr.msk.f32.mxu0 %vm235_vm0, %v8950_v11 }
0x1369   :  { %7638 = vmatmul.mubr.msk.f32.gmra.mxu0 %vm235_vm0, %v8957_v42 }
0x136a   :  { %7658 = vmatprep.mubr.msk.f32.mxu0 %vm149_vm1, %v8869_v25 }
0x13d3   :  { %v2867_v62 = vpop.permute.xlu1 %2866 }
0x13d4   :  { %7640 = vmatprep.subr.mxu1 %v2867_v62 }
0x13d5   :  { %7641 = vmatpush3.msra.mxu1 %v2867_v62  ;;  %v2865_v33 = vpop.permute.xlu0 %2864 }
0x13d6   :  { %7642 = vmatprep.subr.mxu1 %v2865_v33 }
0x13d7   :  { %7643 = vmatpush3.msra.mxu1 %v2865_v33 }
0x13d8   :  { %7645 = vmatmul.mubr.msk.f32.vlgmr.msra.gmra.mxu1 %vm235_vm0, %v8866_v41 }
0x13d9   :  { %7647 = vmatprep.mubr.msk.f32.mxu1 %vm235_vm0, %v8857_v29 }
0x13dc   :  { %7648 = vmatmul.mubr.msk.f32.gmra.mxu1 %vm235_vm0, %v8896_v31 }
0x13dd   :  { %7665 = vmatprep.mubr.msk.f32.mxu1 %vm235_vm0, %v8931_v61 }
0x1425   :  { %v7636_v54 = vpop.f32.mrf.mxu0 }
0x1427   :  { %v2843_v52 = vpop.f32.mrf.mxu0 }
0x1429   :  { %v7639_v27 = vpop.f32.mrf.mxu0 }
0x142b   :  { %v2853_v0 = vpop.f32.mrf.mxu0 }
0x1498   :  { %v7646_v51 = vpop.f32.mrf.mxu1 }
0x1499   :  { %v2942_v16 = vadd.f32 %v7646_v51, %v9101_v36 }
0x149a   :  { %v2936_v4 = vpop.f32.mrf.mxu1 }
0x149b   :  { %v2937_v15 = vadd.f32 %v2936_v4, %v9103_v57  ;;  %v9121_v17 = vmul.f32 %v7636_v54, %v2942_v16 }
0x149c   :  { %v7649_v56 = vpop.f32.mrf.mxu1 }
0x149d   :  { %v2952_v49 = vadd.f32 %v7649_v56, %v9105_v53  ;;  %v9115_v12 = vmul.f32 %v2937_v15, %v2843_v52  ;;  %v2962_v3 = vsel %vm851_vm2, %v9121_v17, 0.0 }
0x149e   :  { %v2946_v28 = vpop.f32.mrf.mxu1 }
0x149f   :  { %v9112_v60 = vmul.f32 %v7639_v27, %v2952_v49  ;;  %v2947_v63 = vadd.f32 %v2946_v28, %v9107_v55  ;;  %v2959_v18 = vsel %vm851_vm2, %v9115_v12, 0.0 }
0x14a1   :  { %v9117_v13 = vmul.f32 %v2947_v63, %v2853_v0  ;;  %v2968_v2 = vsel %vm851_vm2, %v9112_v60, 0.0 }
0x14a2   :  { %2969 = vadd.xlane.f32.xlu1 %v2968_v2 }
0x14a3   :  { %v2965_v7 = vsel %vm851_vm2, %v9117_v13, 0.0 }
0x14a4   :  { %2966 = vadd.xlane.f32.xlu0 %v2965_v7 }
0x14a6   :  { %2960 = vadd.xlane.f32.xlu1 %v2959_v18 }
0x14a8   :  { %2963 = vadd.xlane.f32.xlu0 %v2962_v3 }
0x152b   :  { %v2970_v6 = vpop.xlane.xlu1 %2969 }
0x152c   :  { %v2974_v19 = vmul.f32 0.35355338, %v2970_v6 }
0x152d   :  { %v2967_v20 = vpop.xlane.xlu0 %2966 }
0x152e   :  { %v2978_v9 = vmul.f32 %v8896_v31, %v2974_v19  ;;  %v2973_v1 = vmul.f32 0.35355338, %v2967_v20 }
0x152f   :  { %v2961_v21 = vpop.xlane.xlu1 %2960 }
0x1530   :  { %v2977_v22 = vmul.f32 %v8857_v29, %v2973_v1  ;;  %7650 = vmatprep.subr.mxu0 %v2978_v9  ;;  %v2971_v8 = vmul.f32 0.35355338, %v2961_v21 }
0x1531   :  { %7651 = vmatpush3.msra.mxu0 %v2978_v9  ;;  %v2964_v26 = vpop.xlane.xlu0 %2963 }
0x1532   :  { %v2972_v14 = vmul.f32 0.35355338, %v2964_v26  ;;  %7652 = vmatprep.subr.mxu0 %v2977_v22  ;;  %v2975_v23 = vmul.f32 %v8909_v40, %v2971_v8 }
0x1533   :  { %7653 = vmatpush3.msra.mxu0 %v2977_v22 }
0x1534   :  { %v2976_v59 = vmul.f32 %v8866_v41, %v2972_v14 }
0x1536   :  { %7654 = vmatprep.subr.mxu0 %v2976_v59 }
0x1537   :  { %7655 = vmatpush3.msra.mxu0 %v2976_v59 }
0x1538   :  { %7656 = vmatprep.subr.mxu0 %v2975_v23 }
0x1539   :  { %7657 = vmatpush3.msra.mxu0 %v2975_v23 }
0x153a   :  { %7659 = vmatmul.mubr.msk.f32.vlgmr.msra.gmra.mxu0 %vm149_vm1, %v8880_v48 }
0x153b   :  { %7679 = vmatprep.mubr.msk.f32.mxu0 %vm149_vm1, %v8869_v25 }
0x15fa   :  { %v7660_v47 = vpop.f32.mrf.mxu0 }
0x15fb   :  { %v3051_v44 = vadd.f32 %v7660_v47, %v8675_v43 }
0x15fc   :  { %v3045_v62 = vpop.f32.mrf.mxu0 }
0x15fd   :  { %v3046_v33 = vadd.f32 %v3045_v62, %v8677_v46  ;;  %v3057_v54 = vsel %vm235_vm0, %v3051_v44, -inf }
0x15fe   :  { %3058 = vmax.xlane.f32.xlu0 %v3057_v54 }
0x15ff   :  { %v3054_v51 = vsel %vm235_vm0, %v3046_v33, -inf }
0x1600   :  { %3055 = vmax.xlane.f32.xlu1 %v3054_v51 }
0x1687   :  { %v3059_v52 = vpop.xlane.xlu0 %3058 }
0x1688   :  { %v3061_v4 = vsub.f32 %v3051_v44, %v3059_v52 }
0x1689   :  { %v3056_v27 = vpop.xlane.xlu1 %3055 }
0x168a   :  { %v3064_v56 = vmul.f32 1.442695, %v3061_v4  ;;  %v3060_v15 = vsub.f32 %v3046_v33, %v3056_v27 }
0x168c   :  { %8069 = vpow2.f32 %v3064_v56  ;;  %v3062_v49 = vmul.f32 1.442695, %v3060_v15 }
0x168e   :  { %8071 = vpow2.f32 %v3062_v49 }
0x1699   :  { %v8070_v28 = vpop.eup %8069 }
0x169a   :  { %v3069_v16 = vsel %vm235_vm0, %v8070_v28, 0.0 }
0x169b   :  { %v8072_v63 = vpop.eup %8071  ;;  %3070 = vadd.xlane.f32.xlu0 %v3069_v16 }
0x169c   :  { %v3066_v0 = vsel %vm235_vm0, %v8072_v63, 0.0 }
0x169d   :  { %3067 = vadd.xlane.f32.xlu1 %v3066_v0 }
0x16ae   :  { %3353 = vrot.lane.b32.xlu1 %v9117_v13, %s8361_s5 }
0x16b1   :  { %3355 = vrot.lane.b32.xlu0 %v9112_v60, %s8361_s5 }
0x16b2   :  { %3351 = vrot.lane.b32.xlu1 %v9121_v17, %s8361_s5 }
0x16b5   :  { %3349 = vrot.lane.b32.xlu0 %v9115_v12, %s8361_s5 }
0x1724   :  { %v3071_v2 = vpop.xlane.xlu0 %3070 }
0x1725   :  { %8073 = vrcp.f32 %v3071_v2 }
0x1726   :  { %v3068_v7 = vpop.xlane.xlu1 %3067 }
0x1727   :  { %8075 = vrcp.f32 %v3068_v7 }
0x1728   :  { %v3356_v54 = vpop.permute.xlu0 %3355 }
0x1729   :  { %v3370_v52 = vsel %vm851_vm2, %v3356_v54, 0.0 }
0x172a   :  { %v3354_v62 = vpop.permute.xlu1 %3353 }
0x172b   :  { %v3367_v27 = vsel %vm851_vm2, %v3354_v62, 0.0 }
0x172c   :  { %v3350_v56 = vpop.permute.xlu0 %3349 }
0x172d   :  { %v3361_v49 = vsel %vm851_vm2, %v3350_v56, 0.0 }
0x172e   :  { %v3352_v4 = vpop.permute.xlu1 %3351 }
0x172f   :  { %v3364_v15 = vsel %vm851_vm2, %v3352_v4, 0.0 }
0x1732   :  { %v8074_v18 = vpop.eup %8073 }
0x1733   :  { %v3075_v3 = vmul.f32 %v8074_v18, %v8698_v37 }
0x1734   :  { %v8076_v6 = vpop.eup %8075 }
0x1735   :  { %v9152_v19 = vmul.f32 %v8070_v28, %v3075_v3  ;;  %v3074_v20 = vmul.f32 %v8076_v6, %v8702_v58 }
0x1737   :  { %7661 = vmatprep.subr.mxu1 %v9152_v19  ;;  %v3076_v9 = vmul.f32 %v8072_v63, %v3074_v20 }
0x1738   :  { %7662 = vmatpush3.msra.mxu1 %v9152_v19 }
0x1739   :  { %7663 = vmatprep.subr.mxu1 %v3076_v9 }
0x173a   :  { %7664 = vmatpush3.msra.mxu1 %v3076_v9 }
0x173b   :  { %7666 = vmatmul.mubr.msk.f32.vlgmr.msra.gmra.mxu1 %vm235_vm0, %v8943_v5 }
0x173c   :  { %7668 = vmatprep.mubr.msk.f32.mxu1 %vm235_vm0, %v8950_v11 }
0x173f   :  { %7669 = vmatmul.mubr.msk.f32.gmra.mxu1 %vm235_vm0, %v8957_v42 }
0x1740   :  { %7686 = vmatprep.mubr.msk.f32.mxu1 %vm235_vm0, %v3076_v9 }
0x17fb   :  { %v7667_v1 = vpop.f32.mrf.mxu1 }
0x17fc   :  { %v3164_v21 = vmul.f32 %v8866_v41, %v7667_v1 }
0x17fd   :  { %v3144_v22 = vpop.f32.mrf.mxu1 }
0x17fe   :  { %v3170_v26 = vsel %vm235_vm0, %v3164_v21, 0.0  ;;  %v3163_v23 = vmul.f32 %v8909_v40, %v3144_v22 }
0x17ff   :  { %3171 = vadd.xlane.f32.xlu0 %v3170_v26  ;;  %v7670_v8 = vpop.f32.mrf.mxu1 }
0x1800   :  { %v3166_v14 = vmul.f32 %v8896_v31, %v7670_v8  ;;  %v3167_v51 = vsel %vm235_vm0, %v3163_v23, 0.0 }
0x1801   :  { %v3154_v59 = vpop.f32.mrf.mxu1 }
0x1802   :  { %v3165_v47 = vmul.f32 %v8857_v29, %v3154_v59  ;;  %v3176_v44 = vsel %vm235_vm0, %v3166_v14, 0.0 }
0x1803   :  { %3177 = vadd.xlane.f32.xlu1 %v3176_v44 }
0x1804   :  { %v3173_v33 = vsel %vm235_vm0, %v3165_v47, 0.0 }
0x1805   :  { %3174 = vadd.xlane.f32.xlu0 %v3173_v33 }
0x1807   :  { %3168 = vadd.xlane.f32.xlu1 %v3167_v51 }
0x1809   :  { %3371 = vadd.xlane.f32.xlu0 %v3370_v52 }
0x180b   :  { %3368 = vadd.xlane.f32.xlu1 %v3367_v27 }
0x180d   :  { %3365 = vadd.xlane.f32.xlu0 %v3364_v15 }
0x180f   :  { %3362 = vadd.xlane.f32.xlu1 %v3361_v49 }
0x1888   :  { %v3172_v28 = vpop.xlane.xlu0 %3171 }
0x1889   :  { %v3180_v18 = vmul.f32 %v9101_v36, %v3172_v28 }
0x188c   :  { %v3178_v16 = vpop.xlane.xlu1 %3177 }
0x188d   :  { %v3182_v63 = vmul.f32 %v9105_v53, %v3178_v16 }
0x188e   :  { %v3175_v0 = vpop.xlane.xlu0 %3174 }
0x188f   :  { %v3181_v2 = vmul.f32 %v3175_v0, %v9107_v55  ;;  %7671 = vmatprep.subr.mxu0 %v3182_v63 }
0x1890   :  { %7672 = vmatpush3.msra.mxu0 %v3182_v63  ;;  %v3169_v7 = vpop.xlane.xlu1 %3168 }
0x1891   :  { %7673 = vmatprep.subr.mxu0 %v3181_v2  ;;  %v3179_v6 = vmul.f32 %v3169_v7, %v9103_v57 }
0x1892   :  { %v3372_v3 = vpop.xlane.xlu0 %3371  ;;  %7674 = vmatpush3.msra.mxu0 %v3181_v2 }
0x1893   :  { %v3376_v20 = vmul.f32 0.35355338, %v3372_v3  ;;  %7675 = vmatprep.subr.mxu0 %v3180_v18 }
0x1894   :  { %7676 = vmatpush3.msra.mxu0 %v3180_v18  ;;  %v3369_v9 = vpop.xlane.xlu1 %3368 }
0x1895   :  { %v3380_v1 = vmul.f32 %v8896_v31, %v3376_v20  ;;  %v3375_v21 = vmul.f32 0.35355338, %v3369_v9  ;;  %7677 = vmatprep.subr.mxu0 %v3179_v6 }
0x1896   :  { %v3366_v22 = vpop.xlane.xlu0 %3365  ;;  %7678 = vmatpush3.msra.mxu0 %v3179_v6 }
0x1897   :  { %v3379_v26 = vmul.f32 %v8857_v29, %v3375_v21  ;;  %v3374_v8 = vmul.f32 0.35355338, %v3366_v22  ;;  %7680 = vmatmul.mubr.msk.f32.vlgmr.msra.gmra.mxu0 %vm149_vm1, %v8880_v48  ;;  %7689 = vmatprep.subr.mxu0 %v3380_v1 }
0x1898   :  { %7690 = vmatpush3.msra.mxu0 %v3380_v1  ;;  %v3363_v14 = vpop.xlane.xlu1 %3362  ;;  %7697 = vmatprep.mubr.msk.f32.mxu0 %vm149_vm1, %v8869_v25 }
0x1899   :  { %v3378_v59 = vmul.f32 %v8866_v41, %v3374_v8  ;;  %v3373_v23 = vmul.f32 0.35355338, %v3363_v14  ;;  %7691 = vmatprep.subr.mxu0 %v3379_v26 }
0x189a   :  { %7692 = vmatpush3.msra.mxu0 %v3379_v26 }
0x189b   :  { %v3377_v47 = vmul.f32 %v8909_v40, %v3373_v23  ;;  %7693 = vmatprep.subr.mxu0 %v3378_v59 }
0x189c   :  { %7694 = vmatpush3.msra.mxu0 %v3378_v59 }
0x189d   :  { %7695 = vmatprep.subr.mxu0 %v3377_v47 }
0x189e   :  { %7696 = vmatpush3.msra.mxu0 %v3377_v47 }
0x189f   :  { %7698 = vmatmul.mubr.msk.f32.vlgmr.msra.gmra.mxu0 %vm149_vm1, %v8880_v48 }
0x1957   :  { %v9190_v29 = vpop.f32.mrf.mxu0 }
0x1959   :  { %v9192_v44 = vpop.f32.mrf.mxu0 }
0x195f   :  { %v7699_v62 = vpop.f32.mrf.mxu0 }
0x1960   :  { %v3453_v25 = vadd.f32 %v7699_v62, %v8675_v43 }
0x1961   :  { %v3447_v41 = vpop.f32.mrf.mxu0 }
0x1962   :  { %v3448_v33 = vadd.f32 %v3447_v41, %v8677_v46  ;;  %v3459_v54 = vsel %vm235_vm0, %v3453_v25, -inf }
0x1963   :  { %3460 = vmax.xlane.f32.xlu1 %v3459_v54 }
0x1964   :  { %v3456_v40 = vsel %vm235_vm0, %v3448_v33, -inf }
0x1965   :  { %3457 = vmax.xlane.f32.xlu0 %v3456_v40 }
0x1974   :  { %3767 = vrot.lane.b32.xlu1 %v9117_v13, %s8363_s20 }
0x1978   :  { %3765 = vrot.lane.b32.xlu1 %v9121_v17, %s8363_s20 }
0x197b   :  { %3769 = vrot.lane.b32.xlu0 %v9112_v60, %s8363_s20 }
0x197f   :  { %3763 = vrot.lane.b32.xlu0 %v9115_v12, %s8363_s20 }
0x19ec   :  { %v3461_v48 = vpop.xlane.xlu1 %3460 }
0x19ed   :  { %v3463_v51 = vsub.f32 %v3453_v25, %v3461_v48 }
0x19ee   :  { %v3458_v52 = vpop.xlane.xlu0 %3457 }
0x19ef   :  { %v3466_v4 = vmul.f32 1.442695, %v3463_v51  ;;  %v3462_v27 = vsub.f32 %v3448_v33, %v3458_v52 }
0x19f0   :  { %v3768_v56 = vpop.permute.xlu1 %3767 }
0x19f1   :  { %8077 = vpow2.f32 %v3466_v4  ;;  %v3464_v15 = vmul.f32 1.442695, %v3462_v27  ;;  %v3781_v49 = vsel %vm851_vm2, %v3768_v56, 0.0  ;;  %v9242_v56 = vld [vmem:[%s9934_s1 + $0x8] sm:$0xff] }
0x19f2   :  { %3782 = vadd.xlane.f32.xlu1 %v3781_v49  ;;  %v3770_v28 = vpop.permute.xlu0 %3769  ;;  %v9252_v49 = vld [vmem:[%s9934_s1] sm:$0xff] }
0x19f3   :  { %8079 = vpow2.f32 %v3464_v15  ;;  %v3784_v16 = vsel %vm851_vm2, %v3770_v28, 0.0 }
0x19f4   :  { %v3766_v63 = vpop.permute.xlu1 %3765  ;;  %3785 = vadd.xlane.f32.xlu0 %v3784_v16 }
0x19f5   :  { %v3778_v2 = vsel %vm851_vm2, %v3766_v63, 0.0 }
0x19f6   :  { %v3764_v0 = vpop.permute.xlu0 %3763 }
0x19f7   :  { %v3775_v7 = vsel %vm851_vm2, %v3764_v0, 0.0 }
0x19f8   :  { %3779 = vadd.xlane.f32.xlu0 %v3778_v2  ;;  %3776 = vadd.xlane.f32.xlu1 %v3775_v7 }
0x19fe   :  { %v8078_v18 = vpop.eup %8077 }
0x19ff   :  { %v3471_v3 = vsel %vm235_vm0, %v8078_v18, 0.0 }
0x1a00   :  { %v8080_v6 = vpop.eup %8079  ;;  %3472 = vadd.xlane.f32.xlu0 %v3471_v3 }
0x1a01   :  { %v3468_v20 = vsel %vm235_vm0, %v8080_v6, 0.0 }
0x1a02   :  { %3469 = vadd.xlane.f32.xlu1 %v3468_v20 }
0x1a13   :  { %3676 = vrot.lane.b32.xlu1 %v9075_v24, %s8366_s16 }
0x1a16   :  { %3678 = vrot.lane.b32.xlu0 %v9073_v10, %s8366_s16 }
0x1a17   :  { %3260 = vrot.lane.b32.xlu1 %v9073_v10, %s8362_s17 }
0x1a1a   :  { %3258 = vrot.lane.b32.xlu0 %v9075_v24, %s8362_s17 }
0x1a7b   :  { %v3783_v1 = vpop.xlane.xlu1 %3782 }
0x1a7c   :  { %v3789_v48 = vmul.f32 0.35355338, %v3783_v1 }
0x1a7d   :  { %v3786_v9 = vpop.xlane.xlu0 %3785 }
0x1a7e   :  { %v3790_v14 = vmul.f32 0.35355338, %v3786_v9 }
0x1a80   :  { %v3794_v47 = vmul.f32 %v8896_v31, %v3790_v14 }
0x1a81   :  { %v3780_v21 = vpop.xlane.xlu0 %3779  ;;  %v3777_v22 = vpop.xlane.xlu1 %3776 }
0x1a82   :  { %v3788_v52 = vmul.f32 0.35355338, %v3780_v21  ;;  %v3787_v27 = vmul.f32 0.35355338, %v3777_v22 }
0x1a84   :  { %v3792_v15 = vmul.f32 %v9242_v56, %v3788_v52  ;;  %v3791_v28 = vmul.f32 %v9252_v49, %v3787_v27 }
0x1a89   :  { %v3473_v26 = vpop.xlane.xlu0 %3472 }
0x1a8a   :  { %8081 = vrcp.f32 %v3473_v26 }
0x1a8b   :  { %v3470_v8 = vpop.xlane.xlu1 %3469 }
0x1a8c   :  { %8083 = vrcp.f32 %v3470_v8 }
0x1a8d   :  { %v3679_v59 = vpop.permute.xlu0 %3678 }
0x1a8e   :  { %7721 = vmatprep.subr.mxu0 %v3679_v59 }
0x1a8f   :  { %v3677_v23 = vpop.permute.xlu1 %3676  ;;  %7722 = vmatpush3.msra.mxu0 %v3679_v59 }
0x1a90   :  { %7723 = vmatprep.subr.mxu0 %v3677_v23 }
0x1a91   :  { %7724 = vmatpush3.msra.mxu0 %v3677_v23  ;;  %v3259_v25 = vpop.permute.xlu0 %3258 }
0x1a92   :  { %7728 = vmatprep.subr.mxu0 %v3794_v47 }
0x1a93   :  { %v3261_v62 = vpop.permute.xlu1 %3260 }
0x1a94   :  { %7682 = vmatprep.subr.mxu1 %v3261_v62 }
0x1a95   :  { %7683 = vmatpush3.msra.mxu1 %v3261_v62 }
0x1a96   :  { %7684 = vmatprep.subr.mxu1 %v3259_v25 }
0x1a97   :  { %v8082_v41 = vpop.eup %8081  ;;  %7685 = vmatpush3.msra.mxu1 %v3259_v25 }
0x1a98   :  { %7687 = vmatmul.mubr.msk.f32.vlgmr.msra.gmra.mxu1 %vm235_vm0, %v9152_v19  ;;  %v3477_v33 = vmul.f32 %v8082_v41, %v8698_v37  ;;  %v9231_v19 = vld [vmem:[%s9934_s1 + $0x10] sm:$0xff] }
0x1a99   :  { %v8084_v54 = vpop.eup %8083  ;;  %7704 = vmatprep.mubr.msk.f32.mxu1 %vm235_vm0, %v8931_v61  ;;  %v3793_v4 = vmul.f32 %v9231_v19, %v3789_v48  ;;  %v9235_v61 = vld [vmem:[#allocation5] sm:$0xff] }
0x1a9a   :  { %v3479_v31 = vmul.f32 %v8078_v18, %v3477_v33  ;;  %v3476_v40 = vmul.f32 %v8084_v54, %v8702_v58 }
0x1a9c   :  { %7700 = vmatprep.subr.mxu1 %v3479_v31  ;;  %v3478_v51 = vmul.f32 %v8080_v6, %v3476_v40 }
0x1a9d   :  { %7701 = vmatpush3.msra.mxu1 %v3479_v31 }
0x1a9e   :  { %7702 = vmatprep.subr.mxu1 %v3478_v51  ;;  %7725 = vmatprep.mubr.msk.f32.mxu0 %vm235_vm0, %v3478_v51 }
0x1a9f   :  { %7703 = vmatpush3.msra.mxu1 %v3478_v51  ;;  %7726 = vmatmul.mubr.msk.f32.vlgmr.msra.gmra.mxu0 %vm235_vm0, %v3479_v31 }
0x1aa0   :  { %7729 = vmatpush3.msra.mxu0 %v3794_v47  ;;  %7736 = vmatprep.mubr.msk.f32.mxu0 %vm149_vm1, %v9235_v61 }
0x1aa1   :  { %7730 = vmatprep.subr.mxu0 %v3793_v4  ;;  %7705 = vmatmul.mubr.msk.f32.vlgmr.msra.gmra.mxu1 %vm235_vm0, %v8943_v5  ;;  %v9259_v5 = vld [vmem:[#allocation5 + $0x8] sm:$0xff] }
0x1aa2   :  { %7731 = vmatpush3.msra.mxu0 %v3793_v4  ;;  %7707 = vmatprep.mubr.msk.f32.mxu1 %vm235_vm0, %v8950_v11 }
0x1aa3   :  { %7732 = vmatprep.subr.mxu0 %v3792_v15 }
0x1aa4   :  { %7733 = vmatpush3.msra.mxu0 %v3792_v15 }
0x1aa5   :  { %7734 = vmatprep.subr.mxu0 %v3791_v28  ;;  %7708 = vmatmul.mubr.msk.f32.gmra.mxu1 %vm235_vm0, %v8957_v42 }
0x1aa6   :  { %7735 = vmatpush3.msra.mxu0 %v3791_v28  ;;  %7718 = vmatprep.mubr.msk.f32.mxu1 %vm149_vm1, %v9235_v61 }
0x1aa7   :  { %7737 = vmatmul.mubr.msk.f32.vlgmr.msra.gmra.mxu0 %vm149_vm1, %v9259_v5 }
0x1b58   :  { %v9279_v3 = vpop.f32.mrf.mxu1 }
0x1b5a   :  { %v9281_v6 = vpop.f32.mrf.mxu1 }
0x1b5f   :  { %v9263_v11 = vpop.f32.mrf.mxu0 }
0x1b61   :  { %v9265_v16 = vpop.f32.mrf.mxu0  ;;  %v7706_v20 = vpop.f32.mrf.mxu1 }
0x1b63   :  { %v3546_v9 = vpop.f32.mrf.mxu1 }
0x1b64   :  { %v3565_v26 = vmul.f32 %v9252_v49, %v3546_v9 }
0x1b65   :  { %v7709_v1 = vpop.f32.mrf.mxu1 }
0x1b66   :  { %v3569_v59 = vsel %vm235_vm0, %v3565_v26, 0.0 }
0x1b67   :  { %v7738_v63 = vpop.f32.mrf.mxu0  ;;  %v3556_v21 = vpop.f32.mrf.mxu1 }
0x1b68   :  { %v3867_v0 = vadd.f32 %v7738_v63, %v8675_v43  ;;  %v3567_v22 = vmul.f32 %v9231_v19, %v3556_v21 }
0x1b69   :  { %v3861_v2 = vpop.f32.mrf.mxu0 }
0x1b6a   :  { %v3862_v7 = vadd.f32 %v3861_v2, %v8677_v46  ;;  %v3873_v42 = vsel %vm235_vm0, %v3867_v0, -inf }
0x1b6b   :  { %3874 = vmax.xlane.f32.xlu0 %v3873_v42 }
0x1b6c   :  { %v3870_v18 = vsel %vm235_vm0, %v3862_v7, -inf }
0x1b6d   :  { %3871 = vmax.xlane.f32.xlu1 %v3870_v18 }
0x1b7e   :  { %4181 = vrot.lane.b32.xlu1 %v9117_v13, %s8364_s6 }
0x1b81   :  { %4183 = vrot.lane.b32.xlu0 %v9112_v60, %s8364_s6  ;;  %v9287_v60 = vld [vmem:[%s9934_s1 + $0x18] sm:$0xff] }
0x1b82   :  { %4179 = vrot.lane.b32.xlu1 %v9121_v17, %s8364_s6  ;;  %v3568_v13 = vmul.f32 %v9287_v60, %v7709_v1  ;;  %v3575_v17 = vsel %vm235_vm0, %v3567_v22, 0.0 }
0x1b84   :  { %v3578_v8 = vsel %vm235_vm0, %v3568_v13, 0.0 }
0x1b85   :  { %4177 = vrot.lane.b32.xlu0 %v9115_v12, %s8364_s6  ;;  %v3566_v12 = vmul.f32 %v9242_v56, %v7706_v20 }
0x1b87   :  { %v3572_v14 = vsel %vm235_vm0, %v3566_v12, 0.0 }
0x1ba4   :  { %3576 = vadd.xlane.f32.xlu0 %v3575_v17 }
0x1ba6   :  { %3579 = vadd.xlane.f32.xlu1 %v3578_v8 }
0x1ba8   :  { %3573 = vadd.xlane.f32.xlu0 %v3572_v14 }
0x1baa   :  { %3570 = vadd.xlane.f32.xlu1 %v3569_v59 }
0x1bf4   :  { %v3875_v23 = vpop.xlane.xlu0 %3874 }
0x1bf5   :  { %v3877_v47 = vsub.f32 %v3867_v0, %v3875_v23 }
0x1bf6   :  { %v3872_v62 = vpop.xlane.xlu1 %3871 }
0x1bf7   :  { %v3880_v25 = vmul.f32 1.442695, %v3877_v47  ;;  %v3876_v41 = vsub.f32 %v3862_v7, %v3872_v62 }
0x1bf8   :  { %v4184_v33 = vpop.permute.xlu0 %4183 }
0x1bf9   :  { %8085 = vpow2.f32 %v3880_v25  ;;  %v3878_v54 = vmul.f32 1.442695, %v3876_v41  ;;  %v4198_v31 = vsel %vm851_vm2, %v4184_v33, 0.0 }
0x1bfa   :  { %v4182_v40 = vpop.permute.xlu1 %4181  ;;  %4199 = vadd.xlane.f32.xlu0 %v4198_v31 }
0x1bfb   :  { %8087 = vpow2.f32 %v3878_v54  ;;  %v4195_v48 = vsel %vm851_vm2, %v4182_v40, 0.0 }
0x1bfc   :  { %4196 = vadd.xlane.f32.xlu1 %v4195_v48  ;;  %v4178_v51 = vpop.permute.xlu0 %4177 }
0x1bfd   :  { %v4189_v27 = vsel %vm851_vm2, %v4178_v51, 0.0 }
0x1bfe   :  { %v4180_v52 = vpop.permute.xlu1 %4179 }
0x1bff   :  { %v4192_v4 = vsel %vm851_vm2, %v4180_v52, 0.0 }
0x1c00   :  { %4193 = vadd.xlane.f32.xlu0 %v4192_v4  ;;  %4190 = vadd.xlane.f32.xlu1 %v4189_v27 }
0x1c06   :  { %v8086_v15 = vpop.eup %8085 }
0x1c07   :  { %v3885_v28 = vsel %vm235_vm0, %v8086_v15, 0.0 }
0x1c08   :  { %v8088_v63 = vpop.eup %8087  ;;  %3886 = vadd.xlane.f32.xlu1 %v3885_v28 }
0x1c09   :  { %v3882_v0 = vsel %vm235_vm0, %v8088_v63, 0.0 }
0x1c0a   :  { %3883 = vadd.xlane.f32.xlu0 %v3882_v0 }
0x1c19   :  { %4090 = vrot.lane.b32.xlu1 %v9075_v24, %s8365_s7 }
0x1c20   :  { %4092 = vrot.lane.b32.xlu0 %v9073_v10, %s8365_s7 }
0x1c2d   :  { %v3577_v2 = vpop.xlane.xlu0 %3576 }
0x1c2e   :  { %v3583_v7 = vmul.f32 %v3577_v2, %v9107_v55  ;;  %v9331_v2 = vld [vmem:[%s9935_s2] sm:$0xff] }
0x1c2f   :  { %v3580_v42 = vpop.xlane.xlu1 %3579 }
0x1c30   :  { %v3584_v18 = vmul.f32 %v9105_v53, %v3580_v42  ;;  %3593 = vrot.lane.b32.xlu0 %v3583_v7, %s8361_s5  ;;  %v9338_v7 = vld [vmem:[%s9935_s2 + $0x8] sm:$0xff]  ;;  %v9345_v42 = vld [vmem:[%s9935_s2 + $0x10] sm:$0xff] }
0x1c31   :  { %v3574_v20 = vpop.xlane.xlu0 %3573 }
0x1c32   :  { %3595 = vrot.lane.b32.xlu1 %v3584_v18, %s8361_s5  ;;  %v3582_v1 = vmul.f32 %v9101_v36, %v3574_v20  ;;  %v9352_v18 = vld [vmem:[%s9935_s2 + $0x18] sm:$0xff] }
0x1c33   :  { %v3571_v9 = vpop.xlane.xlu1 %3570 }
0x1c34   :  { %v3581_v21 = vmul.f32 %v3571_v9, %v9103_v57 }
0x1c36   :  { %3589 = vrot.lane.b32.xlu0 %v3581_v21, %s8361_s5  ;;  %3591 = vrot.lane.b32.xlu1 %v3582_v1, %s8361_s5 }
0x1c83   :  { %v4200_v13 = vpop.xlane.xlu0 %4199 }
0x1c84   :  { %v4204_v14 = vmul.f32 0.35355338, %v4200_v13 }
0x1c85   :  { %v4197_v22 = vpop.xlane.xlu1 %4196 }
0x1c86   :  { %v4208_v47 = vmul.f32 %v9287_v60, %v4204_v14  ;;  %v4203_v54 = vmul.f32 0.35355338, %v4197_v22 }
0x1c88   :  { %v4207_v4 = vmul.f32 %v9231_v19, %v4203_v54 }
0x1c89   :  { %v4191_v17 = vpop.xlane.xlu1 %4190  ;;  %v4194_v12 = vpop.xlane.xlu0 %4193 }
0x1c8a   :  { %v4202_v48 = vmul.f32 0.35355338, %v4194_v12  ;;  %v4201_v27 = vmul.f32 0.35355338, %v4191_v17 }
0x1c8c   :  { %v4206_v0 = vmul.f32 %v9242_v56, %v4202_v48 }
0x1c91   :  { %v3887_v26 = vpop.xlane.xlu1 %3886 }
0x1c92   :  { %8089 = vrcp.f32 %v3887_v26 }
0x1c93   :  { %v3884_v8 = vpop.xlane.xlu0 %3883 }
0x1c94   :  { %8091 = vrcp.f32 %v3884_v8 }
0x1c95   :  { %v4091_v23 = vpop.permute.xlu1 %4090 }
0x1c97   :  { %v4093_v59 = vpop.permute.xlu0 %4092 }
0x1c98   :  { %7760 = vmatprep.subr.mxu0 %v4093_v59 }
0x1c99   :  { %7761 = vmatpush3.msra.mxu0 %v4093_v59 }
0x1c9a   :  { %7762 = vmatprep.subr.mxu0 %v4091_v23 }
0x1c9b   :  { %7763 = vmatpush3.msra.mxu0 %v4091_v23 }
0x1c9c   :  { %7767 = vmatprep.subr.mxu0 %v4208_v47 }
0x1c9f   :  { %v8090_v62 = vpop.eup %8089 }
0x1ca0   :  { %v3891_v41 = vmul.f32 %v8090_v62, %v8698_v37 }
0x1ca1   :  { %v8092_v25 = vpop.eup %8091 }
0x1ca2   :  { %v3890_v33 = vmul.f32 %v8092_v25, %v8702_v58  ;;  %v3893_v51 = vmul.f32 %v8086_v15, %v3891_v41  ;;  %v3594_v52 = vpop.permute.xlu0 %3593  ;;  %v4205_v15 = vmul.f32 %v9252_v49, %v4201_v27 }
0x1ca4   :  { %v3596_v31 = vpop.permute.xlu1 %3595  ;;  %v3892_v40 = vmul.f32 %v8088_v63, %v3890_v33 }
0x1ca5   :  { %7710 = vmatprep.subr.mxu1 %v3596_v31 }
0x1ca6   :  { %7711 = vmatpush3.msra.mxu1 %v3596_v31  ;;  %7764 = vmatprep.mubr.msk.f32.mxu0 %vm235_vm0, %v3892_v40 }
0x1ca7   :  { %7712 = vmatprep.subr.mxu1 %v3594_v52  ;;  %7765 = vmatmul.mubr.msk.f32.vlgmr.msra.gmra.mxu0 %vm235_vm0, %v3893_v51 }
0x1ca8   :  { %7768 = vmatpush3.msra.mxu0 %v4208_v47  ;;  %v3592_v28 = vpop.permute.xlu1 %3591  ;;  %7713 = vmatpush3.msra.mxu1 %v3594_v52  ;;  %v3590_v63 = vpop.permute.xlu0 %3589 }
0x1ca9   :  { %7769 = vmatprep.subr.mxu0 %v4207_v4  ;;  %7714 = vmatprep.subr.mxu1 %v3592_v28 }
0x1caa   :  { %7770 = vmatpush3.msra.mxu0 %v4207_v4  ;;  %7715 = vmatpush3.msra.mxu1 %v3592_v28 }
0x1cab   :  { %7771 = vmatprep.subr.mxu0 %v4206_v0  ;;  %7716 = vmatprep.subr.mxu1 %v3590_v63 }
0x1cac   :  { %7772 = vmatpush3.msra.mxu0 %v4206_v0  ;;  %7717 = vmatpush3.msra.mxu1 %v3590_v63 }
0x1cad   :  { %7773 = vmatprep.subr.mxu0 %v4205_v15  ;;  %7719 = vmatmul.mubr.msk.f32.vlgmr.msra.gmra.mxu1 %vm149_vm1, %v9259_v5 }
0x1cae   :  { %7739 = vmatprep.subr.mxu1 %v3893_v51  ;;  %7774 = vmatpush3.msra.mxu0 %v4205_v15 }
0x1caf   :  { %7775 = vmatprep.mubr.msk.f32.mxu0 %vm149_vm1, %v9235_v61  ;;  %7740 = vmatpush3.msra.mxu1 %v3893_v51 }
0x1cb0   :  { %7776 = vmatmul.mubr.msk.f32.vlgmr.msra.gmra.mxu0 %vm149_vm1, %v9259_v5  ;;  %7741 = vmatprep.subr.mxu1 %v3892_v40 }
0x1cb1   :  { %7742 = vmatpush3.msra.mxu1 %v3892_v40  ;;  %7743 = vmatprep.mubr.msk.f32.mxu1 %vm235_vm0, %v9331_v2 }
0x1cb2   :  { %7744 = vmatmul.mubr.msk.f32.vlgmr.msra.gmra.mxu1 %vm235_vm0, %v9338_v7 }
0x1cb3   :  { %7746 = vmatprep.mubr.msk.f32.mxu1 %vm235_vm0, %v9345_v42 }
0x1cb6   :  { %7747 = vmatmul.mubr.msk.f32.gmra.mxu1 %vm235_vm0, %v9352_v18 }
0x1cb7   :  { %7757 = vmatprep.mubr.msk.f32.mxu1 %vm149_vm1, %v9235_v61 }
0x1d67   :  { %v9358_v20 = vpop.f32.mrf.mxu0 }
0x1d69   :  { %v9362_v1 = vpop.f32.mrf.mxu0 }
0x1d6d   :  { %v9360_v9 = vpop.f32.mrf.mxu1 }
0x1d6f   :  { %v9364_v21 = vpop.f32.mrf.mxu1 }
0x1d70   :  { %v7777_v22 = vpop.f32.mrf.mxu0 }
0x1d71   :  { %v4281_v13 = vadd.f32 %v7777_v22, %v8675_v43 }
0x1d72   :  { %v4275_v17 = vpop.f32.mrf.mxu0  ;;  %v7745_v12 = vpop.f32.mrf.mxu1 }
0x1d73   :  { %v4276_v26 = vadd.f32 %v4275_v17, %v8677_v46  ;;  %v4287_v8 = vsel %vm235_vm0, %v4281_v13, -inf  ;;  %v3980_v25 = vmul.f32 %v9242_v56, %v7745_v12 }
0x1d74   :  { %4288 = vmax.xlane.f32.xlu1 %v4287_v8  ;;  %v3960_v14 = vpop.f32.mrf.mxu1 }
0x1d75   :  { %v4284_v59 = vsel %vm235_vm0, %v4276_v26, -inf  ;;  %v3979_v54 = vmul.f32 %v9252_v49, %v3960_v14  ;;  %v3986_v40 = vsel %vm235_vm0, %v3980_v25, 0.0 }
0x1d76   :  { %4285 = vmax.xlane.f32.xlu0 %v4284_v59  ;;  %v7748_v23 = vpop.f32.mrf.mxu1 }
0x1d77   :  { %v3982_v47 = vmul.f32 %v9287_v60, %v7748_v23  ;;  %v3983_v48 = vsel %vm235_vm0, %v3979_v54, 0.0 }
0x1d78   :  { %v3970_v62 = vpop.f32.mrf.mxu1 }
0x1d79   :  { %v3981_v41 = vmul.f32 %v9231_v19, %v3970_v62  ;;  %v3992_v33 = vsel %vm235_vm0, %v3982_v47, 0.0 }
0x1d7a   :  { %3993 = vadd.xlane.f32.xlu0 %v3992_v33 }
0x1d7b   :  { %v3989_v31 = vsel %vm235_vm0, %v3981_v41, 0.0 }
0x1d7c   :  { %3990 = vadd.xlane.f32.xlu1 %v3989_v31 }
0x1d7e   :  { %3987 = vadd.xlane.f32.xlu0 %v3986_v40 }
0x1d80   :  { %3984 = vadd.xlane.f32.xlu1 %v3983_v48 }
0x1dfd   :  { %v4289_v52 = vpop.xlane.xlu1 %4288 }
0x1dfe   :  { %v4291_v63 = vsub.f32 %v4281_v13, %v4289_v52 }
0x1dff   :  { %v4286_v51 = vpop.xlane.xlu0 %4285 }
0x1e00   :  { %v4294_v15 = vmul.f32 1.442695, %v4291_v63  ;;  %v4290_v22 = vsub.f32 %v4276_v26, %v4286_v51 }
0x1e02   :  { %8093 = vpow2.f32 %v4294_v15  ;;  %v4292_v17 = vmul.f32 1.442695, %v4290_v22 }
0x1e03   :  { %v3994_v4 = vpop.xlane.xlu0 %3993 }
0x1e04   :  { %v3998_v27 = vmul.f32 %v9105_v53, %v3994_v4  ;;  %8095 = vpow2.f32 %v4292_v17 }
0x1e05   :  { %v3991_v28 = vpop.xlane.xlu1 %3990 }
0x1e06   :  { %v3997_v0 = vmul.f32 %v3991_v28, %v9107_v55  ;;  %4009 = vrot.lane.b32.xlu0 %v3998_v27, %s8363_s20 }
0x1e07   :  { %v3988_v47 = vpop.xlane.xlu0 %3987 }
0x1e08   :  { %4007 = vrot.lane.b32.xlu1 %v3997_v0, %s8363_s20  ;;  %v3996_v25 = vmul.f32 %v9101_v36, %v3988_v47 }
0x1e09   :  { %v3985_v23 = vpop.xlane.xlu1 %3984 }
0x1e0a   :  { %v3995_v62 = vmul.f32 %v3985_v23, %v9103_v57 }
0x1e0f   :  { %v8094_v12 = vpop.eup %8093 }
0x1e10   :  { %v4299_v8 = vsel %vm235_vm0, %v8094_v12, 0.0 }
0x1e11   :  { %v8096_v14 = vpop.eup %8095 }
0x1e12   :  { %v4296_v59 = vsel %vm235_vm0, %v8096_v14, 0.0 }
0x1e25   :  { %4300 = vadd.xlane.f32.xlu0 %v4299_v8 }
0x1e2c   :  { %4297 = vadd.xlane.f32.xlu1 %v4296_v59 }
0x1e3b   :  { %4003 = vrot.lane.b32.xlu0 %v3995_v62, %s8363_s20 }
0x1e3d   :  { %4005 = vrot.lane.b32.xlu1 %v3996_v25, %s8363_s20 }
0x1e78   :  { %v4010_v13 = vpop.permute.xlu0 %4009 }
0x1e79   :  { %7749 = vmatprep.subr.mxu1 %v4010_v13 }
0x1e7a   :  { %v4008_v26 = vpop.permute.xlu1 %4007  ;;  %7750 = vmatpush3.msra.mxu1 %v4010_v13 }
0x1e7b   :  { %7751 = vmatprep.subr.mxu1 %v4008_v26 }
0x1e7c   :  { %7752 = vmatpush3.msra.mxu1 %v4008_v26 }
0x1eae   :  { %v4301_v41 = vpop.xlane.xlu0 %4300 }
0x1eaf   :  { %8097 = vrcp.f32 %v4301_v41 }
0x1eb2   :  { %v4004_v31 = vpop.permute.xlu0 %4003 }
0x1eb5   :  { %v4298_v33 = vpop.xlane.xlu1 %4297 }
0x1eb6   :  { %8099 = vrcp.f32 %v4298_v33 }
0x1eb9   :  { %v4006_v54 = vpop.permute.xlu1 %4005 }
0x1eba   :  { %7753 = vmatprep.subr.mxu1 %v4006_v54 }
0x1ebb   :  { %7754 = vmatpush3.msra.mxu1 %v4006_v54 }
0x1ebc   :  { %v8098_v40 = vpop.eup %8097  ;;  %7755 = vmatprep.subr.mxu1 %v4004_v31 }
0x1ebd   :  { %7756 = vmatpush3.msra.mxu1 %v4004_v31  ;;  %v4305_v48 = vmul.f32 %v8098_v40, %v8698_v37 }
0x1ebe   :  { %7758 = vmatmul.mubr.msk.f32.vlgmr.msra.gmra.mxu1 %vm149_vm1, %v9259_v5 }
0x1ebf   :  { %v9391_v51 = vmul.f32 %v8094_v12, %v4305_v48  ;;  %7782 = vmatprep.mubr.msk.f32.mxu1 %vm235_vm0, %v9331_v2 }
0x1ec1   :  { %7778 = vmatprep.subr.mxu1 %v9391_v51 }
0x1ec2   :  { %7779 = vmatpush3.msra.mxu1 %v9391_v51 }
0x1ec3   :  { %v8100_v52 = vpop.eup %8099 }
0x1ec4   :  { %v4304_v4 = vmul.f32 %v8100_v52, %v8702_v58 }
0x1ec6   :  { %v4306_v27 = vmul.f32 %v8096_v14, %v4304_v4 }
0x1ec8   :  { %7780 = vmatprep.subr.mxu1 %v4306_v27  ;;  %7803 = vmatprep.mubr.msk.f32.mxu0 %vm235_vm0, %v4306_v27 }
0x1ec9   :  { %7781 = vmatpush3.msra.mxu1 %v4306_v27 }
0x1eca   :  { %7783 = vmatmul.mubr.msk.f32.vlgmr.msra.gmra.mxu1 %vm235_vm0, %v9338_v7 }
0x1ecb   :  { %7785 = vmatprep.mubr.msk.f32.mxu1 %vm235_vm0, %v9345_v42 }
0x1ece   :  { %7786 = vmatmul.mubr.msk.f32.gmra.mxu1 %vm235_vm0, %v9352_v18 }
0x1ecf   :  { %7796 = vmatprep.mubr.msk.f32.mxu1 %vm149_vm1, %v9235_v61 }
0x1f7e   :  { %v7759_v28 = vpop.f32.mrf.mxu1 }
0x1f80   :  { %v4081_v0 = vpop.f32.mrf.mxu1 }
0x1f8a   :  { %v7784_v63 = vpop.f32.mrf.mxu1 }
0x1f8b   :  { %v4394_v23 = vmul.f32 %v9242_v56, %v7784_v63 }
0x1f8c   :  { %v4374_v15 = vpop.f32.mrf.mxu1 }
0x1f8d   :  { %v4393_v8 = vmul.f32 %v9252_v49, %v4374_v15  ;;  %v4400_v25 = vsel %vm235_vm0, %v4394_v23, 0.0 }
0x1f8e   :  { %v7787_v22 = vpop.f32.mrf.mxu1 }
0x1f8f   :  { %v4396_v17 = vmul.f32 %v9287_v60, %v7787_v22  ;;  %v4397_v62 = vsel %vm235_vm0, %v4393_v8, 0.0  ;;  %v3342_v8 = vadd.f32 %v9279_v3, %v9190_v29 }
0x1f90   :  { %v4384_v12 = vpop.f32.mrf.mxu1 }
0x1f91   :  { %v4395_v14 = vmul.f32 %v9231_v19, %v4384_v12  ;;  %v4406_v59 = vsel %vm235_vm0, %v4396_v17, 0.0 }
0x1f92   :  { %4407 = vadd.xlane.f32.xlu1 %v4406_v59  ;;  %v3337_v59 = vadd.f32 %v9281_v6, %v9192_v44 }
0x1f93   :  { %v4403_v47 = vsel %vm235_vm0, %v4395_v14, 0.0 }
0x1f94   :  { %4404 = vadd.xlane.f32.xlu0 %v4403_v47  ;;  %v6964_v47 = vld [vmem:[%s9945_s12 + $0x1] ss:$0 sm:$0xff] }
0x1f96   :  { %4398 = vadd.xlane.f32.xlu1 %v4397_v62 }
0x1f98   :  { %4401 = vadd.xlane.f32.xlu0 %v4400_v25 }
0x201b   :  { %v4408_v13 = vpop.xlane.xlu1 %4407 }
0x201c   :  { %v4412_v26 = vmul.f32 %v9105_v53, %v4408_v13  ;;  %v3755_v53 = vadd.f32 %v9265_v16, %v9364_v21  ;;  %v3760_v16 = vadd.f32 %v9263_v11, %v9360_v9  ;;  %v6974_v9 = vld [vmem:[%s9944_s11 + $0x20] sm:$0xff] }
0x201d   :  { %v4405_v41 = vpop.xlane.xlu0 %4404 }
0x201e   :  { %4423 = vrot.lane.b32.xlu0 %v4412_v26, %s8364_s6  ;;  %v4411_v31 = vmul.f32 %v4405_v41, %v9107_v55  ;;  %v6966_v55 = vld [vmem:[%s9946_s13 + $0x1] ss:$0 sm:$0xff] }
0x201f   :  { %v4399_v40 = vpop.xlane.xlu1 %4398 }
0x2020   :  { %v4409_v48 = vmul.f32 %v4399_v40, %v9103_v57  ;;  %v4174_v57 = vadd.f32 %v9358_v20, %v7759_v28  ;;  %v6975_v20 = vld [vmem:[%s9944_s11 + $0x28] sm:$0xff] }
0x2021   :  { %v4402_v33 = vpop.xlane.xlu0 %4401 }
0x2022   :  { %v4410_v54 = vmul.f32 %v9101_v36, %v4402_v33  ;;  %4506 = vrot.lane.b32.xlu0 %v9073_v10, %s8367_s4  ;;  %v4169_v36 = vadd.f32 %v9362_v1, %v4081_v0 }
0x2024   :  { %4419 = vrot.lane.b32.xlu1 %v4410_v54, %s8364_s6 }
0x2026   :  { %4504 = vrot.lane.b32.xlu0 %v9075_v24, %s8367_s4 }
0x2028   :  { %4421 = vrot.lane.b32.xlu1 %v4411_v31, %s8364_s6 }
0x202a   :  { %4593 = vrot.lane.b32.xlu0 %v3755_v53, %s8352_s19 }
0x202c   :  { %4417 = vrot.lane.b32.xlu1 %v4409_v48, %s8364_s6 }
0x202e   :  { %4601 = vrot.lane.b32.xlu0 %v4169_v36, %s8358_s30 }
0x2030   :  { %4644 = vrot.lane.b32.xlu1 %v6966_v55, %s8360_s26 }
0x2034   :  { %4595 = vrot.lane.b32.xlu1 %v3760_v16, %s8352_s19 }
0x2038   :  { %4603 = vrot.lane.b32.xlu1 %v4174_v57, %s8358_s30 }
0x2090   :  { %v4424_v1 = vpop.permute.xlu0 %4423 }
0x2091   :  { %7788 = vmatprep.subr.mxu1 %v4424_v1 }
0x2092   :  { %7789 = vmatpush3.msra.mxu1 %v4424_v1 }
0x2094   :  { %v4507_v21 = vpop.permute.xlu0 %4506 }
0x2095   :  { %7799 = vmatprep.subr.mxu0 %v4507_v21 }
0x2096   :  { %v4420_v52 = vpop.permute.xlu1 %4419  ;;  %7800 = vmatpush3.msra.mxu0 %v4507_v21 }
0x2098   :  { %v4505_v4 = vpop.permute.xlu0 %4504 }
0x2099   :  { %7801 = vmatprep.subr.mxu0 %v4505_v4 }
0x209a   :  { %v4422_v27 = vpop.permute.xlu1 %4421  ;;  %7802 = vmatpush3.msra.mxu0 %v4505_v4 }
0x209b   :  { %7790 = vmatprep.subr.mxu1 %v4422_v27  ;;  %7804 = vmatmul.mubr.msk.f32.vlgmr.msra.gmra.mxu0 %vm235_vm0, %v9391_v51 }
0x209c   :  { %7791 = vmatpush3.msra.mxu1 %v4422_v27  ;;  %v4594_v17 = vpop.permute.xlu0 %4593 }
0x209d   :  { %7792 = vmatprep.subr.mxu1 %v4420_v52  ;;  %v4615_v13 = vsel %vm851_vm2, %v3337_v59, %v4594_v17  ;;  %v6968_v17 = vld [vmem:[%s9942_s9 + $0x48] sm:$0xff] }
0x209e   :  { %v4418_v11 = vpop.permute.xlu1 %4417  ;;  %7793 = vmatpush3.msra.mxu1 %v4420_v52 }
0x209f   :  { %7794 = vmatprep.subr.mxu1 %v4418_v11 }
0x20a0   :  { %7795 = vmatpush3.msra.mxu1 %v4418_v11  ;;  %v4602_v14 = vpop.permute.xlu0 %4601 }
0x20a1   :  { %7797 = vmatmul.mubr.msk.f32.vlgmr.msra.gmra.mxu1 %vm149_vm1, %v9259_v5  ;;  %7817 = vmatprep.subr.mxu1 %v6975_v20  ;;  %v4617_v41 = vsel %vm235_vm0, %v4615_v13, %v4602_v14 }
0x20a2   :  { %7818 = vmatpush3.msra.mxu1 %v6975_v20  ;;  %7821 = vmatprep.mubr.msk.f32.mxu1 %vm235_vm0, %v8563_v34  ;;  %v4645_v0 = vpop.permute.xlu1 %4644 }
0x20a3   :  { %7819 = vmatprep.subr.mxu1 %v6974_v9 }
0x20a4   :  { %7820 = vmatpush3.msra.mxu1 %v6974_v9 }
0x20a5   :  { %7822 = vmatmul.mubr.msk.f32.vlgmr.msra.gmra.mxu1 %vm235_vm0, %v8561_v32  ;;  %v4648_v32 = vmul.f32 %v4645_v0, %v9073_v10 }
0x20a6   :  { %7824 = vmatprep.mubr.msk.f32.mxu1 %vm235_vm0, %v8571_v39  ;;  %v4647_v39 = vmul.f32 %v4645_v0, %v9075_v24 }
0x20a9   :  { %7825 = vmatmul.mubr.msk.f32.gmra.mxu1 %vm235_vm0, %v8567_v38  ;;  %v4596_v38 = vpop.permute.xlu1 %4595 }
0x20aa   :  { %7841 = vmatprep.mubr.msk.f32.mxu1 %vm235_vm0, %v9252_v49  ;;  %v4616_v23 = vsel %vm851_vm2, %v3342_v8, %v4596_v38  ;;  %v6969_v38 = vld [vmem:[%s9942_s9 + $0x50] sm:$0xff] }
0x20ad   :  { %v4604_v12 = vpop.permute.xlu1 %4603 }
0x20ae   :  { %v4618_v62 = vsel %vm235_vm0, %v4616_v23, %v4604_v12  ;;  %v6967_v12 = vld [vmem:[%s9942_s9 + $0x40] sm:$0xff] }
0x215b   :  { %v7805_v51 = vpop.f32.mrf.mxu0 }
0x215d   :  { %v4582_v15 = vpop.f32.mrf.mxu0 }
0x2161   :  { %v7798_v28 = vpop.f32.mrf.mxu1 }
0x2162   :  { %v4588_v63 = vadd.f32 %v7805_v51, %v7798_v28 }
0x2163   :  { %v4495_v34 = vpop.f32.mrf.mxu1 }
0x2164   :  { %v4583_v22 = vadd.f32 %v4582_v15, %v4495_v34  ;;  %4611 = vrot.lane.b32.xlu1 %v4588_v63, %s8368_s27 }
0x2166   :  { %4609 = vrot.lane.b32.xlu0 %v4583_v22, %s8368_s27 }
0x2168   :  { %4653 = vrot.lane.b32.xlu1 %v4648_v32, %s8369_s28 }
0x216a   :  { %4651 = vrot.lane.b32.xlu0 %v4647_v39, %s8369_s28  ;;  %v6970_v39 = vld [vmem:[%s9942_s9 + $0x58] sm:$0xff] }
0x216b   :  { %7806 = vmatprep.subr.mxu0 %v6970_v39 }
0x216c   :  { %7807 = vmatpush3.msra.mxu0 %v6970_v39 }
0x216d   :  { %7808 = vmatprep.subr.mxu0 %v6969_v38 }
0x216e   :  { %7809 = vmatpush3.msra.mxu0 %v6969_v38 }
0x216f   :  { %7810 = vmatprep.subr.mxu0 %v6968_v17 }
0x2170   :  { %7811 = vmatpush3.msra.mxu0 %v6968_v17 }
0x2171   :  { %7812 = vmatprep.subr.mxu0 %v6967_v12 }
0x2172   :  { %7813 = vmatpush3.msra.mxu0 %v6967_v12 }
0x21d6   :  { %v4612_v25 = vpop.permute.xlu1 %4611 }
0x21d7   :  { %v4620_v26 = vsel %vm2512_vm3, %v4618_v62, %v4612_v25 }
0x21d8   :  { %v4630_v29 = vmul.f32 %v6964_v47, %v4620_v26  ;;  %v4610_v3 = vpop.permute.xlu0 %4609 }
0x21d9   :  { %v4619_v33 = vsel %vm2512_vm3, %v4617_v41, %v4610_v3 }
0x21da   :  { %v4629_v44 = vmul.f32 %v6964_v47, %v4619_v33  ;;  %v4634_v6 = vsel %vm149_vm1, %v4630_v29, 0.0  ;;  %v4654_v53 = vpop.permute.xlu1 %4653 }
0x21db   :  { %4635 = vadd.xlane.f32.xlu0 %v4634_v6  ;;  %v4660_v48 = vsel %vm149_vm1, %v4654_v53, 0.0 }
0x21dc   :  { %v4652_v54 = vpop.permute.xlu0 %4651  ;;  %v4631_v40 = vsel %vm149_vm1, %v4629_v44, 0.0  ;;  %v9548_v44 = vpop.f32.mrf.mxu1 }
0x21dd   :  { %v4657_v31 = vsel %vm149_vm1, %v4652_v54, 0.0 }
0x21de   :  { %4658 = vadd.xlane.f32.xlu1 %v4657_v31  ;;  %v9550_v6 = vpop.f32.mrf.mxu1 }
0x21df   :  { %4632 = vadd.xlane.f32.xlu0 %v4631_v40 }
0x21e0   :  { %v9552_v54 = vpop.f32.mrf.mxu1 }
0x21e2   :  { %v9554_v40 = vpop.f32.mrf.mxu1 }
0x21e3   :  { %4661 = vadd.xlane.f32.xlu0 %v4660_v48 }
0x2264   :  { %v4636_v36 = vpop.xlane.xlu0 %4635 }
0x2267   :  { %v4659_v55 = vpop.xlane.xlu1 %4658 }
0x2268   :  { %v4633_v16 = vpop.xlane.xlu0 %4632 }
0x2269   :  { %v4663_v57 = vadd.f32 %v4659_v55, %v4633_v16 }
0x226b   :  { %v4665_v1 = vsub.f32 0.0, %v4663_v57 }
0x226c   :  { %v4662_v21 = vpop.xlane.xlu0 %4661 }
0x226d   :  { %v4667_v52 = vmul.f32 1.442695, %v4665_v1  ;;  %v4664_v4 = vadd.f32 %v4662_v21, %v4636_v36 }
0x226f   :  { %8101 = vpow2.f32 %v4667_v52  ;;  %v4666_v27 = vsub.f32 0.0, %v4664_v4 }
0x2271   :  { %v4669_v11 = vmul.f32 1.442695, %v4666_v27 }
0x2273   :  { %8103 = vpow2.f32 %v4669_v11 }
0x227c   :  { %v8102_v20 = vpop.eup %8101 }
0x227d   :  { %v4671_v9 = vadd.f32 1.0, %v8102_v20 }
0x227f   :  { %8105 = vrcp.f32 %v4671_v9 }
0x2280   :  { %v8104_v51 = vpop.eup %8103 }
0x2281   :  { %v4672_v28 = vadd.f32 1.0, %v8104_v51 }
0x2283   :  { %8107 = vrcp.f32 %v4672_v28 }
0x228c   :  { %v8106_v0 = vpop.eup %8105 }
0x228d   :  { %v4677_v63 = vsub.f32 1.0, %v8106_v0  ;;  %v4675_v8 = vmul.f32 %v8106_v0, %v9075_v24 }
0x228f   :  { %v4679_v15 = vmul.f32 %v4677_v63, %v4619_v33 }
0x2290   :  { %v8108_v34 = vpop.eup %8107 }
0x2291   :  { %4683 = vrot.lane.b32.xlu1 %v4679_v15, %s8360_s26  ;;  %v4678_v22 = vsub.f32 1.0, %v8108_v34  ;;  %v4676_v23 = vmul.f32 %v8108_v34, %v9073_v10 }
0x2293   :  { %v4680_v32 = vmul.f32 %v4678_v22, %v4620_v26 }
0x2295   :  { %4685 = vrot.lane.b32.xlu0 %v4680_v32, %s8360_s26 }
0x2303   :  { %v4684_v14 = vpop.permute.xlu1 %4683 }
0x2304   :  { %v4689_v59 = vadd.f32 %v4684_v14, %v4675_v8 }
0x2306   :  { %4693 = vrot.lane.b32.xlu1 %v4689_v59, %s8369_s28 }
0x2307   :  { %v4686_v47 = vpop.permute.xlu0 %4685 }
0x2308   :  { %v4690_v62 = vadd.f32 %v4686_v47, %v4676_v23 }
0x230a   :  { %4695 = vrot.lane.b32.xlu1 %v4690_v62, %s8369_s28 }
0x2378   :  { %v4694_v25 = vpop.permute.xlu1 %4693 }
0x2379   :  { %v9504_v13 = vadd.f32 %v4694_v25, %v2593_v30 }
0x237b   :  { %v4701_v26 = vmax.f32 %v9504_v13, 0.0 }
0x237c   :  { %v4696_v41 = vpop.permute.xlu1 %4695 }
0x237d   :  { %v9509_v24 = vadd.f32 %v4696_v41, %v2594_v45  ;;  %7814 = vmatprep.mubr.msk.f32.mxu0 %vm149_vm1, %v4701_v26 }
0x237f   :  { %v4702_v10 = vmax.f32 %v9509_v24, 0.0 }
0x2381   :  { %7815 = vmatmul.mubr.msk.f32.vlgmr.msra.gmra.mxu0 %vm149_vm1, %v4702_v10 }
0x2382   :  { %7831 = vmatprep.mubr.msk.f32.mxu0 %vm235_vm0, %v9331_v2 }
0x2441   :  { %v7816_v30 = vpop.f32.mrf.mxu0 }
0x2442   :  { %v9520_v29 = vadd.f32 %v7816_v30, %v6971_v50 }
0x2443   :  { %v4788_v35 = vpop.f32.mrf.mxu0 }
0x2444   :  { %v9522_v45 = vadd.f32 %v6971_v50, %v4788_v35  ;;  %4974 = vrot.lane.b32.xlu0 %v9520_v29, %s8360_s26  ;;  %7827 = vmatprep.subr.mxu0 %v9520_v29 }
0x2445   :  { %7828 = vmatpush3.msra.mxu0 %v9520_v29 }
0x2446   :  { %4972 = vrot.lane.b32.xlu1 %v9522_v45, %s8360_s26  ;;  %7829 = vmatprep.subr.mxu0 %v9522_v45 }
0x2447   :  { %7830 = vmatpush3.msra.mxu0 %v9522_v45 }
0x2448   :  { %7832 = vmatmul.mubr.msk.f32.vlgmr.msra.gmra.mxu0 %vm235_vm0, %v9338_v7 }
0x2449   :  { %7834 = vmatprep.mubr.msk.f32.mxu0 %vm235_vm0, %v9345_v42 }
0x244c   :  { %7835 = vmatmul.mubr.msk.f32.gmra.mxu0 %vm235_vm0, %v9352_v18 }
0x244d   :  { %7855 = vmatprep.mubr.msk.f32.mxu0 %vm149_vm1, %v9235_v61 }
0x24b6   :  { %v4975_v3 = vpop.permute.xlu0 %4974 }
0x24b7   :  { %7837 = vmatprep.subr.mxu1 %v4975_v3 }
0x24b8   :  { %7838 = vmatpush3.msra.mxu1 %v4975_v3  ;;  %v4973_v33 = vpop.permute.xlu1 %4972 }
0x24b9   :  { %7839 = vmatprep.subr.mxu1 %v4973_v33 }
0x24ba   :  { %7840 = vmatpush3.msra.mxu1 %v4973_v33 }
0x24bb   :  { %7842 = vmatmul.mubr.msk.f32.vlgmr.msra.gmra.mxu1 %vm235_vm0, %v9242_v56 }
0x24bc   :  { %7844 = vmatprep.mubr.msk.f32.mxu1 %vm235_vm0, %v9231_v19 }
0x24bf   :  { %7845 = vmatmul.mubr.msk.f32.gmra.mxu1 %vm235_vm0, %v9287_v60 }
0x24c0   :  { %7862 = vmatprep.mubr.msk.f32.mxu1 %vm235_vm0, %v9331_v2 }
0x2508   :  { %v7833_v31 = vpop.f32.mrf.mxu0 }
0x250a   :  { %v4951_v48 = vpop.f32.mrf.mxu0 }
0x250c   :  { %v7836_v55 = vpop.f32.mrf.mxu0 }
0x250e   :  { %v4961_v4 = vpop.f32.mrf.mxu0 }
0x257b   :  { %v7843_v53 = vpop.f32.mrf.mxu1 }
0x257c   :  { %v5050_v57 = vadd.f32 %v7843_v53, %v9548_v44 }
0x257d   :  { %v5044_v36 = vpop.f32.mrf.mxu1 }
0x257e   :  { %v9561_v27 = vmul.f32 %v7833_v31, %v5050_v57  ;;  %v5045_v11 = vadd.f32 %v5044_v36, %v9550_v6 }
0x257f   :  { %v7846_v16 = vpop.f32.mrf.mxu1 }
0x2580   :  { %v5060_v1 = vadd.f32 %v7846_v16, %v9552_v54  ;;  %v9570_v28 = vmul.f32 %v5045_v11, %v4951_v48  ;;  %v5070_v0 = vsel %vm851_vm2, %v9561_v27, 0.0  ;;  %v9614_v11 = vld [vmem:[%s9934_s1 + $0x8] sm:$0xff] }
0x2581   :  { %v5054_v21 = vpop.f32.mrf.mxu1 }
0x2582   :  { %v9558_v2 = vmul.f32 %v7836_v55, %v5060_v1  ;;  %v5055_v52 = vadd.f32 %v5054_v21, %v9554_v40  ;;  %v5067_v63 = vsel %vm851_vm2, %v9570_v28, 0.0 }
0x2584   :  { %v9564_v20 = vmul.f32 %v5055_v52, %v4961_v4  ;;  %v5076_v9 = vsel %vm851_vm2, %v9558_v2, 0.0 }
0x2585   :  { %5077 = vadd.xlane.f32.xlu0 %v5076_v9 }
0x2586   :  { %v5073_v51 = vsel %vm851_vm2, %v9564_v20, 0.0 }
0x2587   :  { %5074 = vadd.xlane.f32.xlu1 %v5073_v51 }
0x2589   :  { %5071 = vadd.xlane.f32.xlu0 %v5070_v0 }
0x258d   :  { %5068 = vadd.xlane.f32.xlu0 %v5067_v63 }
0x260e   :  { %v5078_v15 = vpop.xlane.xlu0 %5077 }
0x260f   :  { %v5082_v34 = vmul.f32 0.35355338, %v5078_v15 }
0x2610   :  { %v5075_v22 = vpop.xlane.xlu1 %5074 }
0x2611   :  { %v5086_v32 = vmul.f32 %v9287_v60, %v5082_v34  ;;  %v5081_v39 = vmul.f32 0.35355338, %v5075_v22  ;;  %v9628_v22 = vld [vmem:[%s9934_s1 + $0x10] sm:$0xff] }
0x2612   :  { %v5072_v38 = vpop.xlane.xlu0 %5071 }
0x2613   :  { %v5085_v17 = vmul.f32 %v9231_v19, %v5081_v39  ;;  %v5080_v12 = vmul.f32 0.35355338, %v5072_v38  ;;  %7847 = vmatprep.subr.mxu0 %v5086_v32 }
0x2614   :  { %7848 = vmatpush3.msra.mxu0 %v5086_v32 }
0x2615   :  { %v5084_v8 = vmul.f32 %v9242_v56, %v5080_v12  ;;  %7849 = vmatprep.subr.mxu0 %v5085_v17 }
0x2616   :  { %v5069_v14 = vpop.xlane.xlu0 %5068  ;;  %7850 = vmatpush3.msra.mxu0 %v5085_v17 }
0x2617   :  { %v5079_v59 = vmul.f32 0.35355338, %v5069_v14  ;;  %7851 = vmatprep.subr.mxu0 %v5084_v8 }
0x2618   :  { %7852 = vmatpush3.msra.mxu0 %v5084_v8 }
0x2619   :  { %v5083_v23 = vmul.f32 %v9252_v49, %v5079_v59 }
0x261b   :  { %7853 = vmatprep.subr.mxu0 %v5083_v23 }
0x261c   :  { %7854 = vmatpush3.msra.mxu0 %v5083_v23 }
0x261d   :  { %7856 = vmatmul.mubr.msk.f32.vlgmr.msra.gmra.mxu0 %vm149_vm1, %v9259_v5 }
0x261e   :  { %7876 = vmatprep.mubr.msk.f32.mxu0 %vm149_vm1, %v9235_v61 }
0x26dd   :  { %v7857_v19 = vpop.f32.mrf.mxu0 }
0x26de   :  { %v5159_v47 = vadd.f32 %v7857_v19, %v8675_v43 }
0x26df   :  { %v5153_v56 = vpop.f32.mrf.mxu0 }
0x26e0   :  { %v5154_v62 = vadd.f32 %v5153_v56, %v8677_v46  ;;  %v5165_v25 = vsel %vm235_vm0, %v5159_v47, -inf }
0x26e1   :  { %5166 = vmax.xlane.f32.xlu1 %v5165_v25 }
0x26e2   :  { %v5162_v41 = vsel %vm235_vm0, %v5154_v62, -inf }
0x26e3   :  { %5163 = vmax.xlane.f32.xlu0 %v5162_v41 }
0x276a   :  { %v5167_v49 = vpop.xlane.xlu1 %5166 }
0x276b   :  { %v5169_v50 = vsub.f32 %v5159_v47, %v5167_v49 }
0x276c   :  { %v5164_v30 = vpop.xlane.xlu0 %5163 }
0x276d   :  { %v5172_v35 = vmul.f32 1.442695, %v5169_v50  ;;  %v5168_v5 = vsub.f32 %v5154_v62, %v5164_v30 }
0x276f   :  { %8109 = vpow2.f32 %v5172_v35  ;;  %v5170_v3 = vmul.f32 1.442695, %v5168_v5 }
0x2771   :  { %8111 = vpow2.f32 %v5170_v3 }
0x277c   :  { %v8110_v61 = vpop.eup %8109 }
0x277d   :  { %v5177_v33 = vsel %vm235_vm0, %v8110_v61, 0.0 }
0x277e   :  { %v8112_v31 = vpop.eup %8111  ;;  %5178 = vadd.xlane.f32.xlu1 %v5177_v33 }
0x277f   :  { %v5174_v53 = vsel %vm235_vm0, %v8112_v31, 0.0 }
0x2780   :  { %5175 = vadd.xlane.f32.xlu0 %v5174_v53 }
0x278f   :  { %5463 = vrot.lane.b32.xlu1 %v9558_v2, %s8361_s5 }
0x2793   :  { %5459 = vrot.lane.b32.xlu1 %v9561_v27, %s8361_s5 }
0x2796   :  { %5461 = vrot.lane.b32.xlu0 %v9564_v20, %s8361_s5 }
0x2797   :  { %5457 = vrot.lane.b32.xlu1 %v9570_v28, %s8361_s5 }
0x2807   :  { %v5179_v48 = vpop.xlane.xlu1 %5178 }
0x2808   :  { %8113 = vrcp.f32 %v5179_v48 }
0x2809   :  { %v5176_v36 = vpop.xlane.xlu0 %5175 }
0x280a   :  { %8115 = vrcp.f32 %v5176_v36 }
0x280d   :  { %v5462_v12 = vpop.permute.xlu0 %5461 }
0x280e   :  { %v5475_v14 = vsel %vm851_vm2, %v5462_v12, 0.0 }
0x2815   :  { %v8114_v55 = vpop.eup %8113 }
0x2816   :  { %v5183_v16 = vmul.f32 %v8114_v55, %v8698_v37  ;;  %v9649_v55 = vld [vmem:[#allocation5 + $0x8] sm:$0xff] }
0x2817   :  { %v8116_v57 = vpop.eup %8115 }
0x2818   :  { %v9599_v1 = vmul.f32 %v8110_v61, %v5183_v16  ;;  %v5182_v21 = vmul.f32 %v8116_v57, %v8702_v58  ;;  %v9645_v61 = vld [vmem:[%s9934_s1 + $0x18] sm:$0xff]  ;;  %v9653_v57 = vld [vmem:[#allocation5] sm:$0xff] }
0x281a   :  { %7858 = vmatprep.subr.mxu1 %v9599_v1  ;;  %v5184_v52 = vmul.f32 %v8112_v31, %v5182_v21 }
0x281b   :  { %7859 = vmatpush3.msra.mxu1 %v9599_v1 }
0x281c   :  { %7860 = vmatprep.subr.mxu1 %v5184_v52 }
0x281d   :  { %7861 = vmatpush3.msra.mxu1 %v5184_v52 }
0x281e   :  { %7863 = vmatmul.mubr.msk.f32.vlgmr.msra.gmra.mxu1 %vm235_vm0, %v9338_v7  ;;  %v5464_v7 = vpop.permute.xlu1 %5463 }
0x281f   :  { %7865 = vmatprep.mubr.msk.f32.mxu1 %vm235_vm0, %v9345_v42  ;;  %v5478_v8 = vsel %vm851_vm2, %v5464_v7, 0.0 }
0x2822   :  { %7866 = vmatmul.mubr.msk.f32.gmra.mxu1 %vm235_vm0, %v9352_v18  ;;  %v9622_v18 = vld [vmem:[%s9934_s1] sm:$0xff]  ;;  %v5460_v38 = vpop.permute.xlu1 %5459 }
0x2823   :  { %7883 = vmatprep.mubr.msk.f32.mxu1 %vm235_vm0, %v5184_v52  ;;  %v5472_v23 = vsel %vm851_vm2, %v5460_v38, 0.0 }
0x2826   :  { %v5458_v59 = vpop.permute.xlu1 %5457 }
0x2827   :  { %v5469_v19 = vsel %vm851_vm2, %v5458_v59, 0.0 }
0x28de   :  { %v7864_v4 = vpop.f32.mrf.mxu1 }
0x28df   :  { %v5272_v9 = vmul.f32 %v9614_v11, %v7864_v4 }
0x28e0   :  { %v5252_v51 = vpop.f32.mrf.mxu1 }
0x28e1   :  { %v5278_v0 = vsel %vm235_vm0, %v5272_v9, 0.0  ;;  %v5271_v34 = vmul.f32 %v9622_v18, %v5252_v51 }
0x28e2   :  { %5279 = vadd.xlane.f32.xlu0 %v5278_v0  ;;  %v7867_v63 = vpop.f32.mrf.mxu1 }
0x28e3   :  { %v5274_v42 = vmul.f32 %v9287_v60, %v7867_v63  ;;  %v5275_v17 = vsel %vm235_vm0, %v5271_v34, 0.0 }
0x28e4   :  { %v5262_v15 = vpop.f32.mrf.mxu1 }
0x28e5   :  { %v5273_v32 = vmul.f32 %v9628_v22, %v5262_v15  ;;  %v5284_v39 = vsel %vm235_vm0, %v5274_v42, 0.0 }
0x28e6   :  { %5285 = vadd.xlane.f32.xlu0 %v5284_v39 }
0x28e7   :  { %v5281_v60 = vsel %vm235_vm0, %v5273_v32, 0.0 }
0x28e8   :  { %5282 = vadd.xlane.f32.xlu1 %v5281_v60 }
0x28ea   :  { %5276 = vadd.xlane.f32.xlu0 %v5275_v17 }
0x28ec   :  { %5479 = vadd.xlane.f32.xlu1 %v5478_v8 }
0x28ee   :  { %5476 = vadd.xlane.f32.xlu0 %v5475_v14 }
0x28f0   :  { %5473 = vadd.xlane.f32.xlu1 %v5472_v23 }
0x28f2   :  { %5470 = vadd.xlane.f32.xlu0 %v5469_v19 }
0x296b   :  { %v5280_v47 = vpop.xlane.xlu0 %5279 }
0x296c   :  { %v5288_v50 = vmul.f32 %v9548_v44, %v5280_v47 }
0x296f   :  { %v5286_v56 = vpop.xlane.xlu0 %5285 }
0x2970   :  { %v5290_v62 = vmul.f32 %v9552_v54, %v5286_v56 }
0x2971   :  { %v5283_v25 = vpop.xlane.xlu1 %5282 }
0x2972   :  { %v5289_v41 = vmul.f32 %v5283_v25, %v9554_v40  ;;  %7868 = vmatprep.subr.mxu0 %v5290_v62 }
0x2973   :  { %7869 = vmatpush3.msra.mxu0 %v5290_v62  ;;  %v5277_v49 = vpop.xlane.xlu0 %5276 }
0x2974   :  { %7870 = vmatprep.subr.mxu0 %v5289_v41  ;;  %v5287_v35 = vmul.f32 %v5277_v49, %v9550_v6 }
0x2975   :  { %v5480_v30 = vpop.xlane.xlu1 %5479  ;;  %7871 = vmatpush3.msra.mxu0 %v5289_v41 }
0x2976   :  { %v5484_v5 = vmul.f32 0.35355338, %v5480_v30  ;;  %7872 = vmatprep.subr.mxu0 %v5288_v50 }
0x2977   :  { %7873 = vmatpush3.msra.mxu0 %v5288_v50  ;;  %v5477_v3 = vpop.xlane.xlu0 %5476 }
0x2978   :  { %v5488_v33 = vmul.f32 %v9645_v61, %v5484_v5  ;;  %v5483_v31 = vmul.f32 0.35355338, %v5477_v3  ;;  %7874 = vmatprep.subr.mxu0 %v5287_v35 }
0x2979   :  { %v5474_v53 = vpop.xlane.xlu1 %5473  ;;  %7875 = vmatpush3.msra.mxu0 %v5287_v35 }
0x297a   :  { %v5487_v48 = vmul.f32 %v9628_v22, %v5483_v31  ;;  %v5482_v36 = vmul.f32 0.35355338, %v5474_v53  ;;  %7886 = vmatprep.subr.mxu0 %v5488_v33  ;;  %7877 = vmatmul.mubr.msk.f32.vlgmr.msra.gmra.mxu0 %vm149_vm1, %v9649_v55 }
0x297b   :  { %7887 = vmatpush3.msra.mxu0 %v5488_v33  ;;  %v5471_v16 = vpop.xlane.xlu0 %5470  ;;  %7894 = vmatprep.mubr.msk.f32.mxu0 %vm149_vm1, %v9653_v57 }
0x297c   :  { %v5486_v21 = vmul.f32 %v9614_v11, %v5482_v36  ;;  %v5481_v52 = vmul.f32 0.35355338, %v5471_v16  ;;  %7888 = vmatprep.subr.mxu0 %v5487_v48 }
0x297d   :  { %7889 = vmatpush3.msra.mxu0 %v5487_v48 }
0x297e   :  { %v5485_v4 = vmul.f32 %v9622_v18, %v5481_v52  ;;  %7890 = vmatprep.subr.mxu0 %v5486_v21 }
0x297f   :  { %7891 = vmatpush3.msra.mxu0 %v5486_v21 }
0x2980   :  { %7892 = vmatprep.subr.mxu0 %v5485_v4 }
0x2981   :  { %7893 = vmatpush3.msra.mxu0 %v5485_v4 }
0x2982   :  { %7895 = vmatmul.mubr.msk.f32.vlgmr.msra.gmra.mxu0 %vm149_vm1, %v9649_v55 }
0x2a3a   :  { %v9661_v9 = vpop.f32.mrf.mxu0 }
0x2a3c   :  { %v9663_v51 = vpop.f32.mrf.mxu0 }
0x2a42   :  { %v7896_v0 = vpop.f32.mrf.mxu0 }
0x2a43   :  { %v5561_v7 = vadd.f32 %v7896_v0, %v8675_v43 }
0x2a44   :  { %v5555_v63 = vpop.f32.mrf.mxu0 }
0x2a45   :  { %v5556_v42 = vadd.f32 %v5555_v63, %v8677_v46  ;;  %v5567_v15 = vsel %vm235_vm0, %v5561_v7, -inf  ;;  %v9698_v63 = vld [vmem:[%s9935_s2] sm:$0xff] }
0x2a46   :  { %5568 = vmax.xlane.f32.xlu0 %v5567_v15 }
0x2a47   :  { %v5564_v34 = vsel %vm235_vm0, %v5556_v42, -inf }
0x2a48   :  { %5565 = vmax.xlane.f32.xlu1 %v5564_v34 }
0x2a59   :  { %5877 = vrot.lane.b32.xlu1 %v9558_v2, %s8363_s20 }
0x2a5c   :  { %5875 = vrot.lane.b32.xlu0 %v9564_v20, %s8363_s20 }
0x2a5d   :  { %5873 = vrot.lane.b32.xlu1 %v9561_v27, %s8363_s20 }
0x2a61   :  { %5871 = vrot.lane.b32.xlu1 %v9570_v28, %s8363_s20 }
0x2acf   :  { %v5569_v32 = vpop.xlane.xlu0 %5568 }
0x2ad0   :  { %v5571_v39 = vsub.f32 %v5561_v7, %v5569_v32 }
0x2ad1   :  { %v5566_v60 = vpop.xlane.xlu1 %5565 }
0x2ad2   :  { %v5574_v38 = vmul.f32 1.442695, %v5571_v39  ;;  %v5570_v17 = vsub.f32 %v5556_v42, %v5566_v60 }
0x2ad3   :  { %v5876_v59 = vpop.permute.xlu0 %5875 }
0x2ad4   :  { %8117 = vpow2.f32 %v5574_v38  ;;  %v5572_v12 = vmul.f32 1.442695, %v5570_v17  ;;  %v5889_v19 = vsel %vm851_vm2, %v5876_v59, 0.0  ;;  %v9712_v17 = vld [vmem:[%s9935_s2 + $0x8] sm:$0xff] }
0x2ad5   :  { %v5878_v8 = vpop.permute.xlu1 %5877 }
0x2ad6   :  { %8119 = vpow2.f32 %v5572_v12  ;;  %v5892_v14 = vsel %vm851_vm2, %v5878_v8, 0.0  ;;  %v9719_v12 = vld [vmem:[%s9935_s2 + $0x10] sm:$0xff] }
0x2ad7   :  { %5893 = vadd.xlane.f32.xlu0 %v5892_v14  ;;  %v9727_v14 = vld [vmem:[%s9935_s2 + $0x18] sm:$0xff] }
0x2ad9   :  { %v5874_v23 = vpop.permute.xlu1 %5873 }
0x2ada   :  { %v5886_v47 = vsel %vm851_vm2, %v5874_v23, 0.0 }
0x2adb   :  { %5890 = vadd.xlane.f32.xlu0 %v5889_v19  ;;  %5887 = vadd.xlane.f32.xlu1 %v5886_v47 }
0x2add   :  { %v5872_v56 = vpop.permute.xlu1 %5871 }
0x2ade   :  { %v5883_v62 = vsel %vm851_vm2, %v5872_v56, 0.0 }
0x2adf   :  { %5884 = vadd.xlane.f32.xlu0 %v5883_v62 }
0x2ae1   :  { %v8118_v25 = vpop.eup %8117 }
0x2ae2   :  { %v5579_v41 = vsel %vm235_vm0, %v8118_v25, 0.0 }
0x2ae3   :  { %v8120_v49 = vpop.eup %8119  ;;  %5580 = vadd.xlane.f32.xlu1 %v5579_v41 }
0x2ae4   :  { %v5576_v50 = vsel %vm235_vm0, %v8120_v49, 0.0 }
0x2ae5   :  { %5577 = vadd.xlane.f32.xlu0 %v5576_v50 }
0x2af4   :  { %5786 = vrot.lane.b32.xlu1 %v9520_v29, %s8366_s16 }
0x2af8   :  { %5368 = vrot.lane.b32.xlu1 %v9520_v29, %s8362_s17 }
0x2afb   :  { %5784 = vrot.lane.b32.xlu0 %v9522_v45, %s8366_s16 }
0x2afc   :  { %5366 = vrot.lane.b32.xlu1 %v9522_v45, %s8362_s17 }
0x2b60   :  { %v5894_v30 = vpop.xlane.xlu0 %5893 }
0x2b61   :  { %v5898_v53 = vmul.f32 0.35355338, %v5894_v30 }
0x2b63   :  { %v5902_v16 = vmul.f32 %v9645_v61, %v5898_v53 }
0x2b64   :  { %v5891_v35 = vpop.xlane.xlu0 %5890  ;;  %v5888_v5 = vpop.xlane.xlu1 %5887 }
0x2b65   :  { %v5897_v34 = vmul.f32 0.35355338, %v5891_v35  ;;  %v5896_v39 = vmul.f32 0.35355338, %v5888_v5 }
0x2b67   :  { %v5900_v38 = vmul.f32 %v9614_v11, %v5896_v39 }
0x2b68   :  { %v5885_v3 = vpop.xlane.xlu0 %5884 }
0x2b69   :  { %v5895_v60 = vmul.f32 0.35355338, %v5885_v3 }
0x2b6b   :  { %v5899_v8 = vmul.f32 %v9622_v18, %v5895_v60 }
0x2b6c   :  { %v5581_v33 = vpop.xlane.xlu1 %5580 }
0x2b6d   :  { %8121 = vrcp.f32 %v5581_v33 }
0x2b6e   :  { %v5578_v31 = vpop.xlane.xlu0 %5577 }
0x2b6f   :  { %8123 = vrcp.f32 %v5578_v31 }
0x2b70   :  { %v5787_v48 = vpop.permute.xlu1 %5786 }
0x2b71   :  { %7918 = vmatprep.subr.mxu0 %v5787_v48 }
0x2b72   :  { %v5785_v36 = vpop.permute.xlu0 %5784  ;;  %7919 = vmatpush3.msra.mxu0 %v5787_v48 }
0x2b73   :  { %7920 = vmatprep.subr.mxu0 %v5785_v36 }
0x2b74   :  { %7921 = vmatpush3.msra.mxu0 %v5785_v36  ;;  %v5369_v21 = vpop.permute.xlu1 %5368 }
0x2b75   :  { %7879 = vmatprep.subr.mxu1 %v5369_v21  ;;  %7925 = vmatprep.subr.mxu0 %v5902_v16 }
0x2b76   :  { %7880 = vmatpush3.msra.mxu1 %v5369_v21 }
0x2b78   :  { %v5367_v52 = vpop.permute.xlu1 %5366 }
0x2b79   :  { %7881 = vmatprep.subr.mxu1 %v5367_v52 }
0x2b7a   :  { %v8122_v4 = vpop.eup %8121  ;;  %7882 = vmatpush3.msra.mxu1 %v5367_v52 }
0x2b7b   :  { %7884 = vmatmul.mubr.msk.f32.vlgmr.msra.gmra.mxu1 %vm235_vm0, %v9599_v1  ;;  %v5585_v0 = vmul.f32 %v8122_v4, %v8698_v37  ;;  %v5901_v1 = vmul.f32 %v9628_v22, %v5897_v34 }
0x2b7c   :  { %v8124_v7 = vpop.eup %8123  ;;  %7901 = vmatprep.mubr.msk.f32.mxu1 %vm235_vm0, %v9698_v63 }
0x2b7d   :  { %v5587_v42 = vmul.f32 %v8118_v25, %v5585_v0  ;;  %v5584_v15 = vmul.f32 %v8124_v7, %v8702_v58 }
0x2b7f   :  { %7897 = vmatprep.subr.mxu1 %v5587_v42  ;;  %v5586_v32 = vmul.f32 %v8120_v49, %v5584_v15 }
0x2b80   :  { %7898 = vmatpush3.msra.mxu1 %v5587_v42 }
0x2b81   :  { %7899 = vmatprep.subr.mxu1 %v5586_v32  ;;  %7922 = vmatprep.mubr.msk.f32.mxu0 %vm235_vm0, %v5586_v32 }
0x2b82   :  { %7900 = vmatpush3.msra.mxu1 %v5586_v32  ;;  %7923 = vmatmul.mubr.msk.f32.vlgmr.msra.gmra.mxu0 %vm235_vm0, %v5587_v42 }
0x2b83   :  { %7926 = vmatpush3.msra.mxu0 %v5902_v16  ;;  %7933 = vmatprep.mubr.msk.f32.mxu0 %vm149_vm1, %v9653_v57 }
0x2b84   :  { %7927 = vmatprep.subr.mxu0 %v5901_v1  ;;  %7902 = vmatmul.mubr.msk.f32.vlgmr.msra.gmra.mxu1 %vm235_vm0, %v9712_v17 }
0x2b85   :  { %7928 = vmatpush3.msra.mxu0 %v5901_v1  ;;  %7904 = vmatprep.mubr.msk.f32.mxu1 %vm235_vm0, %v9719_v12 }
0x2b86   :  { %7929 = vmatprep.subr.mxu0 %v5900_v38 }
0x2b87   :  { %7930 = vmatpush3.msra.mxu0 %v5900_v38 }
0x2b88   :  { %7931 = vmatprep.subr.mxu0 %v5899_v8  ;;  %7905 = vmatmul.mubr.msk.f32.gmra.mxu1 %vm235_vm0, %v9727_v14 }
0x2b89   :  { %7932 = vmatpush3.msra.mxu0 %v5899_v8  ;;  %7915 = vmatprep.mubr.msk.f32.mxu1 %vm149_vm1, %v9653_v57 }
0x2b8a   :  { %7934 = vmatmul.mubr.msk.f32.vlgmr.msra.gmra.mxu0 %vm149_vm1, %v9649_v55 }
0x2c3b   :  { %v9751_v49 = vpop.f32.mrf.mxu1 }
0x2c3d   :  { %v9753_v50 = vpop.f32.mrf.mxu1 }
0x2c42   :  { %v9735_v59 = vpop.f32.mrf.mxu0 }
0x2c44   :  { %v9737_v23 = vpop.f32.mrf.mxu0  ;;  %v7903_v30 = vpop.f32.mrf.mxu1 }
0x2c46   :  { %v5654_v35 = vpop.f32.mrf.mxu1 }
0x2c48   :  { %v7906_v5 = vpop.f32.mrf.mxu1 }
0x2c4a   :  { %v7935_v19 = vpop.f32.mrf.mxu0  ;;  %v5664_v3 = vpop.f32.mrf.mxu1 }
0x2c4b   :  { %v5975_v47 = vadd.f32 %v7935_v19, %v8675_v43  ;;  %v5675_v33 = vmul.f32 %v9628_v22, %v5664_v3 }
0x2c4c   :  { %v5969_v56 = vpop.f32.mrf.mxu0 }
0x2c4d   :  { %v5970_v62 = vadd.f32 %v5969_v56, %v8677_v46  ;;  %v5981_v25 = vsel %vm235_vm0, %v5975_v47, -inf }
0x2c4e   :  { %5982 = vmax.xlane.f32.xlu1 %v5981_v25 }
0x2c4f   :  { %v5978_v41 = vsel %vm235_vm0, %v5970_v62, -inf }
0x2c50   :  { %5979 = vmax.xlane.f32.xlu0 %v5978_v41 }
0x2c5f   :  { %6289 = vrot.lane.b32.xlu1 %v9564_v20, %s8364_s6  ;;  %v5676_v20 = vmul.f32 %v9645_v61, %v7906_v5 }
0x2c61   :  { %v5686_v31 = vsel %vm235_vm0, %v5676_v20, 0.0 }
0x2c63   :  { %6285 = vrot.lane.b32.xlu1 %v9570_v28, %s8364_s6  ;;  %v5683_v28 = vsel %vm235_vm0, %v5675_v33, 0.0 }
0x2c66   :  { %6291 = vrot.lane.b32.xlu0 %v9558_v2, %s8364_s6  ;;  %v5674_v2 = vmul.f32 %v9614_v11, %v7903_v30 }
0x2c68   :  { %v5680_v53 = vsel %vm235_vm0, %v5674_v2, 0.0 }
0x2c6a   :  { %6287 = vrot.lane.b32.xlu0 %v9561_v27, %s8364_s6  ;;  %v5673_v27 = vmul.f32 %v9622_v18, %v5654_v35 }
0x2c6c   :  { %v5677_v48 = vsel %vm235_vm0, %v5673_v27, 0.0 }
0x2c87   :  { %5684 = vadd.xlane.f32.xlu1 %v5683_v28 }
0x2c89   :  { %5687 = vadd.xlane.f32.xlu0 %v5686_v31 }
0x2c8d   :  { %5681 = vadd.xlane.f32.xlu0 %v5680_v53 }
0x2c91   :  { %5678 = vadd.xlane.f32.xlu0 %v5677_v48 }
0x2cd7   :  { %v5983_v36 = vpop.xlane.xlu1 %5982 }
0x2cd8   :  { %v5985_v16 = vsub.f32 %v5975_v47, %v5983_v36 }
0x2cd9   :  { %v5980_v21 = vpop.xlane.xlu0 %5979 }
0x2cda   :  { %v5988_v52 = vmul.f32 1.442695, %v5985_v16  ;;  %v5984_v4 = vsub.f32 %v5970_v62, %v5980_v21 }
0x2cdb   :  { %v6290_v0 = vpop.permute.xlu1 %6289 }
0x2cdc   :  { %8125 = vpow2.f32 %v5988_v52  ;;  %v5986_v7 = vmul.f32 1.442695, %v5984_v4  ;;  %v6303_v42 = vsel %vm851_vm2, %v6290_v0, 0.0 }
0x2cdd   :  { %v6292_v15 = vpop.permute.xlu0 %6291  ;;  %6304 = vadd.xlane.f32.xlu0 %v6303_v42 }
0x2cde   :  { %8127 = vpow2.f32 %v5986_v7  ;;  %v6306_v34 = vsel %vm851_vm2, %v6292_v15, 0.0 }
0x2cdf   :  { %6307 = vadd.xlane.f32.xlu1 %v6306_v34  ;;  %v6286_v32 = vpop.permute.xlu1 %6285 }
0x2ce0   :  { %v6297_v39 = vsel %vm851_vm2, %v6286_v32, 0.0 }
0x2ce1   :  { %v6288_v1 = vpop.permute.xlu0 %6287  ;;  %6298 = vadd.xlane.f32.xlu0 %v6297_v39 }
0x2ce2   :  { %v6300_v60 = vsel %vm851_vm2, %v6288_v1, 0.0 }
0x2ce3   :  { %6301 = vadd.xlane.f32.xlu1 %v6300_v60 }
0x2ce9   :  { %v8126_v38 = vpop.eup %8125 }
0x2cea   :  { %v5993_v8 = vsel %vm235_vm0, %v8126_v38, 0.0 }
0x2ceb   :  { %v8128_v19 = vpop.eup %8127  ;;  %5994 = vadd.xlane.f32.xlu0 %v5993_v8 }
0x2cec   :  { %v5990_v47 = vsel %vm235_vm0, %v8128_v19, 0.0 }
0x2ced   :  { %5991 = vadd.xlane.f32.xlu1 %v5990_v47 }
0x2cfe   :  { %6200 = vrot.lane.b32.xlu1 %v9520_v29, %s8365_s7 }
0x2d01   :  { %6198 = vrot.lane.b32.xlu0 %v9522_v45, %s8365_s7 }
0x2d10   :  { %v5685_v25 = vpop.xlane.xlu1 %5684 }
0x2d11   :  { %v5691_v30 = vmul.f32 %v5685_v25, %v9554_v40 }
0x2d12   :  { %v5688_v56 = vpop.xlane.xlu0 %5687 }
0x2d13   :  { %v5692_v62 = vmul.f32 %v9552_v54, %v5688_v56 }
0x2d15   :  { %5703 = vrot.lane.b32.xlu1 %v5692_v62, %s8361_s5 }
0x2d16   :  { %v5682_v41 = vpop.xlane.xlu0 %5681 }
0x2d17   :  { %v5690_v35 = vmul.f32 %v9548_v44, %v5682_v41 }
0x2d19   :  { %5699 = vrot.lane.b32.xlu0 %v5690_v35, %s8361_s5  ;;  %5701 = vrot.lane.b32.xlu1 %v5691_v30, %s8361_s5 }
0x2d1a   :  { %v5679_v5 = vpop.xlane.xlu0 %5678 }
0x2d1b   :  { %v5689_v3 = vmul.f32 %v5679_v5, %v9550_v6 }
0x2d1d   :  { %5697 = vrot.lane.b32.xlu1 %v5689_v3, %s8361_s5 }
0x2d66   :  { %v6305_v33 = vpop.xlane.xlu0 %6304 }
0x2d67   :  { %v6311_v7 = vmul.f32 0.35355338, %v6305_v33 }
0x2d68   :  { %v6308_v20 = vpop.xlane.xlu1 %6307 }
0x2d69   :  { %v6312_v53 = vmul.f32 0.35355338, %v6308_v20  ;;  %v6315_v39 = vmul.f32 %v9628_v22, %v6311_v7 }
0x2d6a   :  { %v6299_v28 = vpop.xlane.xlu0 %6298 }
0x2d6b   :  { %v6316_v16 = vmul.f32 %v9645_v61, %v6312_v53  ;;  %v6309_v1 = vmul.f32 0.35355338, %v6299_v28 }
0x2d6c   :  { %v6302_v31 = vpop.xlane.xlu1 %6301 }
0x2d6d   :  { %v6310_v34 = vmul.f32 0.35355338, %v6302_v31 }
0x2d6f   :  { %v6314_v8 = vmul.f32 %v9614_v11, %v6310_v34 }
0x2d74   :  { %v5995_v2 = vpop.xlane.xlu0 %5994 }
0x2d75   :  { %8129 = vrcp.f32 %v5995_v2 }
0x2d76   :  { %v5992_v27 = vpop.xlane.xlu1 %5991 }
0x2d77   :  { %8131 = vrcp.f32 %v5992_v27 }
0x2d78   :  { %v6199_v36 = vpop.permute.xlu0 %6198 }
0x2d7a   :  { %v6201_v48 = vpop.permute.xlu1 %6200 }
0x2d7b   :  { %7957 = vmatprep.subr.mxu0 %v6201_v48 }
0x2d7c   :  { %7958 = vmatpush3.msra.mxu0 %v6201_v48 }
0x2d7d   :  { %7959 = vmatprep.subr.mxu0 %v6199_v36 }
0x2d7e   :  { %7960 = vmatpush3.msra.mxu0 %v6199_v36 }
0x2d7f   :  { %7964 = vmatprep.subr.mxu0 %v6316_v16 }
0x2d82   :  { %v8130_v21 = vpop.eup %8129 }
0x2d83   :  { %v5999_v4 = vmul.f32 %v8130_v21, %v8698_v37 }
0x2d84   :  { %v8132_v52 = vpop.eup %8131 }
0x2d85   :  { %v5998_v0 = vmul.f32 %v8132_v52, %v8702_v58  ;;  %v6001_v32 = vmul.f32 %v8126_v38, %v5999_v4  ;;  %v6313_v38 = vmul.f32 %v9622_v18, %v6309_v1 }
0x2d87   :  { %v5704_v42 = vpop.permute.xlu1 %5703  ;;  %v6000_v15 = vmul.f32 %v8128_v19, %v5998_v0 }
0x2d88   :  { %7907 = vmatprep.subr.mxu1 %v5704_v42 }
0x2d89   :  { %7908 = vmatpush3.msra.mxu1 %v5704_v42  ;;  %7961 = vmatprep.mubr.msk.f32.mxu0 %vm235_vm0, %v6000_v15 }
0x2d8a   :  { %7962 = vmatmul.mubr.msk.f32.vlgmr.msra.gmra.mxu0 %vm235_vm0, %v6001_v32 }
0x2d8b   :  { %7965 = vmatpush3.msra.mxu0 %v6316_v16  ;;  %v5702_v60 = vpop.permute.xlu1 %5701  ;;  %7972 = vmatprep.mubr.msk.f32.mxu0 %vm149_vm1, %v9653_v57  ;;  %v5700_v19 = vpop.permute.xlu0 %5699 }
0x2d8c   :  { %7966 = vmatprep.subr.mxu0 %v6315_v39  ;;  %7909 = vmatprep.subr.mxu1 %v5702_v60 }
0x2d8d   :  { %7967 = vmatpush3.msra.mxu0 %v6315_v39  ;;  %7910 = vmatpush3.msra.mxu1 %v5702_v60 }
0x2d8e   :  { %7968 = vmatprep.subr.mxu0 %v6314_v8  ;;  %7911 = vmatprep.subr.mxu1 %v5700_v19 }
0x2d8f   :  { %7969 = vmatpush3.msra.mxu0 %v6314_v8  ;;  %7912 = vmatpush3.msra.mxu1 %v5700_v19  ;;  %v5698_v47 = vpop.permute.xlu1 %5697 }
0x2d90   :  { %7970 = vmatprep.subr.mxu0 %v6313_v38  ;;  %7913 = vmatprep.subr.mxu1 %v5698_v47 }
0x2d91   :  { %7971 = vmatpush3.msra.mxu0 %v6313_v38  ;;  %7914 = vmatpush3.msra.mxu1 %v5698_v47 }
0x2d92   :  { %7973 = vmatmul.mubr.msk.f32.vlgmr.msra.gmra.mxu0 %vm149_vm1, %v9649_v55  ;;  %7916 = vmatmul.mubr.msk.f32.vlgmr.msra.gmra.mxu1 %vm149_vm1, %v9649_v55 }
0x2d93   :  { %7936 = vmatprep.subr.mxu1 %v6001_v32  ;;  %7940 = vmatprep.mubr.msk.f32.mxu1 %vm235_vm0, %v9698_v63 }
0x2d94   :  { %7937 = vmatpush3.msra.mxu1 %v6001_v32 }
0x2d95   :  { %7938 = vmatprep.subr.mxu1 %v6000_v15 }
0x2d96   :  { %7939 = vmatpush3.msra.mxu1 %v6000_v15 }
0x2d97   :  { %7941 = vmatmul.mubr.msk.f32.vlgmr.msra.gmra.mxu1 %vm235_vm0, %v9712_v17 }
0x2d98   :  { %7943 = vmatprep.mubr.msk.f32.mxu1 %vm235_vm0, %v9719_v12 }
0x2d9b   :  { %7944 = vmatmul.mubr.msk.f32.gmra.mxu1 %vm235_vm0, %v9727_v14 }
0x2d9c   :  { %7954 = vmatprep.mubr.msk.f32.mxu1 %vm149_vm1, %v9653_v57 }
0x2e4a   :  { %v9805_v56 = vpop.f32.mrf.mxu0 }
0x2e4c   :  { %v9807_v62 = vpop.f32.mrf.mxu0 }
0x2e52   :  { %v7974_v25 = vpop.f32.mrf.mxu0  ;;  %v9809_v41 = vpop.f32.mrf.mxu1 }
0x2e53   :  { %v6389_v30 = vadd.f32 %v7974_v25, %v8675_v43 }
0x2e54   :  { %v6383_v35 = vpop.f32.mrf.mxu0  ;;  %v9812_v5 = vpop.f32.mrf.mxu1 }
0x2e55   :  { %v6384_v3 = vadd.f32 %v6383_v35, %v8677_v46  ;;  %v6395_v33 = vsel %vm235_vm0, %v6389_v30, -inf }
0x2e56   :  { %6396 = vmax.xlane.f32.xlu0 %v6395_v33 }
0x2e57   :  { %v7942_v20 = vpop.f32.mrf.mxu1  ;;  %v6392_v28 = vsel %vm235_vm0, %v6384_v3, -inf }
0x2e58   :  { %v6088_v31 = vmul.f32 %v9614_v11, %v7942_v20  ;;  %6393 = vmax.xlane.f32.xlu1 %v6392_v28 }
0x2e59   :  { %v6068_v2 = vpop.f32.mrf.mxu1 }
0x2e5a   :  { %v6094_v27 = vsel %vm235_vm0, %v6088_v31, 0.0  ;;  %v6087_v16 = vmul.f32 %v9622_v18, %v6068_v2 }
0x2e5b   :  { %v7945_v53 = vpop.f32.mrf.mxu1 }
0x2e5c   :  { %v6090_v43 = vmul.f32 %v9645_v61, %v7945_v53  ;;  %6095 = vadd.xlane.f32.xlu1 %v6094_v27  ;;  %v6091_v52 = vsel %vm235_vm0, %v6087_v16, 0.0 }
0x2e5d   :  { %v6078_v48 = vpop.f32.mrf.mxu1 }
0x2e5e   :  { %v6100_v36 = vsel %vm235_vm0, %v6090_v43, 0.0  ;;  %v6089_v46 = vmul.f32 %v9628_v22, %v6078_v48 }
0x2e5f   :  { %6101 = vadd.xlane.f32.xlu0 %v6100_v36 }
0x2e60   :  { %v6097_v21 = vsel %vm235_vm0, %v6089_v46, 0.0 }
0x2e63   :  { %6098 = vadd.xlane.f32.xlu0 %v6097_v21 }
0x2e67   :  { %6092 = vadd.xlane.f32.xlu0 %v6091_v52 }
0x2edf   :  { %v6397_v7 = vpop.xlane.xlu0 %6396 }
0x2ee0   :  { %v6399_v1 = vsub.f32 %v6389_v30, %v6397_v7 }
0x2ee1   :  { %v6394_v4 = vpop.xlane.xlu1 %6393 }
0x2ee2   :  { %v6398_v0 = vsub.f32 %v6384_v3, %v6394_v4  ;;  %v6402_v60 = vmul.f32 1.442695, %v6399_v1 }
0x2ee4   :  { %v6400_v42 = vmul.f32 1.442695, %v6398_v0 }
0x2ee5   :  { %v6096_v25 = vpop.xlane.xlu1 %6095 }
0x2ee6   :  { %8133 = vpow2.f32 %v6400_v42  ;;  %v6104_v35 = vmul.f32 %v9548_v44, %v6096_v25 }
0x2ee7   :  { %8135 = vpow2.f32 %v6402_v60 }
0x2ee8   :  { %v6102_v15 = vpop.xlane.xlu0 %6101 }
0x2ee9   :  { %v6106_v34 = vmul.f32 %v9552_v54, %v6102_v15 }
0x2eeb   :  { %6117 = vrot.lane.b32.xlu1 %v6106_v34, %s8363_s20 }
0x2eec   :  { %v6099_v8 = vpop.xlane.xlu0 %6098 }
0x2eed   :  { %v6105_v19 = vmul.f32 %v6099_v8, %v9554_v40 }
0x2ef0   :  { %v6093_v3 = vpop.xlane.xlu0 %6092 }
0x2ef1   :  { %v6103_v33 = vmul.f32 %v6093_v3, %v9550_v6 }
0x2ef3   :  { %v8134_v32 = vpop.eup %8133 }
0x2ef4   :  { %v6404_v39 = vsel %vm235_vm0, %v8134_v32, 0.0  ;;  %v8136_v38 = vpop.eup %8135 }
0x2ef5   :  { %6405 = vadd.xlane.f32.xlu0 %v6404_v39  ;;  %v6407_v47 = vsel %vm235_vm0, %v8136_v38, 0.0 }
0x2f0b   :  { %6115 = vrot.lane.b32.xlu0 %v6105_v19, %s8363_s20 }
0x2f0f   :  { %6408 = vadd.xlane.f32.xlu1 %v6407_v47 }
0x2f20   :  { %6113 = vrot.lane.b32.xlu1 %v6104_v35, %s8363_s20 }
0x2f24   :  { %6111 = vrot.lane.b32.xlu1 %v6103_v33, %s8363_s20 }
0x2f5d   :  { %v6118_v30 = vpop.permute.xlu1 %6117 }
0x2f5e   :  { %7946 = vmatprep.subr.mxu1 %v6118_v30 }
0x2f5f   :  { %7947 = vmatpush3.msra.mxu1 %v6118_v30 }
0x2f7e   :  { %v6406_v20 = vpop.xlane.xlu0 %6405 }
0x2f7f   :  { %8137 = vrcp.f32 %v6406_v20 }
0x2f82   :  { %v6116_v28 = vpop.permute.xlu0 %6115 }
0x2f83   :  { %7948 = vmatprep.subr.mxu1 %v6116_v28 }
0x2f84   :  { %7949 = vmatpush3.msra.mxu1 %v6116_v28 }
0x2f8c   :  { %v8138_v31 = vpop.eup %8137 }
0x2f8d   :  { %v6412_v2 = vmul.f32 %v8138_v31, %v8702_v58  ;;  %v5450_v31 = vadd.f32 %v9751_v49, %v9661_v9 }
0x2f8f   :  { %v6414_v27 = vmul.f32 %v8134_v32, %v6412_v2 }
0x2f91   :  { %8000 = vmatprep.mubr.msk.f32.mxu0 %vm235_vm0, %v6414_v27 }
0x2f98   :  { %v6409_v53 = vpop.xlane.xlu1 %6408 }
0x2f99   :  { %8139 = vrcp.f32 %v6409_v53 }
0x2f9c   :  { %v6114_v43 = vpop.permute.xlu1 %6113 }
0x2f9d   :  { %7950 = vmatprep.subr.mxu1 %v6114_v43 }
0x2f9e   :  { %7951 = vmatpush3.msra.mxu1 %v6114_v43  ;;  %v7029_v43 = vld [vmem:[%s9945_s12 + $0x2] ss:$0 sm:$0xff]  ;;  %s8370_s12 = smov [#allocation14]  }
0x2f9f   :  { %s6818_s20 = sshll.u32 %s8370_s12, 4  ;;  %s6819_s20 = int_to_ptr.vmem [resolvable:$true] %s6818_s20 }
0x2fa0   :  { %v6112_v48 = vpop.permute.xlu1 %6111  ;;  %p8324_p8 = scmp.lt.s32.totalorder %s6819_s20, %s6819_s20 }
0x2fa1   :  { %7952 = vmatprep.subr.mxu1 %v6112_v48 }
0x2fa2   :  { %7953 = vmatpush3.msra.mxu1 %v6112_v48 }
0x2fa3   :  { %7955 = vmatmul.mubr.msk.f32.vlgmr.msra.gmra.mxu1 %vm149_vm1, %v9649_v55 }
0x2fa4   :  { %7979 = vmatprep.mubr.msk.f32.mxu1 %vm235_vm0, %v9698_v63 }
0x2fa6   :  { %v8140_v36 = vpop.eup %8139 }
0x2fa7   :  { %v6413_v58 = vmul.f32 %v8140_v36, %v8698_v37 }
0x2fa9   :  { %v9842_v46 = vmul.f32 %v8136_v38, %v6413_v58 }
0x2fab   :  { %7975 = vmatprep.subr.mxu1 %v9842_v46 }
0x2fac   :  { %7976 = vmatpush3.msra.mxu1 %v9842_v46 }
0x2fad   :  { %7977 = vmatprep.subr.mxu1 %v6414_v27 }
0x2fae   :  { %7978 = vmatpush3.msra.mxu1 %v6414_v27  ;;  %v5445_v27 = vadd.f32 %v9753_v50, %v9663_v51 }
0x2faf   :  { %7980 = vmatmul.mubr.msk.f32.vlgmr.msra.gmra.mxu1 %vm235_vm0, %v9712_v17 }
0x2fb0   :  { %7982 = vmatprep.mubr.msk.f32.mxu1 %vm235_vm0, %v9719_v12 }
0x2fb3   :  { %7983 = vmatmul.mubr.msk.f32.gmra.mxu1 %vm235_vm0, %v9727_v14 }
0x2fb4   :  { %7993 = vmatprep.mubr.msk.f32.mxu1 %vm149_vm1, %v9653_v57 }
0x3063   :  { %v7956_v37 = vpop.f32.mrf.mxu1 }
0x3065   :  { %v6189_v63 = vpop.f32.mrf.mxu1 }
0x3066   :  { %v6277_v60 = vadd.f32 %v9807_v62, %v6189_v63 }
0x306f   :  { %v7981_v16 = vpop.f32.mrf.mxu1 }
0x3070   :  { %v6502_v7 = vmul.f32 %v9614_v11, %v7981_v16 }
0x3071   :  { %v6482_v21 = vpop.f32.mrf.mxu1 }
0x3072   :  { %v6501_v57 = vmul.f32 %v9622_v18, %v6482_v21  ;;  %v6508_v42 = vsel %vm235_vm0, %v6502_v7, 0.0 }
0x3073   :  { %v7984_v52 = vpop.f32.mrf.mxu1 }
0x3074   :  { %v6504_v4 = vmul.f32 %v9645_v61, %v7984_v52  ;;  %v6505_v15 = vsel %vm235_vm0, %v6501_v57, 0.0 }
0x3075   :  { %v6492_v0 = vpop.f32.mrf.mxu1 }
0x3076   :  { %v6503_v17 = vmul.f32 %v9628_v22, %v6492_v0  ;;  %v6514_v12 = vsel %vm235_vm0, %v6504_v4, 0.0 }
0x3077   :  { %6515 = vadd.xlane.f32.xlu0 %v6514_v12 }
0x3078   :  { %v6511_v14 = vsel %vm235_vm0, %v6503_v17, 0.0 }
0x3079   :  { %6512 = vadd.xlane.f32.xlu1 %v6511_v14 }
0x307b   :  { %6509 = vadd.xlane.f32.xlu0 %v6508_v42 }
0x307f   :  { %6506 = vadd.xlane.f32.xlu0 %v6505_v15 }
0x3100   :  { %v6516_v61 = vpop.xlane.xlu0 %6515 }
0x3101   :  { %v6520_v18 = vmul.f32 %v9552_v54, %v6516_v61  ;;  %v6282_v54 = vadd.f32 %v9805_v56, %v7956_v37 }
0x3102   :  { %v6513_v34 = vpop.xlane.xlu1 %6512 }
0x3103   :  { %v6519_v11 = vmul.f32 %v6513_v34, %v9554_v40  ;;  %v7031_v40 = vld [vmem:[%s9946_s13 + $0x2] ss:$0 sm:$0xff] }
0x3104   :  { %v6510_v32 = vpop.xlane.xlu0 %6509 }
0x3105   :  { %v6518_v22 = vmul.f32 %v9548_v44, %v6510_v32  ;;  %6529 = vrot.lane.b32.xlu0 %v6519_v11, %s8364_s6  ;;  %v5868_v44 = vadd.f32 %v9735_v59, %v9809_v41 }
0x3107   :  { %6527 = vrot.lane.b32.xlu1 %v6518_v22, %s8364_s6 }
0x3108   :  { %v6507_v39 = vpop.xlane.xlu0 %6506 }
0x3109   :  { %v6517_v1 = vmul.f32 %v6507_v39, %v9550_v6  ;;  %v5863_v6 = vadd.f32 %v9737_v23, %v9812_v5 }
0x310b   :  { %6531 = vrot.lane.b32.xlu1 %v6520_v18, %s8364_s6  ;;  %6525 = vrot.lane.b32.xlu0 %v6517_v1, %s8364_s6 }
0x310f   :  { %6614 = vrot.lane.b32.xlu1 %v9520_v29, %s8367_s4  ;;  %6752 = vrot.lane.b32.xlu0 %v7031_v40, %s8360_s26 }
0x3113   :  { %6612 = vrot.lane.b32.xlu1 %v9522_v45, %s8367_s4  ;;  %6703 = vrot.lane.b32.xlu0 %v5868_v44, %s8352_s19 }
0x3117   :  { %6701 = vrot.lane.b32.xlu1 %v5863_v6, %s8352_s19  ;;  %6711 = vrot.lane.b32.xlu0 %v6282_v54, %s8358_s30 }
0x311b   :  { %6709 = vrot.lane.b32.xlu1 %v6277_v60, %s8358_s30 }
0x3177   :  { %v6530_v41 = vpop.permute.xlu0 %6529 }
0x3179   :  { %v6528_v8 = vpop.permute.xlu1 %6527 }
0x317d   :  { %v6532_v59 = vpop.permute.xlu1 %6531  ;;  %v6526_v23 = vpop.permute.xlu0 %6525 }
0x317e   :  { %7985 = vmatprep.subr.mxu1 %v6532_v59 }
0x317f   :  { %7986 = vmatpush3.msra.mxu1 %v6532_v59 }
0x3180   :  { %7987 = vmatprep.subr.mxu1 %v6530_v41 }
0x3181   :  { %7988 = vmatpush3.msra.mxu1 %v6530_v41  ;;  %v6615_v19 = vpop.permute.xlu1 %6614  ;;  %v6753_v38 = vpop.permute.xlu0 %6752 }
0x3182   :  { %7989 = vmatprep.subr.mxu1 %v6528_v8  ;;  %7996 = vmatprep.subr.mxu0 %v6615_v19  ;;  %v6756_v33 = vmul.f32 %v6753_v38, %v9520_v29  ;;  %v6755_v30 = vmul.f32 %v6753_v38, %v9522_v45 }
0x3183   :  { %7990 = vmatpush3.msra.mxu1 %v6528_v8  ;;  %7997 = vmatpush3.msra.mxu0 %v6615_v19 }
0x3184   :  { %7991 = vmatprep.subr.mxu1 %v6526_v23 }
0x3185   :  { %7992 = vmatpush3.msra.mxu1 %v6526_v23  ;;  %v6613_v56 = vpop.permute.xlu1 %6612 }
0x3186   :  { %7998 = vmatprep.subr.mxu0 %v6613_v56  ;;  %7994 = vmatmul.mubr.msk.f32.vlgmr.msra.gmra.mxu1 %vm149_vm1, %v9649_v55  ;;  %v6704_v55 = vpop.permute.xlu0 %6703 }
0x3187   :  { %7999 = vmatpush3.msra.mxu0 %v6613_v56  ;;  %v6724_v53 = vsel %vm851_vm2, %v5450_v31, %v6704_v55 }
0x3188   :  { %8001 = vmatmul.mubr.msk.f32.vlgmr.msra.gmra.mxu0 %vm235_vm0, %v9842_v46 }
0x3189   :  { %v6702_v20 = vpop.permute.xlu1 %6701 }
0x318a   :  { %v6712_v28 = vpop.permute.xlu0 %6711  ;;  %v6723_v58 = vsel %vm851_vm2, %v5445_v27, %v6702_v20 }
0x318b   :  { %v6726_v48 = vsel %vm235_vm0, %v6724_v53, %v6712_v28 }
0x318d   :  { %v6710_v2 = vpop.permute.xlu1 %6709 }
0x318e   :  { %v6725_v37 = vsel %vm235_vm0, %v6723_v58, %v6710_v2 }
0x3246   :  { %v7995_v62 = vpop.f32.mrf.mxu1 }
0x3248   :  { %v8002_v5 = vpop.f32.mrf.mxu0  ;;  %v6603_v25 = vpop.f32.mrf.mxu1 }
0x3249   :  { %v6696_v47 = vadd.f32 %v8002_v5, %v7995_v62 }
0x324a   :  { %v6690_v35 = vpop.f32.mrf.mxu0 }
0x324b   :  { %v6691_v3 = vadd.f32 %v6690_v35, %v6603_v25  ;;  %6719 = vrot.lane.b32.xlu0 %v6696_v47, %s8368_s27 }
0x324d   :  { %6717 = vrot.lane.b32.xlu1 %v6691_v3, %s8368_s27 }
0x324f   :  { %6761 = vrot.lane.b32.xlu0 %v6756_v33, %s8369_s28 }
0x3251   :  { %6759 = vrot.lane.b32.xlu1 %v6755_v30, %s8369_s28 }
0x32bd   :  { %v6720_v36 = vpop.permute.xlu0 %6719 }
0x32be   :  { %v6728_v46 = vsel %vm2512_vm3, %v6726_v48, %v6720_v36 }
0x32bf   :  { %v6738_v9 = vmul.f32 %v7029_v43, %v6728_v46  ;;  %v6718_v49 = vpop.permute.xlu1 %6717 }
0x32c0   :  { %v6727_v63 = vsel %vm2512_vm3, %v6725_v37, %v6718_v49 }
0x32c1   :  { %v6737_v51 = vmul.f32 %v7029_v43, %v6727_v63  ;;  %v6742_v50 = vsel %vm149_vm1, %v6738_v9, 0.0  ;;  %v6762_v52 = vpop.permute.xlu0 %6761 }
0x32c2   :  { %6743 = vadd.xlane.f32.xlu0 %v6742_v50  ;;  %v6768_v0 = vsel %vm149_vm1, %v6762_v52, 0.0 }
0x32c3   :  { %v6760_v16 = vpop.permute.xlu1 %6759  ;;  %v6739_v21 = vsel %vm149_vm1, %v6737_v51, 0.0 }
0x32c4   :  { %v6765_v4 = vsel %vm149_vm1, %v6760_v16, 0.0  ;;  %6740 = vadd.xlane.f32.xlu1 %v6739_v21 }
0x32c6   :  { %6766 = vadd.xlane.f32.xlu0 %v6765_v4 }
0x32c8   :  { %6769 = vadd.xlane.f32.xlu1 %v6768_v0 }
0x334b   :  { %v6744_v7 = vpop.xlane.xlu0 %6743 }
0x334d   :  { %v6741_v17 = vpop.xlane.xlu1 %6740 }
0x334f   :  { %v6767_v12 = vpop.xlane.xlu0 %6766 }
0x3350   :  { %v6771_v14 = vadd.f32 %v6767_v12, %v6741_v17 }
0x3351   :  { %v6770_v57 = vpop.xlane.xlu1 %6769 }
0x3352   :  { %v6773_v42 = vsub.f32 0.0, %v6771_v14  ;;  %v6772_v15 = vadd.f32 %v6770_v57, %v6744_v7 }
0x3354   :  { %v6775_v61 = vmul.f32 1.442695, %v6773_v42  ;;  %v6774_v34 = vsub.f32 0.0, %v6772_v15 }
0x3356   :  { %8141 = vpow2.f32 %v6775_v61  ;;  %v6777_v11 = vmul.f32 1.442695, %v6774_v34 }
0x3358   :  { %8143 = vpow2.f32 %v6777_v11 }
0x3363   :  { %v8142_v32 = vpop.eup %8141 }
0x3364   :  { %v6779_v22 = vadd.f32 1.0, %v8142_v32 }
0x3365   :  { %v8144_v39 = vpop.eup %8143 }
0x3366   :  { %8145 = vrcp.f32 %v6779_v22  ;;  %v6780_v18 = vadd.f32 1.0, %v8144_v39 }
0x3368   :  { %8147 = vrcp.f32 %v6780_v18 }
0x3373   :  { %v8146_v1 = vpop.eup %8145 }
0x3374   :  { %v6785_v40 = vsub.f32 1.0, %v8146_v1  ;;  %v6783_v8 = vmul.f32 %v8146_v1, %v9522_v45 }
0x3375   :  { %v8148_v44 = vpop.eup %8147 }
0x3376   :  { %v6787_v6 = vmul.f32 %v6785_v40, %v6727_v63  ;;  %v6786_v54 = vsub.f32 1.0, %v8148_v44  ;;  %v6784_v19 = vmul.f32 %v8148_v44, %v9520_v29 }
0x3378   :  { %6791 = vrot.lane.b32.xlu0 %v6787_v6, %s8360_s26  ;;  %v6788_v60 = vmul.f32 %v6786_v54, %v6728_v46 }
0x337a   :  { %6793 = vrot.lane.b32.xlu1 %v6788_v60, %s8360_s26  ;;  %s8319_s26 = scalar_lea.vmem %s6819_s20, 256 }
0x337b   :  { %p8320_p7 = scmp.ne.s32.totalorder %s6819_s20, %s8319_s26  ;;  %p8325_p9 = scmp.lt.s32.totalorder %s8319_s26, %s8319_s26 }
0x337d   :  { %p8326_p10 = por %p8325_p9, %p8324_p8 }
0x337f   :  { %p8327_p11 = pnand %p8326_p10, %p8320_p7 }
0x33ea   :  { %v6792_v59 = vpop.permute.xlu0 %6791 }
0x33eb   :  { %v6797_v41 = vadd.f32 %v6792_v59, %v6783_v8 }
0x33ec   :  { %v6794_v23 = vpop.permute.xlu1 %6793 }
0x33ed   :  { %v6798_v56 = vadd.f32 %v6794_v23, %v6784_v19  ;;  %6801 = vrot.lane.b32.xlu1 %v6797_v41, %s8369_s28 }
0x33ef   :  { %6803 = vrot.lane.b32.xlu0 %v6798_v56, %s8369_s28 }
0x345f   :  { %v6802_v62 = vpop.permute.xlu1 %6801 }
0x3460   :  { %v6807_v5 = vadd.f32 %v6802_v62, %v4701_v26 }
0x3461   :  { %v6804_v38 = vpop.permute.xlu0 %6803 }
0x3462   :  { %v6809_v47 = vmax.f32 %v6807_v5, 0.0  ;;  %v6808_v45 = vadd.f32 %v6804_v38, %v4702_v10 }
0x3464   :  { %6811 = vst.msk [vmem:[#allocation14] sm:$0xff] %vm149_vm1, %v6809_v47  ;;  %v6810_v29 = vmax.f32 %v6808_v45, 0.0 }
0x3466   :  { %6812 = vst.msk [vmem:[#allocation14 + $0x8] sm:$0xff] %vm149_vm1, %v6810_v29 }
0x3467   :  { %8330 = shalt.err (!%p8327_p11)
}
0x3468   :  { %6824 = dma.vmem_to_hbm [thread:$0]  %s6819_s20, 256, %s9947_s14, [#allocation4], %s8351_s18, %s8351_s18, %s8352_s19  }
0x3469   :  { %8347 = dma.done.wait [#allocation4], 256  }
0x346a   :  { %8348 = vsyncadd [#allocation4], 4294967040 }
0x346b   :  { %6828 = vsyncpa [#allocation3], 1 }
0x346c   :  { %6829 = vsyncpa [#allocation6], 1 }
0x346d   :  { %6830 = vsyncpa [#allocation9], 1 }
0x346e   :  { %6831 = vsyncpa [#allocation12], 1 }
0x346f   :  { %6832 = vsyncpa [#allocation4], 1 }

</bundles_post_ra>
